<compile_context>
chip_gen: v7x
topology: tpu7x:2x2x1
jax: 0.10.0
libtpu: 0.0.40
codegen_flags: <defaults>
</compile_context>

<pallas_src>
import functools

import jax
import jax.numpy as jnp
from jax.experimental import pallas as pl
from jax.experimental.pallas import tpu as pltpu


# ----------------------------- shared math ---------------------------------
def _lipswish(x):
    return 0.909 * x * jax.nn.sigmoid(x)


def _mlp(x, Ws, bs, final_tanh):
    n = len(Ws)
    for i in range(n):
        x = jnp.dot(x, Ws[i], preferred_element_type=jnp.float32) + bs[i]
        if i < n - 1:
            x = _lipswish(x)
    if final_tanh:
        x = jnp.tanh(x)
    return x


def _round_up(x, m):
    return ((x + m - 1) // m) * m


# ------------------------------- kernel -------------------------------------
def _disc_kernel(n_init, n_func, hidden, data, unroll,
                 y0_ref, dy_ref, tb_ref, *refs):
    out_ref = refs[-1]
    prefs = refs[:-1]

    # Unpack weights once (hoisted; whole-array VMEM blocks with constant
    # index_maps, so no per-grid-step re-DMA).
    idx = 0
    init_W, init_b = [], []
    for _ in range(n_init):
        init_W.append(prefs[idx][...])
        init_b.append(prefs[idx + 1][...])
        idx += 2
    Wh = prefs[idx][...]            # (hidden, mlp) hidden rows of first func layer
    idx += 1
    func_W, func_b = [], []
    for _ in range(n_func - 1):     # middle layers + (permuted) last layer
        func_W.append(prefs[idx][...])
        func_b.append(prefs[idx + 1][...])
        idx += 2
    W_r = prefs[idx][...]           # (hidden, 1)

    Tm1 = dy_ref.shape[0]

    # h0 = initial MLP on Y(0)
    h0 = _mlp(y0_ref[...], init_W, init_b, final_tanh=False)   # (bb, hidden)

    def vector_field(t_bias, h):
        # First func layer with t folded into the bias (no concat, no scalar mul).
        x = jnp.dot(h, Wh, preferred_element_type=jnp.float32) + t_bias
        x = _lipswish(x)
        n = len(func_W)
        for i in range(n):
            x = jnp.dot(x, func_W[i], preferred_element_type=jnp.float32) + func_b[i]
            if i < n - 1:
                x = _lipswish(x)
        return jnp.tanh(x)   # (bb, (1+data)*hidden) in c*hidden+h layout

    def contract(f, dy):
        # sum_c f[:, c*hidden:(c+1)*hidden] * dY_c  (dy unexpanded: (bb, 1+data))
        acc = f[:, 0:hidden] * dy[:, 0:1]
        for c in range(1, 1 + data):
            acc = acc + f[:, c * hidden:(c + 1) * hidden] * dy[:, c:c + 1]
        return acc           # (bb, hidden)

    def step(n, h):
        dy = dy_ref[n]                       # (bb, 1+data)
        tb = tb_ref[n]                       # (2, mlp): biases at t_n, t_n+0.5
        k1 = contract(vector_field(tb[0:1, :], h), dy)
        return h + contract(vector_field(tb[1:2, :], h + 0.5 * k1), dy)

    hT = jax.lax.fori_loop(0, Tm1, step, h0, unroll=unroll)

    # Per-row readout (bias + mean applied exactly in the wrapper).
    out_ref[...] = jnp.dot(hT, W_r, preferred_element_type=jnp.float32)


# ------------------------------ wrapper --------------------------------------
def discriminator_forward(ys_coeffs, params, block_b=256):
    """ys_coeffs: (B, T, 1 + data_size) float32 (PyTorch layout). Returns scalar."""
    B, T, C = ys_coeffs.shape
    assert T >= 2, "need at least two interpolation knots"
    data_size = C - 1
    W_r, b_r = params["readout"]
    hidden_size = W_r.shape[0]
    Tm1 = T - 1

    # --- batch tiling -------------------------------------------------------
    bb = min(_round_up(block_b, 8), _round_up(B, 8))
    B_pad = _round_up(B, bb)
    num_blocks = B_pad // bb

    # --- data prep (plain XLA, one-time) ------------------------------------
    y0 = ys_coeffs[:, 0, :]                                     # (B, C)
    dY = ys_coeffs[:, 1:, :] - ys_coeffs[:, :-1, :]             # (B, T-1, C)
    dY = jnp.transpose(dY, (1, 0, 2))                           # (T-1, B, C)
    if B_pad != B:
        y0 = jnp.pad(y0, ((0, B_pad - B), (0, 0)))
        dY = jnp.pad(dY, ((0, 0), (0, B_pad - B), (0, 0)))

    # --- one-time weight preprocessing --------------------------------------
    init = params["initial"]
    func = params["func"]
    W0, b0 = func[0]
    Wt = W0[0:1, :]             # time row of first func layer
    Wh = W0[1:, :]              # hidden rows
    mlp_w = b0.shape[1]
    # Time-folded first-layer biases for both midpoint stage times.
    ns = jnp.arange(Tm1, dtype=jnp.float32)[:, None]            # (T-1, 1)
    t_bias = jnp.stack([b0 + ns * Wt, b0 + (ns + 0.5) * Wt], axis=1)  # (T-1,2,mlp)
    # Permute last func layer columns from flat index h*(1+data)+c to c*hidden+h.
    W_last, b_last = func[-1]
    perm = jnp.arange(hidden_size * (1 + data_size)).reshape(
        hidden_size, 1 + data_size).T.reshape(-1)
    W_last_p = W_last[:, perm]
    b_last_p = b_last[:, perm]

    flat = [y0, dY, t_bias]
    for W, b in init:
        flat += [W, b]
    flat += [Wh]
    for W, b in func[1:-1]:
        flat += [W, b]
    flat += [W_last_p, b_last_p]
    flat += [W_r]

    in_specs = [
        pl.BlockSpec((bb, C), lambda b: (b, 0)),
        pl.BlockSpec((Tm1, bb, C), lambda b: (0, b, 0)),
        pl.BlockSpec((Tm1, 2, mlp_w), lambda b: (0, 0, 0)),
    ]
    for arr in flat[3:]:
        # Weights: full array, constant index_map -> resident, no re-DMA.
        in_specs.append(pl.BlockSpec(arr.shape, lambda b: (0, 0)))

    out_spec = pl.BlockSpec((bb, 1), lambda b: (b, 0))

    unroll = Tm1 if Tm1 <= 8 else 4

    kernel = functools.partial(
        _disc_kernel, len(init), len(func), hidden_size, data_size, unroll)

    out = pl.pallas_call(
        kernel,
        grid=(num_blocks,),
        out_shape=jax.ShapeDtypeStruct((B_pad, 1), jnp.float32),
        in_specs=in_specs,
        out_specs=out_spec,
        compiler_params=pltpu.CompilerParams(
            dimension_semantics=("parallel",)),
    )(*flat)

    # Exact mean over the true batch; readout bias added once.
    return jnp.mean(out[:B, 0]) + b_r[0, 0]


# --------------------------- pure-JAX reference ------------------------------
def reference_forward(ys_coeffs, params):
    init_W = [W for W, _ in params["initial"]]
    init_b = [b for _, b in params["initial"]]
    func_W = [W for W, _ in params["func"]]
    func_b = [b for _, b in params["func"]]
    W_r, b_r = params["readout"]
    B, T, C = ys_coeffs.shape
    hidden_size = W_r.shape[0]
    data_size = C - 1

    ys = jnp.transpose(ys_coeffs, (1, 0, 2))
    h = _mlp(ys[0], init_W, init_b, final_tanh=False)

    def drift(t, h, dY):
        tcol = jnp.full((h.shape[0], 1), t, jnp.float32)
        th = jnp.concatenate([tcol, h], axis=1)
        f = _mlp(th, func_W, func_b, final_tanh=True)
        f = f.reshape(B, hidden_size, 1 + data_size)
        return jnp.sum(f * dY[:, None, :], axis=-1)

    for n in range(T - 1):
        t = jnp.float32(n)
        dY = ys[n + 1] - ys[n]
        k1 = drift(t, h, dY)
        h = h + drift(t + 0.5, h + 0.5 * k1, dY)
    score = jnp.dot(h, W_r) + b_r
    return jnp.mean(score)


# ------------------------------ params ---------------------------------------
def _init_linear(key, fan_in, fan_out):
    # PyTorch nn.Linear default init: U(-1/sqrt(fan_in), 1/sqrt(fan_in)).
    k1, k2 = jax.random.split(key)
    bound = 1.0 / float(fan_in) ** 0.5
    W = jax.random.uniform(k1, (fan_in, fan_out), jnp.float32, -bound, bound)
    b = jax.random.uniform(k2, (1, fan_out), jnp.float32, -bound, bound)
    return W, b


def make_params(key, data_size, hidden_size, mlp_size, num_layers):
    def mlp_sizes(in_size, out_size):
        sizes = [(in_size, mlp_size)]
        sizes += [(mlp_size, mlp_size)] * (num_layers - 1)
        sizes += [(mlp_size, out_size)]
        return sizes

    params = {"initial": [], "func": [], "readout": None}
    for (fi, fo) in mlp_sizes(1 + data_size, hidden_size):
        key, sub = jax.random.split(key)
        params["initial"].append(_init_linear(sub, fi, fo))
    for (fi, fo) in mlp_sizes(1 + hidden_size, hidden_size * (1 + data_size)):
        key, sub = jax.random.split(key)
        params["func"].append(_init_linear(sub, fi, fo))
    key, sub = jax.random.split(key)
    params["readout"] = _init_linear(sub, hidden_size, 1)
    return params


# -------------------------------- main ----------------------------------------
if __name__ == "__main__":
    B, T = 8, 8
    data_size, hidden_size, mlp_size, num_layers = 3, 16, 32, 2

    root = jax.random.PRNGKey(0)
    kp, kx = jax.random.split(root)
    params = make_params(kp, data_size, hidden_size, mlp_size, num_layers)

    # ys_coeffs: linear-interpolation coefficients = the path samples themselves;
    # channel 0 carries time (as in the sde_gan data pipeline).
    ts = jnp.arange(T, dtype=jnp.float32)
    xs = jax.random.normal(kx, (B, T, data_size), jnp.float32)
    ys_coeffs = jnp.concatenate(
        [jnp.broadcast_to(ts[None, :, None], (B, T, 1)), xs], axis=-1)

    score = discriminator_forward(ys_coeffs, params)
    score = jax.block_until_ready(score)

    ref = jax.block_until_ready(reference_forward(ys_coeffs, params))
    assert abs(float(score) - float(ref)) < 1e-3 + 1e-3 * abs(float(ref)), (
        float(score), float(ref))

    print("KERNEL_OK")
</pallas_src>

<mosaic_0001>
module attributes {stable_mosaic.version = 11 : i64} {
  func.func @_disc_kernel(%arg0: i32, %arg1: memref<8x4xf32, #tpu.memory_space<vmem>>, %arg2: memref<7x8x4xf32, #tpu.memory_space<vmem>>, %arg3: memref<7x2x32xf32, #tpu.memory_space<vmem>>, %arg4: memref<4x32xf32, #tpu.memory_space<vmem>>, %arg5: memref<1x32xf32, #tpu.memory_space<vmem>>, %arg6: memref<32x32xf32, #tpu.memory_space<vmem>>, %arg7: memref<1x32xf32, #tpu.memory_space<vmem>>, %arg8: memref<32x16xf32, #tpu.memory_space<vmem>>, %arg9: memref<1x16xf32, #tpu.memory_space<vmem>>, %arg10: memref<16x32xf32, #tpu.memory_space<vmem>>, %arg11: memref<32x32xf32, #tpu.memory_space<vmem>>, %arg12: memref<1x32xf32, #tpu.memory_space<vmem>>, %arg13: memref<32x64xf32, #tpu.memory_space<vmem>>, %arg14: memref<1x64xf32, #tpu.memory_space<vmem>>, %arg15: memref<16x1xf32, #tpu.memory_space<vmem>>, %arg16: memref<8x1xf32, #tpu.memory_space<vmem>>) attributes {dimension_semantics = [#tpu.dimension_semantics<parallel>], iteration_bounds = array<i64: 1>, scalar_prefetch = 0 : i64, scratch_operands = 0 : i64, tpu.core_type = #tpu.core_type<tc>, window_params = [{transform_indices = @transform_0, window_bounds = array<i64: 8, 4>}, {transform_indices = @transform_1, window_bounds = array<i64: 7, 8, 4>}, {pipeline_mode = #tpu.pipeline_mode<synchronous>, transform_indices = @transform_2, window_bounds = array<i64: 7, 2, 32>}, {pipeline_mode = #tpu.pipeline_mode<synchronous>, transform_indices = @transform_3, window_bounds = array<i64: 4, 32>}, {pipeline_mode = #tpu.pipeline_mode<synchronous>, transform_indices = @transform_4, window_bounds = array<i64: 1, 32>}, {pipeline_mode = #tpu.pipeline_mode<synchronous>, transform_indices = @transform_5, window_bounds = array<i64: 32, 32>}, {pipeline_mode = #tpu.pipeline_mode<synchronous>, transform_indices = @transform_6, window_bounds = array<i64: 1, 32>}, {pipeline_mode = #tpu.pipeline_mode<synchronous>, transform_indices = @transform_7, window_bounds = array<i64: 32, 16>}, {pipeline_mode = #tpu.pipeline_mode<synchronous>, transform_indices = @transform_8, window_bounds = array<i64: 1, 16>}, {pipeline_mode = #tpu.pipeline_mode<synchronous>, transform_indices = @transform_9, window_bounds = array<i64: 16, 32>}, {pipeline_mode = #tpu.pipeline_mode<synchronous>, transform_indices = @transform_10, window_bounds = array<i64: 32, 32>}, {pipeline_mode = #tpu.pipeline_mode<synchronous>, transform_indices = @transform_11, window_bounds = array<i64: 1, 32>}, {pipeline_mode = #tpu.pipeline_mode<synchronous>, transform_indices = @transform_12, window_bounds = array<i64: 32, 64>}, {pipeline_mode = #tpu.pipeline_mode<synchronous>, transform_indices = @transform_13, window_bounds = array<i64: 1, 64>}, {pipeline_mode = #tpu.pipeline_mode<synchronous>, transform_indices = @transform_14, window_bounds = array<i64: 16, 1>}, {transform_indices = @transform_15, window_bounds = array<i64: 8, 1>}]} {
    %c0 = arith.constant 0 : index
    %c0_0 = arith.constant 0 : index
    %0 = vector.load %arg4[%c0, %c0_0] : memref<4x32xf32, #tpu.memory_space<vmem>>, vector<4x32xf32>
    %c0_1 = arith.constant 0 : index
    %c0_2 = arith.constant 0 : index
    %1 = vector.load %arg5[%c0_1, %c0_2] : memref<1x32xf32, #tpu.memory_space<vmem>>, vector<1x32xf32>
    %c0_3 = arith.constant 0 : index
    %c0_4 = arith.constant 0 : index
    %2 = vector.load %arg6[%c0_3, %c0_4] : memref<32x32xf32, #tpu.memory_space<vmem>>, vector<32x32xf32>
    %c0_5 = arith.constant 0 : index
    %c0_6 = arith.constant 0 : index
    %3 = vector.load %arg7[%c0_5, %c0_6] : memref<1x32xf32, #tpu.memory_space<vmem>>, vector<1x32xf32>
    %c0_7 = arith.constant 0 : index
    %c0_8 = arith.constant 0 : index
    %4 = vector.load %arg8[%c0_7, %c0_8] : memref<32x16xf32, #tpu.memory_space<vmem>>, vector<32x16xf32>
    %c0_9 = arith.constant 0 : index
    %c0_10 = arith.constant 0 : index
    %5 = vector.load %arg9[%c0_9, %c0_10] : memref<1x16xf32, #tpu.memory_space<vmem>>, vector<1x16xf32>
    %c0_11 = arith.constant 0 : index
    %c0_12 = arith.constant 0 : index
    %6 = vector.load %arg10[%c0_11, %c0_12] : memref<16x32xf32, #tpu.memory_space<vmem>>, vector<16x32xf32>
    %c0_13 = arith.constant 0 : index
    %c0_14 = arith.constant 0 : index
    %7 = vector.load %arg11[%c0_13, %c0_14] : memref<32x32xf32, #tpu.memory_space<vmem>>, vector<32x32xf32>
    %c0_15 = arith.constant 0 : index
    %c0_16 = arith.constant 0 : index
    %8 = vector.load %arg12[%c0_15, %c0_16] : memref<1x32xf32, #tpu.memory_space<vmem>>, vector<1x32xf32>
    %c0_17 = arith.constant 0 : index
    %c0_18 = arith.constant 0 : index
    %9 = vector.load %arg13[%c0_17, %c0_18] : memref<32x64xf32, #tpu.memory_space<vmem>>, vector<32x64xf32>
    %c0_19 = arith.constant 0 : index
    %c0_20 = arith.constant 0 : index
    %10 = vector.load %arg14[%c0_19, %c0_20] : memref<1x64xf32, #tpu.memory_space<vmem>>, vector<1x64xf32>
    %c0_21 = arith.constant 0 : index
    %c0_22 = arith.constant 0 : index
    %11 = vector.load %arg15[%c0_21, %c0_22] : memref<16x1xf32, #tpu.memory_space<vmem>>, vector<16x1xf32>
    %c0_23 = arith.constant 0 : index
    %c0_24 = arith.constant 0 : index
    %12 = vector.load %arg1[%c0_23, %c0_24] : memref<8x4xf32, #tpu.memory_space<vmem>>, vector<8x4xf32>
    %cst = arith.constant dense<0.000000e+00> : vector<8x32xf32>
    %13 = tpu.matmul %12, %0, %cst {dimension_numbers = #tpu.dot_dimension_numbers<[1], [0], [0], [1], [0, 0, 1, 1], [], []>} : vector<8x4xf32>, vector<4x32xf32>, vector<8x32xf32> -> vector<8x32xf32>
    %14 = vector.broadcast %1 : vector<1x32xf32> to vector<8x32xf32>
    %15 = arith.addf %13, %14 : vector<8x32xf32>
    %cst_25 = arith.constant 0.908999979 : f32
    %16 = vector.broadcast %cst_25 : f32 to vector<8x32xf32>
    %17 = arith.mulf %16, %15 : vector<8x32xf32>
    %18 = arith.negf %15 : vector<8x32xf32>
    %19 = math.exp %18 : vector<8x32xf32>
    %cst_26 = arith.constant 1.000000e+00 : f32
    %20 = vector.broadcast %cst_26 : f32 to vector<8x32xf32>
    %21 = arith.addf %20, %19 : vector<8x32xf32>
    %22 = arith.divf %20, %21 : vector<8x32xf32>
    %23 = arith.mulf %17, %22 : vector<8x32xf32>
    %cst_27 = arith.constant dense<0.000000e+00> : vector<8x32xf32>
    %24 = tpu.matmul %23, %2, %cst_27 {dimension_numbers = #tpu.dot_dimension_numbers<[1], [0], [0], [1], [0, 0, 1, 1], [], []>} : vector<8x32xf32>, vector<32x32xf32>, vector<8x32xf32> -> vector<8x32xf32>
    %25 = vector.broadcast %3 : vector<1x32xf32> to vector<8x32xf32>
    %26 = arith.addf %24, %25 : vector<8x32xf32>
    %cst_28 = arith.constant 0.908999979 : f32
    %27 = vector.broadcast %cst_28 : f32 to vector<8x32xf32>
    %28 = arith.mulf %27, %26 : vector<8x32xf32>
    %29 = arith.negf %26 : vector<8x32xf32>
    %30 = math.exp %29 : vector<8x32xf32>
    %cst_29 = arith.constant 1.000000e+00 : f32
    %31 = vector.broadcast %cst_29 : f32 to vector<8x32xf32>
    %32 = arith.addf %31, %30 : vector<8x32xf32>
    %33 = arith.divf %31, %32 : vector<8x32xf32>
    %34 = arith.mulf %28, %33 : vector<8x32xf32>
    %cst_30 = arith.constant dense<0.000000e+00> : vector<8x16xf32>
    %35 = tpu.matmul %34, %4, %cst_30 {dimension_numbers = #tpu.dot_dimension_numbers<[1], [0], [0], [1], [0, 0, 1, 1], [], []>} : vector<8x32xf32>, vector<32x16xf32>, vector<8x16xf32> -> vector<8x16xf32>
    %36 = vector.broadcast %5 : vector<1x16xf32> to vector<8x16xf32>
    %37 = arith.addf %35, %36 : vector<8x16xf32>
    %c0_i32 = arith.constant 0 : i32
    %38 = arith.index_cast %c0_i32 : i32 to index
    %c0_31 = arith.constant 0 : index
    %c0_32 = arith.constant 0 : index
    %39 = vector.load %arg2[%38, %c0_31, %c0_32] : memref<7x8x4xf32, #tpu.memory_space<vmem>>, vector<1x8x4xf32>
    %40 = vector.shape_cast %39 : vector<1x8x4xf32> to vector<8x4xf32>
    %41 = arith.index_cast %c0_i32 : i32 to index
    %c0_33 = arith.constant 0 : index
    %c0_34 = arith.constant 0 : index
    %42 = vector.load %arg3[%41, %c0_33, %c0_34] : memref<7x2x32xf32, #tpu.memory_space<vmem>>, vector<1x2x32xf32>
    %43 = vector.shape_cast %42 : vector<1x2x32xf32> to vector<2x32xf32>
    %44 = vector.extract_strided_slice %43 {offsets = [0, 0], sizes = [1, 32], strides = [1, 1]} : vector<2x32xf32> to vector<1x32xf32>
    %cst_35 = arith.constant dense<0.000000e+00> : vector<8x32xf32>
    %45 = tpu.matmul %37, %6, %cst_35 {dimension_numbers = #tpu.dot_dimension_numbers<[1], [0], [0], [1], [0, 0, 1, 1], [], []>} : vector<8x16xf32>, vector<16x32xf32>, vector<8x32xf32> -> vector<8x32xf32>
    %46 = vector.broadcast %44 : vector<1x32xf32> to vector<8x32xf32>
    %47 = arith.addf %45, %46 : vector<8x32xf32>
    %cst_36 = arith.constant 0.908999979 : f32
    %48 = vector.broadcast %cst_36 : f32 to vector<8x32xf32>
    %49 = arith.mulf %48, %47 : vector<8x32xf32>
    %50 = arith.negf %47 : vector<8x32xf32>
    %51 = math.exp %50 : vector<8x32xf32>
    %cst_37 = arith.constant 1.000000e+00 : f32
    %52 = vector.broadcast %cst_37 : f32 to vector<8x32xf32>
    %53 = arith.addf %52, %51 : vector<8x32xf32>
    %54 = arith.divf %52, %53 : vector<8x32xf32>
    %55 = arith.mulf %49, %54 : vector<8x32xf32>
    %cst_38 = arith.constant dense<0.000000e+00> : vector<8x32xf32>
    %56 = tpu.matmul %55, %7, %cst_38 {dimension_numbers = #tpu.dot_dimension_numbers<[1], [0], [0], [1], [0, 0, 1, 1], [], []>} : vector<8x32xf32>, vector<32x32xf32>, vector<8x32xf32> -> vector<8x32xf32>
    %57 = vector.broadcast %8 : vector<1x32xf32> to vector<8x32xf32>
    %58 = arith.addf %56, %57 : vector<8x32xf32>
    %cst_39 = arith.constant 0.908999979 : f32
    %59 = vector.broadcast %cst_39 : f32 to vector<8x32xf32>
    %60 = arith.mulf %59, %58 : vector<8x32xf32>
    %61 = arith.negf %58 : vector<8x32xf32>
    %62 = math.exp %61 : vector<8x32xf32>
    %cst_40 = arith.constant 1.000000e+00 : f32
    %63 = vector.broadcast %cst_40 : f32 to vector<8x32xf32>
    %64 = arith.addf %63, %62 : vector<8x32xf32>
    %65 = arith.divf %63, %64 : vector<8x32xf32>
    %66 = arith.mulf %60, %65 : vector<8x32xf32>
    %cst_41 = arith.constant dense<0.000000e+00> : vector<8x64xf32>
    %67 = tpu.matmul %66, %9, %cst_41 {dimension_numbers = #tpu.dot_dimension_numbers<[1], [0], [0], [1], [0, 0, 1, 1], [], []>} : vector<8x32xf32>, vector<32x64xf32>, vector<8x64xf32> -> vector<8x64xf32>
    %68 = vector.broadcast %10 : vector<1x64xf32> to vector<8x64xf32>
    %69 = arith.addf %67, %68 : vector<8x64xf32>
    %70 = math.tanh %69 : vector<8x64xf32>
    %71 = vector.extract_strided_slice %70 {offsets = [0, 0], sizes = [8, 16], strides = [1, 1]} : vector<8x64xf32> to vector<8x16xf32>
    %72 = vector.extract_strided_slice %40 {offsets = [0, 0], sizes = [8, 1], strides = [1, 1]} : vector<8x4xf32> to vector<8x1xf32>
    %73 = vector.broadcast %72 : vector<8x1xf32> to vector<8x16xf32>
    %74 = arith.mulf %71, %73 : vector<8x16xf32>
    %75 = vector.extract_strided_slice %70 {offsets = [0, 16], sizes = [8, 16], strides = [1, 1]} : vector<8x64xf32> to vector<8x16xf32>
    %76 = vector.extract_strided_slice %40 {offsets = [0, 1], sizes = [8, 1], strides = [1, 1]} : vector<8x4xf32> to vector<8x1xf32>
    %77 = vector.broadcast %76 : vector<8x1xf32> to vector<8x16xf32>
    %78 = arith.mulf %75, %77 : vector<8x16xf32>
    %79 = arith.addf %74, %78 : vector<8x16xf32>
    %80 = vector.extract_strided_slice %70 {offsets = [0, 32], sizes = [8, 16], strides = [1, 1]} : vector<8x64xf32> to vector<8x16xf32>
    %81 = vector.extract_strided_slice %40 {offsets = [0, 2], sizes = [8, 1], strides = [1, 1]} : vector<8x4xf32> to vector<8x1xf32>
    %82 = vector.broadcast %81 : vector<8x1xf32> to vector<8x16xf32>
    %83 = arith.mulf %80, %82 : vector<8x16xf32>
    %84 = arith.addf %79, %83 : vector<8x16xf32>
    %85 = vector.extract_strided_slice %70 {offsets = [0, 48], sizes = [8, 16], strides = [1, 1]} : vector<8x64xf32> to vector<8x16xf32>
    %86 = vector.extract_strided_slice %40 {offsets = [0, 3], sizes = [8, 1], strides = [1, 1]} : vector<8x4xf32> to vector<8x1xf32>
    %87 = vector.broadcast %86 : vector<8x1xf32> to vector<8x16xf32>
    %88 = arith.mulf %85, %87 : vector<8x16xf32>
    %89 = arith.addf %84, %88 : vector<8x16xf32>
    %90 = vector.extract_strided_slice %43 {offsets = [1, 0], sizes = [1, 32], strides = [1, 1]} : vector<2x32xf32> to vector<1x32xf32>
    %cst_42 = arith.constant 5.000000e-01 : f32
    %91 = vector.broadcast %cst_42 : f32 to vector<8x16xf32>
    %92 = arith.mulf %91, %89 : vector<8x16xf32>
    %93 = arith.addf %37, %92 : vector<8x16xf32>
    %cst_43 = arith.constant dense<0.000000e+00> : vector<8x32xf32>
    %94 = tpu.matmul %93, %6, %cst_43 {dimension_numbers = #tpu.dot_dimension_numbers<[1], [0], [0], [1], [0, 0, 1, 1], [], []>} : vector<8x16xf32>, vector<16x32xf32>, vector<8x32xf32> -> vector<8x32xf32>
    %95 = vector.broadcast %90 : vector<1x32xf32> to vector<8x32xf32>
    %96 = arith.addf %94, %95 : vector<8x32xf32>
    %cst_44 = arith.constant 0.908999979 : f32
    %97 = vector.broadcast %cst_44 : f32 to vector<8x32xf32>
    %98 = arith.mulf %97, %96 : vector<8x32xf32>
    %99 = arith.negf %96 : vector<8x32xf32>
    %100 = math.exp %99 : vector<8x32xf32>
    %cst_45 = arith.constant 1.000000e+00 : f32
    %101 = vector.broadcast %cst_45 : f32 to vector<8x32xf32>
    %102 = arith.addf %101, %100 : vector<8x32xf32>
    %103 = arith.divf %101, %102 : vector<8x32xf32>
    %104 = arith.mulf %98, %103 : vector<8x32xf32>
    %cst_46 = arith.constant dense<0.000000e+00> : vector<8x32xf32>
    %105 = tpu.matmul %104, %7, %cst_46 {dimension_numbers = #tpu.dot_dimension_numbers<[1], [0], [0], [1], [0, 0, 1, 1], [], []>} : vector<8x32xf32>, vector<32x32xf32>, vector<8x32xf32> -> vector<8x32xf32>
    %106 = vector.broadcast %8 : vector<1x32xf32> to vector<8x32xf32>
    %107 = arith.addf %105, %106 : vector<8x32xf32>
    %cst_47 = arith.constant 0.908999979 : f32
    %108 = vector.broadcast %cst_47 : f32 to vector<8x32xf32>
    %109 = arith.mulf %108, %107 : vector<8x32xf32>
    %110 = arith.negf %107 : vector<8x32xf32>
    %111 = math.exp %110 : vector<8x32xf32>
    %cst_48 = arith.constant 1.000000e+00 : f32
    %112 = vector.broadcast %cst_48 : f32 to vector<8x32xf32>
    %113 = arith.addf %112, %111 : vector<8x32xf32>
    %114 = arith.divf %112, %113 : vector<8x32xf32>
    %115 = arith.mulf %109, %114 : vector<8x32xf32>
    %cst_49 = arith.constant dense<0.000000e+00> : vector<8x64xf32>
    %116 = tpu.matmul %115, %9, %cst_49 {dimension_numbers = #tpu.dot_dimension_numbers<[1], [0], [0], [1], [0, 0, 1, 1], [], []>} : vector<8x32xf32>, vector<32x64xf32>, vector<8x64xf32> -> vector<8x64xf32>
    %117 = vector.broadcast %10 : vector<1x64xf32> to vector<8x64xf32>
    %118 = arith.addf %116, %117 : vector<8x64xf32>
    %119 = math.tanh %118 : vector<8x64xf32>
    %120 = vector.extract_strided_slice %119 {offsets = [0, 0], sizes = [8, 16], strides = [1, 1]} : vector<8x64xf32> to vector<8x16xf32>
    %121 = vector.extract_strided_slice %40 {offsets = [0, 0], sizes = [8, 1], strides = [1, 1]} : vector<8x4xf32> to vector<8x1xf32>
    %122 = vector.broadcast %121 : vector<8x1xf32> to vector<8x16xf32>
    %123 = arith.mulf %120, %122 : vector<8x16xf32>
    %124 = vector.extract_strided_slice %119 {offsets = [0, 16], sizes = [8, 16], strides = [1, 1]} : vector<8x64xf32> to vector<8x16xf32>
    %125 = vector.extract_strided_slice %40 {offsets = [0, 1], sizes = [8, 1], strides = [1, 1]} : vector<8x4xf32> to vector<8x1xf32>
    %126 = vector.broadcast %125 : vector<8x1xf32> to vector<8x16xf32>
    %127 = arith.mulf %124, %126 : vector<8x16xf32>
    %128 = arith.addf %123, %127 : vector<8x16xf32>
    %129 = vector.extract_strided_slice %119 {offsets = [0, 32], sizes = [8, 16], strides = [1, 1]} : vector<8x64xf32> to vector<8x16xf32>
    %130 = vector.extract_strided_slice %40 {offsets = [0, 2], sizes = [8, 1], strides = [1, 1]} : vector<8x4xf32> to vector<8x1xf32>
    %131 = vector.broadcast %130 : vector<8x1xf32> to vector<8x16xf32>
    %132 = arith.mulf %129, %131 : vector<8x16xf32>
    %133 = arith.addf %128, %132 : vector<8x16xf32>
    %134 = vector.extract_strided_slice %119 {offsets = [0, 48], sizes = [8, 16], strides = [1, 1]} : vector<8x64xf32> to vector<8x16xf32>
    %135 = vector.extract_strided_slice %40 {offsets = [0, 3], sizes = [8, 1], strides = [1, 1]} : vector<8x4xf32> to vector<8x1xf32>
    %136 = vector.broadcast %135 : vector<8x1xf32> to vector<8x16xf32>
    %137 = arith.mulf %134, %136 : vector<8x16xf32>
    %138 = arith.addf %133, %137 : vector<8x16xf32>
    %139 = arith.addf %37, %138 : vector<8x16xf32>
    %c1_i32 = arith.constant 1 : i32
    %140 = arith.index_cast %c1_i32 : i32 to index
    %c0_50 = arith.constant 0 : index
    %c0_51 = arith.constant 0 : index
    %141 = vector.load %arg2[%140, %c0_50, %c0_51] : memref<7x8x4xf32, #tpu.memory_space<vmem>>, vector<1x8x4xf32>
    %142 = vector.shape_cast %141 : vector<1x8x4xf32> to vector<8x4xf32>
    %143 = arith.index_cast %c1_i32 : i32 to index
    %c0_52 = arith.constant 0 : index
    %c0_53 = arith.constant 0 : index
    %144 = vector.load %arg3[%143, %c0_52, %c0_53] : memref<7x2x32xf32, #tpu.memory_space<vmem>>, vector<1x2x32xf32>
    %145 = vector.shape_cast %144 : vector<1x2x32xf32> to vector<2x32xf32>
    %146 = vector.extract_strided_slice %145 {offsets = [0, 0], sizes = [1, 32], strides = [1, 1]} : vector<2x32xf32> to vector<1x32xf32>
    %cst_54 = arith.constant dense<0.000000e+00> : vector<8x32xf32>
    %147 = tpu.matmul %139, %6, %cst_54 {dimension_numbers = #tpu.dot_dimension_numbers<[1], [0], [0], [1], [0, 0, 1, 1], [], []>} : vector<8x16xf32>, vector<16x32xf32>, vector<8x32xf32> -> vector<8x32xf32>
    %148 = vector.broadcast %146 : vector<1x32xf32> to vector<8x32xf32>
    %149 = arith.addf %147, %148 : vector<8x32xf32>
    %cst_55 = arith.constant 0.908999979 : f32
    %150 = vector.broadcast %cst_55 : f32 to vector<8x32xf32>
    %151 = arith.mulf %150, %149 : vector<8x32xf32>
    %152 = arith.negf %149 : vector<8x32xf32>
    %153 = math.exp %152 : vector<8x32xf32>
    %cst_56 = arith.constant 1.000000e+00 : f32
    %154 = vector.broadcast %cst_56 : f32 to vector<8x32xf32>
    %155 = arith.addf %154, %153 : vector<8x32xf32>
    %156 = arith.divf %154, %155 : vector<8x32xf32>
    %157 = arith.mulf %151, %156 : vector<8x32xf32>
    %cst_57 = arith.constant dense<0.000000e+00> : vector<8x32xf32>
    %158 = tpu.matmul %157, %7, %cst_57 {dimension_numbers = #tpu.dot_dimension_numbers<[1], [0], [0], [1], [0, 0, 1, 1], [], []>} : vector<8x32xf32>, vector<32x32xf32>, vector<8x32xf32> -> vector<8x32xf32>
    %159 = vector.broadcast %8 : vector<1x32xf32> to vector<8x32xf32>
    %160 = arith.addf %158, %159 : vector<8x32xf32>
    %cst_58 = arith.constant 0.908999979 : f32
    %161 = vector.broadcast %cst_58 : f32 to vector<8x32xf32>
    %162 = arith.mulf %161, %160 : vector<8x32xf32>
    %163 = arith.negf %160 : vector<8x32xf32>
    %164 = math.exp %163 : vector<8x32xf32>
    %cst_59 = arith.constant 1.000000e+00 : f32
    %165 = vector.broadcast %cst_59 : f32 to vector<8x32xf32>
    %166 = arith.addf %165, %164 : vector<8x32xf32>
    %167 = arith.divf %165, %166 : vector<8x32xf32>
    %168 = arith.mulf %162, %167 : vector<8x32xf32>
    %cst_60 = arith.constant dense<0.000000e+00> : vector<8x64xf32>
    %169 = tpu.matmul %168, %9, %cst_60 {dimension_numbers = #tpu.dot_dimension_numbers<[1], [0], [0], [1], [0, 0, 1, 1], [], []>} : vector<8x32xf32>, vector<32x64xf32>, vector<8x64xf32> -> vector<8x64xf32>
    %170 = vector.broadcast %10 : vector<1x64xf32> to vector<8x64xf32>
    %171 = arith.addf %169, %170 : vector<8x64xf32>
    %172 = math.tanh %171 : vector<8x64xf32>
    %173 = vector.extract_strided_slice %172 {offsets = [0, 0], sizes = [8, 16], strides = [1, 1]} : vector<8x64xf32> to vector<8x16xf32>
    %174 = vector.extract_strided_slice %142 {offsets = [0, 0], sizes = [8, 1], strides = [1, 1]} : vector<8x4xf32> to vector<8x1xf32>
    %175 = vector.broadcast %174 : vector<8x1xf32> to vector<8x16xf32>
    %176 = arith.mulf %173, %175 : vector<8x16xf32>
    %177 = vector.extract_strided_slice %172 {offsets = [0, 16], sizes = [8, 16], strides = [1, 1]} : vector<8x64xf32> to vector<8x16xf32>
    %178 = vector.extract_strided_slice %142 {offsets = [0, 1], sizes = [8, 1], strides = [1, 1]} : vector<8x4xf32> to vector<8x1xf32>
    %179 = vector.broadcast %178 : vector<8x1xf32> to vector<8x16xf32>
    %180 = arith.mulf %177, %179 : vector<8x16xf32>
    %181 = arith.addf %176, %180 : vector<8x16xf32>
    %182 = vector.extract_strided_slice %172 {offsets = [0, 32], sizes = [8, 16], strides = [1, 1]} : vector<8x64xf32> to vector<8x16xf32>
    %183 = vector.extract_strided_slice %142 {offsets = [0, 2], sizes = [8, 1], strides = [1, 1]} : vector<8x4xf32> to vector<8x1xf32>
    %184 = vector.broadcast %183 : vector<8x1xf32> to vector<8x16xf32>
    %185 = arith.mulf %182, %184 : vector<8x16xf32>
    %186 = arith.addf %181, %185 : vector<8x16xf32>
    %187 = vector.extract_strided_slice %172 {offsets = [0, 48], sizes = [8, 16], strides = [1, 1]} : vector<8x64xf32> to vector<8x16xf32>
    %188 = vector.extract_strided_slice %142 {offsets = [0, 3], sizes = [8, 1], strides = [1, 1]} : vector<8x4xf32> to vector<8x1xf32>
    %189 = vector.broadcast %188 : vector<8x1xf32> to vector<8x16xf32>
    %190 = arith.mulf %187, %189 : vector<8x16xf32>
    %191 = arith.addf %186, %190 : vector<8x16xf32>
    %192 = vector.extract_strided_slice %145 {offsets = [1, 0], sizes = [1, 32], strides = [1, 1]} : vector<2x32xf32> to vector<1x32xf32>
    %cst_61 = arith.constant 5.000000e-01 : f32
    %193 = vector.broadcast %cst_61 : f32 to vector<8x16xf32>
    %194 = arith.mulf %193, %191 : vector<8x16xf32>
    %195 = arith.addf %139, %194 : vector<8x16xf32>
    %cst_62 = arith.constant dense<0.000000e+00> : vector<8x32xf32>
    %196 = tpu.matmul %195, %6, %cst_62 {dimension_numbers = #tpu.dot_dimension_numbers<[1], [0], [0], [1], [0, 0, 1, 1], [], []>} : vector<8x16xf32>, vector<16x32xf32>, vector<8x32xf32> -> vector<8x32xf32>
    %197 = vector.broadcast %192 : vector<1x32xf32> to vector<8x32xf32>
    %198 = arith.addf %196, %197 : vector<8x32xf32>
    %cst_63 = arith.constant 0.908999979 : f32
    %199 = vector.broadcast %cst_63 : f32 to vector<8x32xf32>
    %200 = arith.mulf %199, %198 : vector<8x32xf32>
    %201 = arith.negf %198 : vector<8x32xf32>
    %202 = math.exp %201 : vector<8x32xf32>
    %cst_64 = arith.constant 1.000000e+00 : f32
    %203 = vector.broadcast %cst_64 : f32 to vector<8x32xf32>
    %204 = arith.addf %203, %202 : vector<8x32xf32>
    %205 = arith.divf %203, %204 : vector<8x32xf32>
    %206 = arith.mulf %200, %205 : vector<8x32xf32>
    %cst_65 = arith.constant dense<0.000000e+00> : vector<8x32xf32>
    %207 = tpu.matmul %206, %7, %cst_65 {dimension_numbers = #tpu.dot_dimension_numbers<[1], [0], [0], [1], [0, 0, 1, 1], [], []>} : vector<8x32xf32>, vector<32x32xf32>, vector<8x32xf32> -> vector<8x32xf32>
    %208 = vector.broadcast %8 : vector<1x32xf32> to vector<8x32xf32>
    %209 = arith.addf %207, %208 : vector<8x32xf32>
    %cst_66 = arith.constant 0.908999979 : f32
    %210 = vector.broadcast %cst_66 : f32 to vector<8x32xf32>
    %211 = arith.mulf %210, %209 : vector<8x32xf32>
    %212 = arith.negf %209 : vector<8x32xf32>
    %213 = math.exp %212 : vector<8x32xf32>
    %cst_67 = arith.constant 1.000000e+00 : f32
    %214 = vector.broadcast %cst_67 : f32 to vector<8x32xf32>
    %215 = arith.addf %214, %213 : vector<8x32xf32>
    %216 = arith.divf %214, %215 : vector<8x32xf32>
    %217 = arith.mulf %211, %216 : vector<8x32xf32>
    %cst_68 = arith.constant dense<0.000000e+00> : vector<8x64xf32>
    %218 = tpu.matmul %217, %9, %cst_68 {dimension_numbers = #tpu.dot_dimension_numbers<[1], [0], [0], [1], [0, 0, 1, 1], [], []>} : vector<8x32xf32>, vector<32x64xf32>, vector<8x64xf32> -> vector<8x64xf32>
    %219 = vector.broadcast %10 : vector<1x64xf32> to vector<8x64xf32>
    %220 = arith.addf %218, %219 : vector<8x64xf32>
    %221 = math.tanh %220 : vector<8x64xf32>
    %222 = vector.extract_strided_slice %221 {offsets = [0, 0], sizes = [8, 16], strides = [1, 1]} : vector<8x64xf32> to vector<8x16xf32>
    %223 = vector.extract_strided_slice %142 {offsets = [0, 0], sizes = [8, 1], strides = [1, 1]} : vector<8x4xf32> to vector<8x1xf32>
    %224 = vector.broadcast %223 : vector<8x1xf32> to vector<8x16xf32>
    %225 = arith.mulf %222, %224 : vector<8x16xf32>
    %226 = vector.extract_strided_slice %221 {offsets = [0, 16], sizes = [8, 16], strides = [1, 1]} : vector<8x64xf32> to vector<8x16xf32>
    %227 = vector.extract_strided_slice %142 {offsets = [0, 1], sizes = [8, 1], strides = [1, 1]} : vector<8x4xf32> to vector<8x1xf32>
    %228 = vector.broadcast %227 : vector<8x1xf32> to vector<8x16xf32>
    %229 = arith.mulf %226, %228 : vector<8x16xf32>
    %230 = arith.addf %225, %229 : vector<8x16xf32>
    %231 = vector.extract_strided_slice %221 {offsets = [0, 32], sizes = [8, 16], strides = [1, 1]} : vector<8x64xf32> to vector<8x16xf32>
    %232 = vector.extract_strided_slice %142 {offsets = [0, 2], sizes = [8, 1], strides = [1, 1]} : vector<8x4xf32> to vector<8x1xf32>
    %233 = vector.broadcast %232 : vector<8x1xf32> to vector<8x16xf32>
    %234 = arith.mulf %231, %233 : vector<8x16xf32>
    %235 = arith.addf %230, %234 : vector<8x16xf32>
    %236 = vector.extract_strided_slice %221 {offsets = [0, 48], sizes = [8, 16], strides = [1, 1]} : vector<8x64xf32> to vector<8x16xf32>
    %237 = vector.extract_strided_slice %142 {offsets = [0, 3], sizes = [8, 1], strides = [1, 1]} : vector<8x4xf32> to vector<8x1xf32>
    %238 = vector.broadcast %237 : vector<8x1xf32> to vector<8x16xf32>
    %239 = arith.mulf %236, %238 : vector<8x16xf32>
    %240 = arith.addf %235, %239 : vector<8x16xf32>
    %241 = arith.addf %139, %240 : vector<8x16xf32>
    %c2_i32 = arith.constant 2 : i32
    %242 = arith.index_cast %c2_i32 : i32 to index
    %c0_69 = arith.constant 0 : index
    %c0_70 = arith.constant 0 : index
    %243 = vector.load %arg2[%242, %c0_69, %c0_70] : memref<7x8x4xf32, #tpu.memory_space<vmem>>, vector<1x8x4xf32>
    %244 = vector.shape_cast %243 : vector<1x8x4xf32> to vector<8x4xf32>
    %245 = arith.index_cast %c2_i32 : i32 to index
    %c0_71 = arith.constant 0 : index
    %c0_72 = arith.constant 0 : index
    %246 = vector.load %arg3[%245, %c0_71, %c0_72] : memref<7x2x32xf32, #tpu.memory_space<vmem>>, vector<1x2x32xf32>
    %247 = vector.shape_cast %246 : vector<1x2x32xf32> to vector<2x32xf32>
    %248 = vector.extract_strided_slice %247 {offsets = [0, 0], sizes = [1, 32], strides = [1, 1]} : vector<2x32xf32> to vector<1x32xf32>
    %cst_73 = arith.constant dense<0.000000e+00> : vector<8x32xf32>
    %249 = tpu.matmul %241, %6, %cst_73 {dimension_numbers = #tpu.dot_dimension_numbers<[1], [0], [0], [1], [0, 0, 1, 1], [], []>} : vector<8x16xf32>, vector<16x32xf32>, vector<8x32xf32> -> vector<8x32xf32>
    %250 = vector.broadcast %248 : vector<1x32xf32> to vector<8x32xf32>
    %251 = arith.addf %249, %250 : vector<8x32xf32>
    %cst_74 = arith.constant 0.908999979 : f32
    %252 = vector.broadcast %cst_74 : f32 to vector<8x32xf32>
    %253 = arith.mulf %252, %251 : vector<8x32xf32>
    %254 = arith.negf %251 : vector<8x32xf32>
    %255 = math.exp %254 : vector<8x32xf32>
    %cst_75 = arith.constant 1.000000e+00 : f32
    %256 = vector.broadcast %cst_75 : f32 to vector<8x32xf32>
    %257 = arith.addf %256, %255 : vector<8x32xf32>
    %258 = arith.divf %256, %257 : vector<8x32xf32>
    %259 = arith.mulf %253, %258 : vector<8x32xf32>
    %cst_76 = arith.constant dense<0.000000e+00> : vector<8x32xf32>
    %260 = tpu.matmul %259, %7, %cst_76 {dimension_numbers = #tpu.dot_dimension_numbers<[1], [0], [0], [1], [0, 0, 1, 1], [], []>} : vector<8x32xf32>, vector<32x32xf32>, vector<8x32xf32> -> vector<8x32xf32>
    %261 = vector.broadcast %8 : vector<1x32xf32> to vector<8x32xf32>
    %262 = arith.addf %260, %261 : vector<8x32xf32>
    %cst_77 = arith.constant 0.908999979 : f32
    %263 = vector.broadcast %cst_77 : f32 to vector<8x32xf32>
    %264 = arith.mulf %263, %262 : vector<8x32xf32>
    %265 = arith.negf %262 : vector<8x32xf32>
    %266 = math.exp %265 : vector<8x32xf32>
    %cst_78 = arith.constant 1.000000e+00 : f32
    %267 = vector.broadcast %cst_78 : f32 to vector<8x32xf32>
    %268 = arith.addf %267, %266 : vector<8x32xf32>
    %269 = arith.divf %267, %268 : vector<8x32xf32>
    %270 = arith.mulf %264, %269 : vector<8x32xf32>
    %cst_79 = arith.constant dense<0.000000e+00> : vector<8x64xf32>
    %271 = tpu.matmul %270, %9, %cst_79 {dimension_numbers = #tpu.dot_dimension_numbers<[1], [0], [0], [1], [0, 0, 1, 1], [], []>} : vector<8x32xf32>, vector<32x64xf32>, vector<8x64xf32> -> vector<8x64xf32>
    %272 = vector.broadcast %10 : vector<1x64xf32> to vector<8x64xf32>
    %273 = arith.addf %271, %272 : vector<8x64xf32>
    %274 = math.tanh %273 : vector<8x64xf32>
    %275 = vector.extract_strided_slice %274 {offsets = [0, 0], sizes = [8, 16], strides = [1, 1]} : vector<8x64xf32> to vector<8x16xf32>
    %276 = vector.extract_strided_slice %244 {offsets = [0, 0], sizes = [8, 1], strides = [1, 1]} : vector<8x4xf32> to vector<8x1xf32>
    %277 = vector.broadcast %276 : vector<8x1xf32> to vector<8x16xf32>
    %278 = arith.mulf %275, %277 : vector<8x16xf32>
    %279 = vector.extract_strided_slice %274 {offsets = [0, 16], sizes = [8, 16], strides = [1, 1]} : vector<8x64xf32> to vector<8x16xf32>
    %280 = vector.extract_strided_slice %244 {offsets = [0, 1], sizes = [8, 1], strides = [1, 1]} : vector<8x4xf32> to vector<8x1xf32>
    %281 = vector.broadcast %280 : vector<8x1xf32> to vector<8x16xf32>
    %282 = arith.mulf %279, %281 : vector<8x16xf32>
    %283 = arith.addf %278, %282 : vector<8x16xf32>
    %284 = vector.extract_strided_slice %274 {offsets = [0, 32], sizes = [8, 16], strides = [1, 1]} : vector<8x64xf32> to vector<8x16xf32>
    %285 = vector.extract_strided_slice %244 {offsets = [0, 2], sizes = [8, 1], strides = [1, 1]} : vector<8x4xf32> to vector<8x1xf32>
    %286 = vector.broadcast %285 : vector<8x1xf32> to vector<8x16xf32>
    %287 = arith.mulf %284, %286 : vector<8x16xf32>
    %288 = arith.addf %283, %287 : vector<8x16xf32>
    %289 = vector.extract_strided_slice %274 {offsets = [0, 48], sizes = [8, 16], strides = [1, 1]} : vector<8x64xf32> to vector<8x16xf32>
    %290 = vector.extract_strided_slice %244 {offsets = [0, 3], sizes = [8, 1], strides = [1, 1]} : vector<8x4xf32> to vector<8x1xf32>
    %291 = vector.broadcast %290 : vector<8x1xf32> to vector<8x16xf32>
    %292 = arith.mulf %289, %291 : vector<8x16xf32>
    %293 = arith.addf %288, %292 : vector<8x16xf32>
    %294 = vector.extract_strided_slice %247 {offsets = [1, 0], sizes = [1, 32], strides = [1, 1]} : vector<2x32xf32> to vector<1x32xf32>
    %cst_80 = arith.constant 5.000000e-01 : f32
    %295 = vector.broadcast %cst_80 : f32 to vector<8x16xf32>
    %296 = arith.mulf %295, %293 : vector<8x16xf32>
    %297 = arith.addf %241, %296 : vector<8x16xf32>
    %cst_81 = arith.constant dense<0.000000e+00> : vector<8x32xf32>
    %298 = tpu.matmul %297, %6, %cst_81 {dimension_numbers = #tpu.dot_dimension_numbers<[1], [0], [0], [1], [0, 0, 1, 1], [], []>} : vector<8x16xf32>, vector<16x32xf32>, vector<8x32xf32> -> vector<8x32xf32>
    %299 = vector.broadcast %294 : vector<1x32xf32> to vector<8x32xf32>
    %300 = arith.addf %298, %299 : vector<8x32xf32>
    %cst_82 = arith.constant 0.908999979 : f32
    %301 = vector.broadcast %cst_82 : f32 to vector<8x32xf32>
    %302 = arith.mulf %301, %300 : vector<8x32xf32>
    %303 = arith.negf %300 : vector<8x32xf32>
    %304 = math.exp %303 : vector<8x32xf32>
    %cst_83 = arith.constant 1.000000e+00 : f32
    %305 = vector.broadcast %cst_83 : f32 to vector<8x32xf32>
    %306 = arith.addf %305, %304 : vector<8x32xf32>
    %307 = arith.divf %305, %306 : vector<8x32xf32>
    %308 = arith.mulf %302, %307 : vector<8x32xf32>
    %cst_84 = arith.constant dense<0.000000e+00> : vector<8x32xf32>
    %309 = tpu.matmul %308, %7, %cst_84 {dimension_numbers = #tpu.dot_dimension_numbers<[1], [0], [0], [1], [0, 0, 1, 1], [], []>} : vector<8x32xf32>, vector<32x32xf32>, vector<8x32xf32> -> vector<8x32xf32>
    %310 = vector.broadcast %8 : vector<1x32xf32> to vector<8x32xf32>
    %311 = arith.addf %309, %310 : vector<8x32xf32>
    %cst_85 = arith.constant 0.908999979 : f32
    %312 = vector.broadcast %cst_85 : f32 to vector<8x32xf32>
    %313 = arith.mulf %312, %311 : vector<8x32xf32>
    %314 = arith.negf %311 : vector<8x32xf32>
    %315 = math.exp %314 : vector<8x32xf32>
    %cst_86 = arith.constant 1.000000e+00 : f32
    %316 = vector.broadcast %cst_86 : f32 to vector<8x32xf32>
    %317 = arith.addf %316, %315 : vector<8x32xf32>
    %318 = arith.divf %316, %317 : vector<8x32xf32>
    %319 = arith.mulf %313, %318 : vector<8x32xf32>
    %cst_87 = arith.constant dense<0.000000e+00> : vector<8x64xf32>
    %320 = tpu.matmul %319, %9, %cst_87 {dimension_numbers = #tpu.dot_dimension_numbers<[1], [0], [0], [1], [0, 0, 1, 1], [], []>} : vector<8x32xf32>, vector<32x64xf32>, vector<8x64xf32> -> vector<8x64xf32>
    %321 = vector.broadcast %10 : vector<1x64xf32> to vector<8x64xf32>
    %322 = arith.addf %320, %321 : vector<8x64xf32>
    %323 = math.tanh %322 : vector<8x64xf32>
    %324 = vector.extract_strided_slice %323 {offsets = [0, 0], sizes = [8, 16], strides = [1, 1]} : vector<8x64xf32> to vector<8x16xf32>
    %325 = vector.extract_strided_slice %244 {offsets = [0, 0], sizes = [8, 1], strides = [1, 1]} : vector<8x4xf32> to vector<8x1xf32>
    %326 = vector.broadcast %325 : vector<8x1xf32> to vector<8x16xf32>
    %327 = arith.mulf %324, %326 : vector<8x16xf32>
    %328 = vector.extract_strided_slice %323 {offsets = [0, 16], sizes = [8, 16], strides = [1, 1]} : vector<8x64xf32> to vector<8x16xf32>
    %329 = vector.extract_strided_slice %244 {offsets = [0, 1], sizes = [8, 1], strides = [1, 1]} : vector<8x4xf32> to vector<8x1xf32>
    %330 = vector.broadcast %329 : vector<8x1xf32> to vector<8x16xf32>
    %331 = arith.mulf %328, %330 : vector<8x16xf32>
    %332 = arith.addf %327, %331 : vector<8x16xf32>
    %333 = vector.extract_strided_slice %323 {offsets = [0, 32], sizes = [8, 16], strides = [1, 1]} : vector<8x64xf32> to vector<8x16xf32>
    %334 = vector.extract_strided_slice %244 {offsets = [0, 2], sizes = [8, 1], strides = [1, 1]} : vector<8x4xf32> to vector<8x1xf32>
    %335 = vector.broadcast %334 : vector<8x1xf32> to vector<8x16xf32>
    %336 = arith.mulf %333, %335 : vector<8x16xf32>
    %337 = arith.addf %332, %336 : vector<8x16xf32>
    %338 = vector.extract_strided_slice %323 {offsets = [0, 48], sizes = [8, 16], strides = [1, 1]} : vector<8x64xf32> to vector<8x16xf32>
    %339 = vector.extract_strided_slice %244 {offsets = [0, 3], sizes = [8, 1], strides = [1, 1]} : vector<8x4xf32> to vector<8x1xf32>
    %340 = vector.broadcast %339 : vector<8x1xf32> to vector<8x16xf32>
    %341 = arith.mulf %338, %340 : vector<8x16xf32>
    %342 = arith.addf %337, %341 : vector<8x16xf32>
    %343 = arith.addf %241, %342 : vector<8x16xf32>
    %c3_i32 = arith.constant 3 : i32
    %344 = arith.index_cast %c3_i32 : i32 to index
    %c0_88 = arith.constant 0 : index
    %c0_89 = arith.constant 0 : index
    %345 = vector.load %arg2[%344, %c0_88, %c0_89] : memref<7x8x4xf32, #tpu.memory_space<vmem>>, vector<1x8x4xf32>
    %346 = vector.shape_cast %345 : vector<1x8x4xf32> to vector<8x4xf32>
    %347 = arith.index_cast %c3_i32 : i32 to index
    %c0_90 = arith.constant 0 : index
    %c0_91 = arith.constant 0 : index
    %348 = vector.load %arg3[%347, %c0_90, %c0_91] : memref<7x2x32xf32, #tpu.memory_space<vmem>>, vector<1x2x32xf32>
    %349 = vector.shape_cast %348 : vector<1x2x32xf32> to vector<2x32xf32>
    %350 = vector.extract_strided_slice %349 {offsets = [0, 0], sizes = [1, 32], strides = [1, 1]} : vector<2x32xf32> to vector<1x32xf32>
    %cst_92 = arith.constant dense<0.000000e+00> : vector<8x32xf32>
    %351 = tpu.matmul %343, %6, %cst_92 {dimension_numbers = #tpu.dot_dimension_numbers<[1], [0], [0], [1], [0, 0, 1, 1], [], []>} : vector<8x16xf32>, vector<16x32xf32>, vector<8x32xf32> -> vector<8x32xf32>
    %352 = vector.broadcast %350 : vector<1x32xf32> to vector<8x32xf32>
    %353 = arith.addf %351, %352 : vector<8x32xf32>
    %cst_93 = arith.constant 0.908999979 : f32
    %354 = vector.broadcast %cst_93 : f32 to vector<8x32xf32>
    %355 = arith.mulf %354, %353 : vector<8x32xf32>
    %356 = arith.negf %353 : vector<8x32xf32>
    %357 = math.exp %356 : vector<8x32xf32>
    %cst_94 = arith.constant 1.000000e+00 : f32
    %358 = vector.broadcast %cst_94 : f32 to vector<8x32xf32>
    %359 = arith.addf %358, %357 : vector<8x32xf32>
    %360 = arith.divf %358, %359 : vector<8x32xf32>
    %361 = arith.mulf %355, %360 : vector<8x32xf32>
    %cst_95 = arith.constant dense<0.000000e+00> : vector<8x32xf32>
    %362 = tpu.matmul %361, %7, %cst_95 {dimension_numbers = #tpu.dot_dimension_numbers<[1], [0], [0], [1], [0, 0, 1, 1], [], []>} : vector<8x32xf32>, vector<32x32xf32>, vector<8x32xf32> -> vector<8x32xf32>
    %363 = vector.broadcast %8 : vector<1x32xf32> to vector<8x32xf32>
    %364 = arith.addf %362, %363 : vector<8x32xf32>
    %cst_96 = arith.constant 0.908999979 : f32
    %365 = vector.broadcast %cst_96 : f32 to vector<8x32xf32>
    %366 = arith.mulf %365, %364 : vector<8x32xf32>
    %367 = arith.negf %364 : vector<8x32xf32>
    %368 = math.exp %367 : vector<8x32xf32>
    %cst_97 = arith.constant 1.000000e+00 : f32
    %369 = vector.broadcast %cst_97 : f32 to vector<8x32xf32>
    %370 = arith.addf %369, %368 : vector<8x32xf32>
    %371 = arith.divf %369, %370 : vector<8x32xf32>
    %372 = arith.mulf %366, %371 : vector<8x32xf32>
    %cst_98 = arith.constant dense<0.000000e+00> : vector<8x64xf32>
    %373 = tpu.matmul %372, %9, %cst_98 {dimension_numbers = #tpu.dot_dimension_numbers<[1], [0], [0], [1], [0, 0, 1, 1], [], []>} : vector<8x32xf32>, vector<32x64xf32>, vector<8x64xf32> -> vector<8x64xf32>
    %374 = vector.broadcast %10 : vector<1x64xf32> to vector<8x64xf32>
    %375 = arith.addf %373, %374 : vector<8x64xf32>
    %376 = math.tanh %375 : vector<8x64xf32>
    %377 = vector.extract_strided_slice %376 {offsets = [0, 0], sizes = [8, 16], strides = [1, 1]} : vector<8x64xf32> to vector<8x16xf32>
    %378 = vector.extract_strided_slice %346 {offsets = [0, 0], sizes = [8, 1], strides = [1, 1]} : vector<8x4xf32> to vector<8x1xf32>
    %379 = vector.broadcast %378 : vector<8x1xf32> to vector<8x16xf32>
    %380 = arith.mulf %377, %379 : vector<8x16xf32>
    %381 = vector.extract_strided_slice %376 {offsets = [0, 16], sizes = [8, 16], strides = [1, 1]} : vector<8x64xf32> to vector<8x16xf32>
    %382 = vector.extract_strided_slice %346 {offsets = [0, 1], sizes = [8, 1], strides = [1, 1]} : vector<8x4xf32> to vector<8x1xf32>
    %383 = vector.broadcast %382 : vector<8x1xf32> to vector<8x16xf32>
    %384 = arith.mulf %381, %383 : vector<8x16xf32>
    %385 = arith.addf %380, %384 : vector<8x16xf32>
    %386 = vector.extract_strided_slice %376 {offsets = [0, 32], sizes = [8, 16], strides = [1, 1]} : vector<8x64xf32> to vector<8x16xf32>
    %387 = vector.extract_strided_slice %346 {offsets = [0, 2], sizes = [8, 1], strides = [1, 1]} : vector<8x4xf32> to vector<8x1xf32>
    %388 = vector.broadcast %387 : vector<8x1xf32> to vector<8x16xf32>
    %389 = arith.mulf %386, %388 : vector<8x16xf32>
    %390 = arith.addf %385, %389 : vector<8x16xf32>
    %391 = vector.extract_strided_slice %376 {offsets = [0, 48], sizes = [8, 16], strides = [1, 1]} : vector<8x64xf32> to vector<8x16xf32>
    %392 = vector.extract_strided_slice %346 {offsets = [0, 3], sizes = [8, 1], strides = [1, 1]} : vector<8x4xf32> to vector<8x1xf32>
    %393 = vector.broadcast %392 : vector<8x1xf32> to vector<8x16xf32>
    %394 = arith.mulf %391, %393 : vector<8x16xf32>
    %395 = arith.addf %390, %394 : vector<8x16xf32>
    %396 = vector.extract_strided_slice %349 {offsets = [1, 0], sizes = [1, 32], strides = [1, 1]} : vector<2x32xf32> to vector<1x32xf32>
    %cst_99 = arith.constant 5.000000e-01 : f32
    %397 = vector.broadcast %cst_99 : f32 to vector<8x16xf32>
    %398 = arith.mulf %397, %395 : vector<8x16xf32>
    %399 = arith.addf %343, %398 : vector<8x16xf32>
    %cst_100 = arith.constant dense<0.000000e+00> : vector<8x32xf32>
    %400 = tpu.matmul %399, %6, %cst_100 {dimension_numbers = #tpu.dot_dimension_numbers<[1], [0], [0], [1], [0, 0, 1, 1], [], []>} : vector<8x16xf32>, vector<16x32xf32>, vector<8x32xf32> -> vector<8x32xf32>
    %401 = vector.broadcast %396 : vector<1x32xf32> to vector<8x32xf32>
    %402 = arith.addf %400, %401 : vector<8x32xf32>
    %cst_101 = arith.constant 0.908999979 : f32
    %403 = vector.broadcast %cst_101 : f32 to vector<8x32xf32>
    %404 = arith.mulf %403, %402 : vector<8x32xf32>
    %405 = arith.negf %402 : vector<8x32xf32>
    %406 = math.exp %405 : vector<8x32xf32>
    %cst_102 = arith.constant 1.000000e+00 : f32
    %407 = vector.broadcast %cst_102 : f32 to vector<8x32xf32>
    %408 = arith.addf %407, %406 : vector<8x32xf32>
    %409 = arith.divf %407, %408 : vector<8x32xf32>
    %410 = arith.mulf %404, %409 : vector<8x32xf32>
    %cst_103 = arith.constant dense<0.000000e+00> : vector<8x32xf32>
    %411 = tpu.matmul %410, %7, %cst_103 {dimension_numbers = #tpu.dot_dimension_numbers<[1], [0], [0], [1], [0, 0, 1, 1], [], []>} : vector<8x32xf32>, vector<32x32xf32>, vector<8x32xf32> -> vector<8x32xf32>
    %412 = vector.broadcast %8 : vector<1x32xf32> to vector<8x32xf32>
    %413 = arith.addf %411, %412 : vector<8x32xf32>
    %cst_104 = arith.constant 0.908999979 : f32
    %414 = vector.broadcast %cst_104 : f32 to vector<8x32xf32>
    %415 = arith.mulf %414, %413 : vector<8x32xf32>
    %416 = arith.negf %413 : vector<8x32xf32>
    %417 = math.exp %416 : vector<8x32xf32>
    %cst_105 = arith.constant 1.000000e+00 : f32
    %418 = vector.broadcast %cst_105 : f32 to vector<8x32xf32>
    %419 = arith.addf %418, %417 : vector<8x32xf32>
    %420 = arith.divf %418, %419 : vector<8x32xf32>
    %421 = arith.mulf %415, %420 : vector<8x32xf32>
    %cst_106 = arith.constant dense<0.000000e+00> : vector<8x64xf32>
    %422 = tpu.matmul %421, %9, %cst_106 {dimension_numbers = #tpu.dot_dimension_numbers<[1], [0], [0], [1], [0, 0, 1, 1], [], []>} : vector<8x32xf32>, vector<32x64xf32>, vector<8x64xf32> -> vector<8x64xf32>
    %423 = vector.broadcast %10 : vector<1x64xf32> to vector<8x64xf32>
    %424 = arith.addf %422, %423 : vector<8x64xf32>
    %425 = math.tanh %424 : vector<8x64xf32>
    %426 = vector.extract_strided_slice %425 {offsets = [0, 0], sizes = [8, 16], strides = [1, 1]} : vector<8x64xf32> to vector<8x16xf32>
    %427 = vector.extract_strided_slice %346 {offsets = [0, 0], sizes = [8, 1], strides = [1, 1]} : vector<8x4xf32> to vector<8x1xf32>
    %428 = vector.broadcast %427 : vector<8x1xf32> to vector<8x16xf32>
    %429 = arith.mulf %426, %428 : vector<8x16xf32>
    %430 = vector.extract_strided_slice %425 {offsets = [0, 16], sizes = [8, 16], strides = [1, 1]} : vector<8x64xf32> to vector<8x16xf32>
    %431 = vector.extract_strided_slice %346 {offsets = [0, 1], sizes = [8, 1], strides = [1, 1]} : vector<8x4xf32> to vector<8x1xf32>
    %432 = vector.broadcast %431 : vector<8x1xf32> to vector<8x16xf32>
    %433 = arith.mulf %430, %432 : vector<8x16xf32>
    %434 = arith.addf %429, %433 : vector<8x16xf32>
    %435 = vector.extract_strided_slice %425 {offsets = [0, 32], sizes = [8, 16], strides = [1, 1]} : vector<8x64xf32> to vector<8x16xf32>
    %436 = vector.extract_strided_slice %346 {offsets = [0, 2], sizes = [8, 1], strides = [1, 1]} : vector<8x4xf32> to vector<8x1xf32>
    %437 = vector.broadcast %436 : vector<8x1xf32> to vector<8x16xf32>
    %438 = arith.mulf %435, %437 : vector<8x16xf32>
    %439 = arith.addf %434, %438 : vector<8x16xf32>
    %440 = vector.extract_strided_slice %425 {offsets = [0, 48], sizes = [8, 16], strides = [1, 1]} : vector<8x64xf32> to vector<8x16xf32>
    %441 = vector.extract_strided_slice %346 {offsets = [0, 3], sizes = [8, 1], strides = [1, 1]} : vector<8x4xf32> to vector<8x1xf32>
    %442 = vector.broadcast %441 : vector<8x1xf32> to vector<8x16xf32>
    %443 = arith.mulf %440, %442 : vector<8x16xf32>
    %444 = arith.addf %439, %443 : vector<8x16xf32>
    %445 = arith.addf %343, %444 : vector<8x16xf32>
    %c4_i32 = arith.constant 4 : i32
    %446 = arith.index_cast %c4_i32 : i32 to index
    %c0_107 = arith.constant 0 : index
    %c0_108 = arith.constant 0 : index
    %447 = vector.load %arg2[%446, %c0_107, %c0_108] : memref<7x8x4xf32, #tpu.memory_space<vmem>>, vector<1x8x4xf32>
    %448 = vector.shape_cast %447 : vector<1x8x4xf32> to vector<8x4xf32>
    %449 = arith.index_cast %c4_i32 : i32 to index
    %c0_109 = arith.constant 0 : index
    %c0_110 = arith.constant 0 : index
    %450 = vector.load %arg3[%449, %c0_109, %c0_110] : memref<7x2x32xf32, #tpu.memory_space<vmem>>, vector<1x2x32xf32>
    %451 = vector.shape_cast %450 : vector<1x2x32xf32> to vector<2x32xf32>
    %452 = vector.extract_strided_slice %451 {offsets = [0, 0], sizes = [1, 32], strides = [1, 1]} : vector<2x32xf32> to vector<1x32xf32>
    %cst_111 = arith.constant dense<0.000000e+00> : vector<8x32xf32>
    %453 = tpu.matmul %445, %6, %cst_111 {dimension_numbers = #tpu.dot_dimension_numbers<[1], [0], [0], [1], [0, 0, 1, 1], [], []>} : vector<8x16xf32>, vector<16x32xf32>, vector<8x32xf32> -> vector<8x32xf32>
    %454 = vector.broadcast %452 : vector<1x32xf32> to vector<8x32xf32>
    %455 = arith.addf %453, %454 : vector<8x32xf32>
    %cst_112 = arith.constant 0.908999979 : f32
    %456 = vector.broadcast %cst_112 : f32 to vector<8x32xf32>
    %457 = arith.mulf %456, %455 : vector<8x32xf32>
    %458 = arith.negf %455 : vector<8x32xf32>
    %459 = math.exp %458 : vector<8x32xf32>
    %cst_113 = arith.constant 1.000000e+00 : f32
    %460 = vector.broadcast %cst_113 : f32 to vector<8x32xf32>
    %461 = arith.addf %460, %459 : vector<8x32xf32>
    %462 = arith.divf %460, %461 : vector<8x32xf32>
    %463 = arith.mulf %457, %462 : vector<8x32xf32>
    %cst_114 = arith.constant dense<0.000000e+00> : vector<8x32xf32>
    %464 = tpu.matmul %463, %7, %cst_114 {dimension_numbers = #tpu.dot_dimension_numbers<[1], [0], [0], [1], [0, 0, 1, 1], [], []>} : vector<8x32xf32>, vector<32x32xf32>, vector<8x32xf32> -> vector<8x32xf32>
    %465 = vector.broadcast %8 : vector<1x32xf32> to vector<8x32xf32>
    %466 = arith.addf %464, %465 : vector<8x32xf32>
    %cst_115 = arith.constant 0.908999979 : f32
    %467 = vector.broadcast %cst_115 : f32 to vector<8x32xf32>
    %468 = arith.mulf %467, %466 : vector<8x32xf32>
    %469 = arith.negf %466 : vector<8x32xf32>
    %470 = math.exp %469 : vector<8x32xf32>
    %cst_116 = arith.constant 1.000000e+00 : f32
    %471 = vector.broadcast %cst_116 : f32 to vector<8x32xf32>
    %472 = arith.addf %471, %470 : vector<8x32xf32>
    %473 = arith.divf %471, %472 : vector<8x32xf32>
    %474 = arith.mulf %468, %473 : vector<8x32xf32>
    %cst_117 = arith.constant dense<0.000000e+00> : vector<8x64xf32>
    %475 = tpu.matmul %474, %9, %cst_117 {dimension_numbers = #tpu.dot_dimension_numbers<[1], [0], [0], [1], [0, 0, 1, 1], [], []>} : vector<8x32xf32>, vector<32x64xf32>, vector<8x64xf32> -> vector<8x64xf32>
    %476 = vector.broadcast %10 : vector<1x64xf32> to vector<8x64xf32>
    %477 = arith.addf %475, %476 : vector<8x64xf32>
    %478 = math.tanh %477 : vector<8x64xf32>
    %479 = vector.extract_strided_slice %478 {offsets = [0, 0], sizes = [8, 16], strides = [1, 1]} : vector<8x64xf32> to vector<8x16xf32>
    %480 = vector.extract_strided_slice %448 {offsets = [0, 0], sizes = [8, 1], strides = [1, 1]} : vector<8x4xf32> to vector<8x1xf32>
    %481 = vector.broadcast %480 : vector<8x1xf32> to vector<8x16xf32>
    %482 = arith.mulf %479, %481 : vector<8x16xf32>
    %483 = vector.extract_strided_slice %478 {offsets = [0, 16], sizes = [8, 16], strides = [1, 1]} : vector<8x64xf32> to vector<8x16xf32>
    %484 = vector.extract_strided_slice %448 {offsets = [0, 1], sizes = [8, 1], strides = [1, 1]} : vector<8x4xf32> to vector<8x1xf32>
    %485 = vector.broadcast %484 : vector<8x1xf32> to vector<8x16xf32>
    %486 = arith.mulf %483, %485 : vector<8x16xf32>
    %487 = arith.addf %482, %486 : vector<8x16xf32>
    %488 = vector.extract_strided_slice %478 {offsets = [0, 32], sizes = [8, 16], strides = [1, 1]} : vector<8x64xf32> to vector<8x16xf32>
    %489 = vector.extract_strided_slice %448 {offsets = [0, 2], sizes = [8, 1], strides = [1, 1]} : vector<8x4xf32> to vector<8x1xf32>
    %490 = vector.broadcast %489 : vector<8x1xf32> to vector<8x16xf32>
    %491 = arith.mulf %488, %490 : vector<8x16xf32>
    %492 = arith.addf %487, %491 : vector<8x16xf32>
    %493 = vector.extract_strided_slice %478 {offsets = [0, 48], sizes = [8, 16], strides = [1, 1]} : vector<8x64xf32> to vector<8x16xf32>
    %494 = vector.extract_strided_slice %448 {offsets = [0, 3], sizes = [8, 1], strides = [1, 1]} : vector<8x4xf32> to vector<8x1xf32>
    %495 = vector.broadcast %494 : vector<8x1xf32> to vector<8x16xf32>
    %496 = arith.mulf %493, %495 : vector<8x16xf32>
    %497 = arith.addf %492, %496 : vector<8x16xf32>
    %498 = vector.extract_strided_slice %451 {offsets = [1, 0], sizes = [1, 32], strides = [1, 1]} : vector<2x32xf32> to vector<1x32xf32>
    %cst_118 = arith.constant 5.000000e-01 : f32
    %499 = vector.broadcast %cst_118 : f32 to vector<8x16xf32>
    %500 = arith.mulf %499, %497 : vector<8x16xf32>
    %501 = arith.addf %445, %500 : vector<8x16xf32>
    %cst_119 = arith.constant dense<0.000000e+00> : vector<8x32xf32>
    %502 = tpu.matmul %501, %6, %cst_119 {dimension_numbers = #tpu.dot_dimension_numbers<[1], [0], [0], [1], [0, 0, 1, 1], [], []>} : vector<8x16xf32>, vector<16x32xf32>, vector<8x32xf32> -> vector<8x32xf32>
    %503 = vector.broadcast %498 : vector<1x32xf32> to vector<8x32xf32>
    %504 = arith.addf %502, %503 : vector<8x32xf32>
    %cst_120 = arith.constant 0.908999979 : f32
    %505 = vector.broadcast %cst_120 : f32 to vector<8x32xf32>
    %506 = arith.mulf %505, %504 : vector<8x32xf32>
    %507 = arith.negf %504 : vector<8x32xf32>
    %508 = math.exp %507 : vector<8x32xf32>
    %cst_121 = arith.constant 1.000000e+00 : f32
    %509 = vector.broadcast %cst_121 : f32 to vector<8x32xf32>
    %510 = arith.addf %509, %508 : vector<8x32xf32>
    %511 = arith.divf %509, %510 : vector<8x32xf32>
    %512 = arith.mulf %506, %511 : vector<8x32xf32>
    %cst_122 = arith.constant dense<0.000000e+00> : vector<8x32xf32>
    %513 = tpu.matmul %512, %7, %cst_122 {dimension_numbers = #tpu.dot_dimension_numbers<[1], [0], [0], [1], [0, 0, 1, 1], [], []>} : vector<8x32xf32>, vector<32x32xf32>, vector<8x32xf32> -> vector<8x32xf32>
    %514 = vector.broadcast %8 : vector<1x32xf32> to vector<8x32xf32>
    %515 = arith.addf %513, %514 : vector<8x32xf32>
    %cst_123 = arith.constant 0.908999979 : f32
    %516 = vector.broadcast %cst_123 : f32 to vector<8x32xf32>
    %517 = arith.mulf %516, %515 : vector<8x32xf32>
    %518 = arith.negf %515 : vector<8x32xf32>
    %519 = math.exp %518 : vector<8x32xf32>
    %cst_124 = arith.constant 1.000000e+00 : f32
    %520 = vector.broadcast %cst_124 : f32 to vector<8x32xf32>
    %521 = arith.addf %520, %519 : vector<8x32xf32>
    %522 = arith.divf %520, %521 : vector<8x32xf32>
    %523 = arith.mulf %517, %522 : vector<8x32xf32>
    %cst_125 = arith.constant dense<0.000000e+00> : vector<8x64xf32>
    %524 = tpu.matmul %523, %9, %cst_125 {dimension_numbers = #tpu.dot_dimension_numbers<[1], [0], [0], [1], [0, 0, 1, 1], [], []>} : vector<8x32xf32>, vector<32x64xf32>, vector<8x64xf32> -> vector<8x64xf32>
    %525 = vector.broadcast %10 : vector<1x64xf32> to vector<8x64xf32>
    %526 = arith.addf %524, %525 : vector<8x64xf32>
    %527 = math.tanh %526 : vector<8x64xf32>
    %528 = vector.extract_strided_slice %527 {offsets = [0, 0], sizes = [8, 16], strides = [1, 1]} : vector<8x64xf32> to vector<8x16xf32>
    %529 = vector.extract_strided_slice %448 {offsets = [0, 0], sizes = [8, 1], strides = [1, 1]} : vector<8x4xf32> to vector<8x1xf32>
    %530 = vector.broadcast %529 : vector<8x1xf32> to vector<8x16xf32>
    %531 = arith.mulf %528, %530 : vector<8x16xf32>
    %532 = vector.extract_strided_slice %527 {offsets = [0, 16], sizes = [8, 16], strides = [1, 1]} : vector<8x64xf32> to vector<8x16xf32>
    %533 = vector.extract_strided_slice %448 {offsets = [0, 1], sizes = [8, 1], strides = [1, 1]} : vector<8x4xf32> to vector<8x1xf32>
    %534 = vector.broadcast %533 : vector<8x1xf32> to vector<8x16xf32>
    %535 = arith.mulf %532, %534 : vector<8x16xf32>
    %536 = arith.addf %531, %535 : vector<8x16xf32>
    %537 = vector.extract_strided_slice %527 {offsets = [0, 32], sizes = [8, 16], strides = [1, 1]} : vector<8x64xf32> to vector<8x16xf32>
    %538 = vector.extract_strided_slice %448 {offsets = [0, 2], sizes = [8, 1], strides = [1, 1]} : vector<8x4xf32> to vector<8x1xf32>
    %539 = vector.broadcast %538 : vector<8x1xf32> to vector<8x16xf32>
    %540 = arith.mulf %537, %539 : vector<8x16xf32>
    %541 = arith.addf %536, %540 : vector<8x16xf32>
    %542 = vector.extract_strided_slice %527 {offsets = [0, 48], sizes = [8, 16], strides = [1, 1]} : vector<8x64xf32> to vector<8x16xf32>
    %543 = vector.extract_strided_slice %448 {offsets = [0, 3], sizes = [8, 1], strides = [1, 1]} : vector<8x4xf32> to vector<8x1xf32>
    %544 = vector.broadcast %543 : vector<8x1xf32> to vector<8x16xf32>
    %545 = arith.mulf %542, %544 : vector<8x16xf32>
    %546 = arith.addf %541, %545 : vector<8x16xf32>
    %547 = arith.addf %445, %546 : vector<8x16xf32>
    %c5_i32 = arith.constant 5 : i32
    %548 = arith.index_cast %c5_i32 : i32 to index
    %c0_126 = arith.constant 0 : index
    %c0_127 = arith.constant 0 : index
    %549 = vector.load %arg2[%548, %c0_126, %c0_127] : memref<7x8x4xf32, #tpu.memory_space<vmem>>, vector<1x8x4xf32>
    %550 = vector.shape_cast %549 : vector<1x8x4xf32> to vector<8x4xf32>
    %551 = arith.index_cast %c5_i32 : i32 to index
    %c0_128 = arith.constant 0 : index
    %c0_129 = arith.constant 0 : index
    %552 = vector.load %arg3[%551, %c0_128, %c0_129] : memref<7x2x32xf32, #tpu.memory_space<vmem>>, vector<1x2x32xf32>
    %553 = vector.shape_cast %552 : vector<1x2x32xf32> to vector<2x32xf32>
    %554 = vector.extract_strided_slice %553 {offsets = [0, 0], sizes = [1, 32], strides = [1, 1]} : vector<2x32xf32> to vector<1x32xf32>
    %cst_130 = arith.constant dense<0.000000e+00> : vector<8x32xf32>
    %555 = tpu.matmul %547, %6, %cst_130 {dimension_numbers = #tpu.dot_dimension_numbers<[1], [0], [0], [1], [0, 0, 1, 1], [], []>} : vector<8x16xf32>, vector<16x32xf32>, vector<8x32xf32> -> vector<8x32xf32>
    %556 = vector.broadcast %554 : vector<1x32xf32> to vector<8x32xf32>
    %557 = arith.addf %555, %556 : vector<8x32xf32>
    %cst_131 = arith.constant 0.908999979 : f32
    %558 = vector.broadcast %cst_131 : f32 to vector<8x32xf32>
    %559 = arith.mulf %558, %557 : vector<8x32xf32>
    %560 = arith.negf %557 : vector<8x32xf32>
    %561 = math.exp %560 : vector<8x32xf32>
    %cst_132 = arith.constant 1.000000e+00 : f32
    %562 = vector.broadcast %cst_132 : f32 to vector<8x32xf32>
    %563 = arith.addf %562, %561 : vector<8x32xf32>
    %564 = arith.divf %562, %563 : vector<8x32xf32>
    %565 = arith.mulf %559, %564 : vector<8x32xf32>
    %cst_133 = arith.constant dense<0.000000e+00> : vector<8x32xf32>
    %566 = tpu.matmul %565, %7, %cst_133 {dimension_numbers = #tpu.dot_dimension_numbers<[1], [0], [0], [1], [0, 0, 1, 1], [], []>} : vector<8x32xf32>, vector<32x32xf32>, vector<8x32xf32> -> vector<8x32xf32>
    %567 = vector.broadcast %8 : vector<1x32xf32> to vector<8x32xf32>
    %568 = arith.addf %566, %567 : vector<8x32xf32>
    %cst_134 = arith.constant 0.908999979 : f32
    %569 = vector.broadcast %cst_134 : f32 to vector<8x32xf32>
    %570 = arith.mulf %569, %568 : vector<8x32xf32>
    %571 = arith.negf %568 : vector<8x32xf32>
    %572 = math.exp %571 : vector<8x32xf32>
    %cst_135 = arith.constant 1.000000e+00 : f32
    %573 = vector.broadcast %cst_135 : f32 to vector<8x32xf32>
    %574 = arith.addf %573, %572 : vector<8x32xf32>
    %575 = arith.divf %573, %574 : vector<8x32xf32>
    %576 = arith.mulf %570, %575 : vector<8x32xf32>
    %cst_136 = arith.constant dense<0.000000e+00> : vector<8x64xf32>
    %577 = tpu.matmul %576, %9, %cst_136 {dimension_numbers = #tpu.dot_dimension_numbers<[1], [0], [0], [1], [0, 0, 1, 1], [], []>} : vector<8x32xf32>, vector<32x64xf32>, vector<8x64xf32> -> vector<8x64xf32>
    %578 = vector.broadcast %10 : vector<1x64xf32> to vector<8x64xf32>
    %579 = arith.addf %577, %578 : vector<8x64xf32>
    %580 = math.tanh %579 : vector<8x64xf32>
    %581 = vector.extract_strided_slice %580 {offsets = [0, 0], sizes = [8, 16], strides = [1, 1]} : vector<8x64xf32> to vector<8x16xf32>
    %582 = vector.extract_strided_slice %550 {offsets = [0, 0], sizes = [8, 1], strides = [1, 1]} : vector<8x4xf32> to vector<8x1xf32>
    %583 = vector.broadcast %582 : vector<8x1xf32> to vector<8x16xf32>
    %584 = arith.mulf %581, %583 : vector<8x16xf32>
    %585 = vector.extract_strided_slice %580 {offsets = [0, 16], sizes = [8, 16], strides = [1, 1]} : vector<8x64xf32> to vector<8x16xf32>
    %586 = vector.extract_strided_slice %550 {offsets = [0, 1], sizes = [8, 1], strides = [1, 1]} : vector<8x4xf32> to vector<8x1xf32>
    %587 = vector.broadcast %586 : vector<8x1xf32> to vector<8x16xf32>
    %588 = arith.mulf %585, %587 : vector<8x16xf32>
    %589 = arith.addf %584, %588 : vector<8x16xf32>
    %590 = vector.extract_strided_slice %580 {offsets = [0, 32], sizes = [8, 16], strides = [1, 1]} : vector<8x64xf32> to vector<8x16xf32>
    %591 = vector.extract_strided_slice %550 {offsets = [0, 2], sizes = [8, 1], strides = [1, 1]} : vector<8x4xf32> to vector<8x1xf32>
    %592 = vector.broadcast %591 : vector<8x1xf32> to vector<8x16xf32>
    %593 = arith.mulf %590, %592 : vector<8x16xf32>
    %594 = arith.addf %589, %593 : vector<8x16xf32>
    %595 = vector.extract_strided_slice %580 {offsets = [0, 48], sizes = [8, 16], strides = [1, 1]} : vector<8x64xf32> to vector<8x16xf32>
    %596 = vector.extract_strided_slice %550 {offsets = [0, 3], sizes = [8, 1], strides = [1, 1]} : vector<8x4xf32> to vector<8x1xf32>
    %597 = vector.broadcast %596 : vector<8x1xf32> to vector<8x16xf32>
    %598 = arith.mulf %595, %597 : vector<8x16xf32>
    %599 = arith.addf %594, %598 : vector<8x16xf32>
    %600 = vector.extract_strided_slice %553 {offsets = [1, 0], sizes = [1, 32], strides = [1, 1]} : vector<2x32xf32> to vector<1x32xf32>
    %cst_137 = arith.constant 5.000000e-01 : f32
    %601 = vector.broadcast %cst_137 : f32 to vector<8x16xf32>
    %602 = arith.mulf %601, %599 : vector<8x16xf32>
    %603 = arith.addf %547, %602 : vector<8x16xf32>
    %cst_138 = arith.constant dense<0.000000e+00> : vector<8x32xf32>
    %604 = tpu.matmul %603, %6, %cst_138 {dimension_numbers = #tpu.dot_dimension_numbers<[1], [0], [0], [1], [0, 0, 1, 1], [], []>} : vector<8x16xf32>, vector<16x32xf32>, vector<8x32xf32> -> vector<8x32xf32>
    %605 = vector.broadcast %600 : vector<1x32xf32> to vector<8x32xf32>
    %606 = arith.addf %604, %605 : vector<8x32xf32>
    %cst_139 = arith.constant 0.908999979 : f32
    %607 = vector.broadcast %cst_139 : f32 to vector<8x32xf32>
    %608 = arith.mulf %607, %606 : vector<8x32xf32>
    %609 = arith.negf %606 : vector<8x32xf32>
    %610 = math.exp %609 : vector<8x32xf32>
    %cst_140 = arith.constant 1.000000e+00 : f32
    %611 = vector.broadcast %cst_140 : f32 to vector<8x32xf32>
    %612 = arith.addf %611, %610 : vector<8x32xf32>
    %613 = arith.divf %611, %612 : vector<8x32xf32>
    %614 = arith.mulf %608, %613 : vector<8x32xf32>
    %cst_141 = arith.constant dense<0.000000e+00> : vector<8x32xf32>
    %615 = tpu.matmul %614, %7, %cst_141 {dimension_numbers = #tpu.dot_dimension_numbers<[1], [0], [0], [1], [0, 0, 1, 1], [], []>} : vector<8x32xf32>, vector<32x32xf32>, vector<8x32xf32> -> vector<8x32xf32>
    %616 = vector.broadcast %8 : vector<1x32xf32> to vector<8x32xf32>
    %617 = arith.addf %615, %616 : vector<8x32xf32>
    %cst_142 = arith.constant 0.908999979 : f32
    %618 = vector.broadcast %cst_142 : f32 to vector<8x32xf32>
    %619 = arith.mulf %618, %617 : vector<8x32xf32>
    %620 = arith.negf %617 : vector<8x32xf32>
    %621 = math.exp %620 : vector<8x32xf32>
    %cst_143 = arith.constant 1.000000e+00 : f32
    %622 = vector.broadcast %cst_143 : f32 to vector<8x32xf32>
    %623 = arith.addf %622, %621 : vector<8x32xf32>
    %624 = arith.divf %622, %623 : vector<8x32xf32>
    %625 = arith.mulf %619, %624 : vector<8x32xf32>
    %cst_144 = arith.constant dense<0.000000e+00> : vector<8x64xf32>
    %626 = tpu.matmul %625, %9, %cst_144 {dimension_numbers = #tpu.dot_dimension_numbers<[1], [0], [0], [1], [0, 0, 1, 1], [], []>} : vector<8x32xf32>, vector<32x64xf32>, vector<8x64xf32> -> vector<8x64xf32>
    %627 = vector.broadcast %10 : vector<1x64xf32> to vector<8x64xf32>
    %628 = arith.addf %626, %627 : vector<8x64xf32>
    %629 = math.tanh %628 : vector<8x64xf32>
    %630 = vector.extract_strided_slice %629 {offsets = [0, 0], sizes = [8, 16], strides = [1, 1]} : vector<8x64xf32> to vector<8x16xf32>
    %631 = vector.extract_strided_slice %550 {offsets = [0, 0], sizes = [8, 1], strides = [1, 1]} : vector<8x4xf32> to vector<8x1xf32>
    %632 = vector.broadcast %631 : vector<8x1xf32> to vector<8x16xf32>
    %633 = arith.mulf %630, %632 : vector<8x16xf32>
    %634 = vector.extract_strided_slice %629 {offsets = [0, 16], sizes = [8, 16], strides = [1, 1]} : vector<8x64xf32> to vector<8x16xf32>
    %635 = vector.extract_strided_slice %550 {offsets = [0, 1], sizes = [8, 1], strides = [1, 1]} : vector<8x4xf32> to vector<8x1xf32>
    %636 = vector.broadcast %635 : vector<8x1xf32> to vector<8x16xf32>
    %637 = arith.mulf %634, %636 : vector<8x16xf32>
    %638 = arith.addf %633, %637 : vector<8x16xf32>
    %639 = vector.extract_strided_slice %629 {offsets = [0, 32], sizes = [8, 16], strides = [1, 1]} : vector<8x64xf32> to vector<8x16xf32>
    %640 = vector.extract_strided_slice %550 {offsets = [0, 2], sizes = [8, 1], strides = [1, 1]} : vector<8x4xf32> to vector<8x1xf32>
    %641 = vector.broadcast %640 : vector<8x1xf32> to vector<8x16xf32>
    %642 = arith.mulf %639, %641 : vector<8x16xf32>
    %643 = arith.addf %638, %642 : vector<8x16xf32>
    %644 = vector.extract_strided_slice %629 {offsets = [0, 48], sizes = [8, 16], strides = [1, 1]} : vector<8x64xf32> to vector<8x16xf32>
    %645 = vector.extract_strided_slice %550 {offsets = [0, 3], sizes = [8, 1], strides = [1, 1]} : vector<8x4xf32> to vector<8x1xf32>
    %646 = vector.broadcast %645 : vector<8x1xf32> to vector<8x16xf32>
    %647 = arith.mulf %644, %646 : vector<8x16xf32>
    %648 = arith.addf %643, %647 : vector<8x16xf32>
    %649 = arith.addf %547, %648 : vector<8x16xf32>
    %c6_i32 = arith.constant 6 : i32
    %650 = arith.index_cast %c6_i32 : i32 to index
    %c0_145 = arith.constant 0 : index
    %c0_146 = arith.constant 0 : index
    %651 = vector.load %arg2[%650, %c0_145, %c0_146] : memref<7x8x4xf32, #tpu.memory_space<vmem>>, vector<1x8x4xf32>
    %652 = vector.shape_cast %651 : vector<1x8x4xf32> to vector<8x4xf32>
    %653 = arith.index_cast %c6_i32 : i32 to index
    %c0_147 = arith.constant 0 : index
    %c0_148 = arith.constant 0 : index
    %654 = vector.load %arg3[%653, %c0_147, %c0_148] : memref<7x2x32xf32, #tpu.memory_space<vmem>>, vector<1x2x32xf32>
    %655 = vector.shape_cast %654 : vector<1x2x32xf32> to vector<2x32xf32>
    %656 = vector.extract_strided_slice %655 {offsets = [0, 0], sizes = [1, 32], strides = [1, 1]} : vector<2x32xf32> to vector<1x32xf32>
    %cst_149 = arith.constant dense<0.000000e+00> : vector<8x32xf32>
    %657 = tpu.matmul %649, %6, %cst_149 {dimension_numbers = #tpu.dot_dimension_numbers<[1], [0], [0], [1], [0, 0, 1, 1], [], []>} : vector<8x16xf32>, vector<16x32xf32>, vector<8x32xf32> -> vector<8x32xf32>
    %658 = vector.broadcast %656 : vector<1x32xf32> to vector<8x32xf32>
    %659 = arith.addf %657, %658 : vector<8x32xf32>
    %cst_150 = arith.constant 0.908999979 : f32
    %660 = vector.broadcast %cst_150 : f32 to vector<8x32xf32>
    %661 = arith.mulf %660, %659 : vector<8x32xf32>
    %662 = arith.negf %659 : vector<8x32xf32>
    %663 = math.exp %662 : vector<8x32xf32>
    %cst_151 = arith.constant 1.000000e+00 : f32
    %664 = vector.broadcast %cst_151 : f32 to vector<8x32xf32>
    %665 = arith.addf %664, %663 : vector<8x32xf32>
    %666 = arith.divf %664, %665 : vector<8x32xf32>
    %667 = arith.mulf %661, %666 : vector<8x32xf32>
    %cst_152 = arith.constant dense<0.000000e+00> : vector<8x32xf32>
    %668 = tpu.matmul %667, %7, %cst_152 {dimension_numbers = #tpu.dot_dimension_numbers<[1], [0], [0], [1], [0, 0, 1, 1], [], []>} : vector<8x32xf32>, vector<32x32xf32>, vector<8x32xf32> -> vector<8x32xf32>
    %669 = vector.broadcast %8 : vector<1x32xf32> to vector<8x32xf32>
    %670 = arith.addf %668, %669 : vector<8x32xf32>
    %cst_153 = arith.constant 0.908999979 : f32
    %671 = vector.broadcast %cst_153 : f32 to vector<8x32xf32>
    %672 = arith.mulf %671, %670 : vector<8x32xf32>
    %673 = arith.negf %670 : vector<8x32xf32>
    %674 = math.exp %673 : vector<8x32xf32>
    %cst_154 = arith.constant 1.000000e+00 : f32
    %675 = vector.broadcast %cst_154 : f32 to vector<8x32xf32>
    %676 = arith.addf %675, %674 : vector<8x32xf32>
    %677 = arith.divf %675, %676 : vector<8x32xf32>
    %678 = arith.mulf %672, %677 : vector<8x32xf32>
    %cst_155 = arith.constant dense<0.000000e+00> : vector<8x64xf32>
    %679 = tpu.matmul %678, %9, %cst_155 {dimension_numbers = #tpu.dot_dimension_numbers<[1], [0], [0], [1], [0, 0, 1, 1], [], []>} : vector<8x32xf32>, vector<32x64xf32>, vector<8x64xf32> -> vector<8x64xf32>
    %680 = vector.broadcast %10 : vector<1x64xf32> to vector<8x64xf32>
    %681 = arith.addf %679, %680 : vector<8x64xf32>
    %682 = math.tanh %681 : vector<8x64xf32>
    %683 = vector.extract_strided_slice %682 {offsets = [0, 0], sizes = [8, 16], strides = [1, 1]} : vector<8x64xf32> to vector<8x16xf32>
    %684 = vector.extract_strided_slice %652 {offsets = [0, 0], sizes = [8, 1], strides = [1, 1]} : vector<8x4xf32> to vector<8x1xf32>
    %685 = vector.broadcast %684 : vector<8x1xf32> to vector<8x16xf32>
    %686 = arith.mulf %683, %685 : vector<8x16xf32>
    %687 = vector.extract_strided_slice %682 {offsets = [0, 16], sizes = [8, 16], strides = [1, 1]} : vector<8x64xf32> to vector<8x16xf32>
    %688 = vector.extract_strided_slice %652 {offsets = [0, 1], sizes = [8, 1], strides = [1, 1]} : vector<8x4xf32> to vector<8x1xf32>
    %689 = vector.broadcast %688 : vector<8x1xf32> to vector<8x16xf32>
    %690 = arith.mulf %687, %689 : vector<8x16xf32>
    %691 = arith.addf %686, %690 : vector<8x16xf32>
    %692 = vector.extract_strided_slice %682 {offsets = [0, 32], sizes = [8, 16], strides = [1, 1]} : vector<8x64xf32> to vector<8x16xf32>
    %693 = vector.extract_strided_slice %652 {offsets = [0, 2], sizes = [8, 1], strides = [1, 1]} : vector<8x4xf32> to vector<8x1xf32>
    %694 = vector.broadcast %693 : vector<8x1xf32> to vector<8x16xf32>
    %695 = arith.mulf %692, %694 : vector<8x16xf32>
    %696 = arith.addf %691, %695 : vector<8x16xf32>
    %697 = vector.extract_strided_slice %682 {offsets = [0, 48], sizes = [8, 16], strides = [1, 1]} : vector<8x64xf32> to vector<8x16xf32>
    %698 = vector.extract_strided_slice %652 {offsets = [0, 3], sizes = [8, 1], strides = [1, 1]} : vector<8x4xf32> to vector<8x1xf32>
    %699 = vector.broadcast %698 : vector<8x1xf32> to vector<8x16xf32>
    %700 = arith.mulf %697, %699 : vector<8x16xf32>
    %701 = arith.addf %696, %700 : vector<8x16xf32>
    %702 = vector.extract_strided_slice %655 {offsets = [1, 0], sizes = [1, 32], strides = [1, 1]} : vector<2x32xf32> to vector<1x32xf32>
    %cst_156 = arith.constant 5.000000e-01 : f32
    %703 = vector.broadcast %cst_156 : f32 to vector<8x16xf32>
    %704 = arith.mulf %703, %701 : vector<8x16xf32>
    %705 = arith.addf %649, %704 : vector<8x16xf32>
    %cst_157 = arith.constant dense<0.000000e+00> : vector<8x32xf32>
    %706 = tpu.matmul %705, %6, %cst_157 {dimension_numbers = #tpu.dot_dimension_numbers<[1], [0], [0], [1], [0, 0, 1, 1], [], []>} : vector<8x16xf32>, vector<16x32xf32>, vector<8x32xf32> -> vector<8x32xf32>
    %707 = vector.broadcast %702 : vector<1x32xf32> to vector<8x32xf32>
    %708 = arith.addf %706, %707 : vector<8x32xf32>
    %cst_158 = arith.constant 0.908999979 : f32
    %709 = vector.broadcast %cst_158 : f32 to vector<8x32xf32>
    %710 = arith.mulf %709, %708 : vector<8x32xf32>
    %711 = arith.negf %708 : vector<8x32xf32>
    %712 = math.exp %711 : vector<8x32xf32>
    %cst_159 = arith.constant 1.000000e+00 : f32
    %713 = vector.broadcast %cst_159 : f32 to vector<8x32xf32>
    %714 = arith.addf %713, %712 : vector<8x32xf32>
    %715 = arith.divf %713, %714 : vector<8x32xf32>
    %716 = arith.mulf %710, %715 : vector<8x32xf32>
    %cst_160 = arith.constant dense<0.000000e+00> : vector<8x32xf32>
    %717 = tpu.matmul %716, %7, %cst_160 {dimension_numbers = #tpu.dot_dimension_numbers<[1], [0], [0], [1], [0, 0, 1, 1], [], []>} : vector<8x32xf32>, vector<32x32xf32>, vector<8x32xf32> -> vector<8x32xf32>
    %718 = vector.broadcast %8 : vector<1x32xf32> to vector<8x32xf32>
    %719 = arith.addf %717, %718 : vector<8x32xf32>
    %cst_161 = arith.constant 0.908999979 : f32
    %720 = vector.broadcast %cst_161 : f32 to vector<8x32xf32>
    %721 = arith.mulf %720, %719 : vector<8x32xf32>
    %722 = arith.negf %719 : vector<8x32xf32>
    %723 = math.exp %722 : vector<8x32xf32>
    %cst_162 = arith.constant 1.000000e+00 : f32
    %724 = vector.broadcast %cst_162 : f32 to vector<8x32xf32>
    %725 = arith.addf %724, %723 : vector<8x32xf32>
    %726 = arith.divf %724, %725 : vector<8x32xf32>
    %727 = arith.mulf %721, %726 : vector<8x32xf32>
    %cst_163 = arith.constant dense<0.000000e+00> : vector<8x64xf32>
    %728 = tpu.matmul %727, %9, %cst_163 {dimension_numbers = #tpu.dot_dimension_numbers<[1], [0], [0], [1], [0, 0, 1, 1], [], []>} : vector<8x32xf32>, vector<32x64xf32>, vector<8x64xf32> -> vector<8x64xf32>
    %729 = vector.broadcast %10 : vector<1x64xf32> to vector<8x64xf32>
    %730 = arith.addf %728, %729 : vector<8x64xf32>
    %731 = math.tanh %730 : vector<8x64xf32>
    %732 = vector.extract_strided_slice %731 {offsets = [0, 0], sizes = [8, 16], strides = [1, 1]} : vector<8x64xf32> to vector<8x16xf32>
    %733 = vector.extract_strided_slice %652 {offsets = [0, 0], sizes = [8, 1], strides = [1, 1]} : vector<8x4xf32> to vector<8x1xf32>
    %734 = vector.broadcast %733 : vector<8x1xf32> to vector<8x16xf32>
    %735 = arith.mulf %732, %734 : vector<8x16xf32>
    %736 = vector.extract_strided_slice %731 {offsets = [0, 16], sizes = [8, 16], strides = [1, 1]} : vector<8x64xf32> to vector<8x16xf32>
    %737 = vector.extract_strided_slice %652 {offsets = [0, 1], sizes = [8, 1], strides = [1, 1]} : vector<8x4xf32> to vector<8x1xf32>
    %738 = vector.broadcast %737 : vector<8x1xf32> to vector<8x16xf32>
    %739 = arith.mulf %736, %738 : vector<8x16xf32>
    %740 = arith.addf %735, %739 : vector<8x16xf32>
    %741 = vector.extract_strided_slice %731 {offsets = [0, 32], sizes = [8, 16], strides = [1, 1]} : vector<8x64xf32> to vector<8x16xf32>
    %742 = vector.extract_strided_slice %652 {offsets = [0, 2], sizes = [8, 1], strides = [1, 1]} : vector<8x4xf32> to vector<8x1xf32>
    %743 = vector.broadcast %742 : vector<8x1xf32> to vector<8x16xf32>
    %744 = arith.mulf %741, %743 : vector<8x16xf32>
    %745 = arith.addf %740, %744 : vector<8x16xf32>
    %746 = vector.extract_strided_slice %731 {offsets = [0, 48], sizes = [8, 16], strides = [1, 1]} : vector<8x64xf32> to vector<8x16xf32>
    %747 = vector.extract_strided_slice %652 {offsets = [0, 3], sizes = [8, 1], strides = [1, 1]} : vector<8x4xf32> to vector<8x1xf32>
    %748 = vector.broadcast %747 : vector<8x1xf32> to vector<8x16xf32>
    %749 = arith.mulf %746, %748 : vector<8x16xf32>
    %750 = arith.addf %745, %749 : vector<8x16xf32>
    %751 = arith.addf %649, %750 : vector<8x16xf32>
    %c7_i32 = arith.constant 7 : i32
    %cst_164 = arith.constant dense<0.000000e+00> : vector<8x1xf32>
    %752 = tpu.matmul %751, %11, %cst_164 {dimension_numbers = #tpu.dot_dimension_numbers<[1], [0], [0], [1], [0, 0, 1, 1], [], []>} : vector<8x16xf32>, vector<16x1xf32>, vector<8x1xf32> -> vector<8x1xf32>
    %c0_165 = arith.constant 0 : index
    %c0_166 = arith.constant 0 : index
    %753 = vector.load %arg16[%c0_165, %c0_166] : memref<8x1xf32, #tpu.memory_space<vmem>>, vector<8x1xf32>
    tpu.vector_store %arg16[%c0_165, %c0_166], %752 {strides = array<i32>} : memref<8x1xf32, #tpu.memory_space<vmem>>, vector<8x1xf32>,
    return
  }
  func.func @transform_0(%arg0: i32) -> (i32, i32) {
    %c0_i32 = arith.constant 0 : i32
    %c0_i32_0 = arith.constant 0 : i32
    return %arg0, %c0_i32 : i32, i32
  }
  func.func @transform_1(%arg0: i32) -> (i32, i32, i32) {
    %c0_i32 = arith.constant 0 : i32
    %c0_i32_0 = arith.constant 0 : i32
    %c0_i32_1 = arith.constant 0 : i32
    return %c0_i32, %arg0, %c0_i32_0 : i32, i32, i32
  }
  func.func @transform_2(%arg0: i32) -> (i32, i32, i32) {
    %c0_i32 = arith.constant 0 : i32
    %c0_i32_0 = arith.constant 0 : i32
    %c0_i32_1 = arith.constant 0 : i32
    %c0_i32_2 = arith.constant 0 : i32
    return %c0_i32, %c0_i32_0, %c0_i32_1 : i32, i32, i32
  }
  func.func @transform_3(%arg0: i32) -> (i32, i32) {
    %c0_i32 = arith.constant 0 : i32
    %c0_i32_0 = arith.constant 0 : i32
    %c0_i32_1 = arith.constant 0 : i32
    return %c0_i32, %c0_i32_0 : i32, i32
  }
  func.func @transform_4(%arg0: i32) -> (i32, i32) {
    %c0_i32 = arith.constant 0 : i32
    %c0_i32_0 = arith.constant 0 : i32
    %c0_i32_1 = arith.constant 0 : i32
    return %c0_i32, %c0_i32_0 : i32, i32
  }
  func.func @transform_5(%arg0: i32) -> (i32, i32) {
    %c0_i32 = arith.constant 0 : i32
    %c0_i32_0 = arith.constant 0 : i32
    %c0_i32_1 = arith.constant 0 : i32
    return %c0_i32, %c0_i32_0 : i32, i32
  }
  func.func @transform_6(%arg0: i32) -> (i32, i32) {
    %c0_i32 = arith.constant 0 : i32
    %c0_i32_0 = arith.constant 0 : i32
    %c0_i32_1 = arith.constant 0 : i32
    return %c0_i32, %c0_i32_0 : i32, i32
  }
  func.func @transform_7(%arg0: i32) -> (i32, i32) {
    %c0_i32 = arith.constant 0 : i32
    %c0_i32_0 = arith.constant 0 : i32
    %c0_i32_1 = arith.constant 0 : i32
    return %c0_i32, %c0_i32_0 : i32, i32
  }
  func.func @transform_8(%arg0: i32) -> (i32, i32) {
    %c0_i32 = arith.constant 0 : i32
    %c0_i32_0 = arith.constant 0 : i32
    %c0_i32_1 = arith.constant 0 : i32
    return %c0_i32, %c0_i32_0 : i32, i32
  }
  func.func @transform_9(%arg0: i32) -> (i32, i32) {
    %c0_i32 = arith.constant 0 : i32
    %c0_i32_0 = arith.constant 0 : i32
    %c0_i32_1 = arith.constant 0 : i32
    return %c0_i32, %c0_i32_0 : i32, i32
  }
  func.func @transform_10(%arg0: i32) -> (i32, i32) {
    %c0_i32 = arith.constant 0 : i32
    %c0_i32_0 = arith.constant 0 : i32
    %c0_i32_1 = arith.constant 0 : i32
    return %c0_i32, %c0_i32_0 : i32, i32
  }
  func.func @transform_11(%arg0: i32) -> (i32, i32) {
    %c0_i32 = arith.constant 0 : i32
    %c0_i32_0 = arith.constant 0 : i32
    %c0_i32_1 = arith.constant 0 : i32
    return %c0_i32, %c0_i32_0 : i32, i32
  }
  func.func @transform_12(%arg0: i32) -> (i32, i32) {
    %c0_i32 = arith.constant 0 : i32
    %c0_i32_0 = arith.constant 0 : i32
    %c0_i32_1 = arith.constant 0 : i32
    return %c0_i32, %c0_i32_0 : i32, i32
  }
  func.func @transform_13(%arg0: i32) -> (i32, i32) {
    %c0_i32 = arith.constant 0 : i32
    %c0_i32_0 = arith.constant 0 : i32
    %c0_i32_1 = arith.constant 0 : i32
    return %c0_i32, %c0_i32_0 : i32, i32
  }
  func.func @transform_14(%arg0: i32) -> (i32, i32) {
    %c0_i32 = arith.constant 0 : i32
    %c0_i32_0 = arith.constant 0 : i32
    %c0_i32_1 = arith.constant 0 : i32
    return %c0_i32, %c0_i32_0 : i32, i32
  }
  func.func @transform_15(%arg0: i32) -> (i32, i32) {
    %c0_i32 = arith.constant 0 : i32
    %c0_i32_0 = arith.constant 0 : i32
    return %arg0, %c0_i32 : i32, i32
  }
}

</mosaic_0001>

<bundles_post_ra>
// kernel: tpu_custom_call.1
= control target key start
LH: loop header
LB: loop body
LE: loop exit
PB: predicated region body
PF: predicated region fallthrough
CT: control target
= control target key end

     0   :  { %20 = vsyncpa [#allocation3], 0  ;;  %s5400_s18 = smov [#allocation2]   ;;  %s6160_s0 = inlined_call_operand.vmem [shape: f32[8,4], index: 0, kind: input, shape index: {}]   ;;  %s6161_s1 = inlined_call_operand.vmem [shape: f32[7,8,4], index: 1, kind: input, shape index: {}]   ;;  %s6162_s2 = inlined_call_operand.hbm [shape: f32[7,2,32], index: 2, kind: input, shape index: {}]   ;;  %s6163_s3 = inlined_call_operand.vmem [shape: f32[4,32], index: 3, kind: input, shape index: {}]   ;;  %s6164_s4 = inlined_call_operand.vmem [shape: f32[1,32], index: 4, kind: input, shape index: {}]   ;;  %s6165_s5 = inlined_call_operand.vmem [shape: f32[32,32], index: 5, kind: input, shape index: {}]   ;;  %s6166_s6 = inlined_call_operand.vmem [shape: f32[1,32], index: 6, kind: input, shape index: {}]   ;;  %s6167_s7 = inlined_call_operand.vmem [shape: f32[32,16], index: 7, kind: input, shape index: {}]   ;;  %s6168_s8 = inlined_call_operand.vmem [shape: f32[1,16], index: 8, kind: input, shape index: {}]   ;;  %s6169_s9 = inlined_call_operand.vmem [shape: f32[16,32], index: 9, kind: input, shape index: {}]   ;;  %s6170_s10 = inlined_call_operand.vmem [shape: f32[32,32], index: 10, kind: input, shape index: {}]   ;;  %s6171_s11 = inlined_call_operand.vmem [shape: f32[1,32], index: 11, kind: input, shape index: {}]   ;;  %s6172_s12 = inlined_call_operand.vmem [shape: f32[32,64], index: 12, kind: input, shape index: {}]   ;;  %s6173_s13 = inlined_call_operand.vmem [shape: f32[1,64], index: 13, kind: input, shape index: {}]   ;;  %s6174_s14 = inlined_call_operand.vmem [shape: f32[16,1], index: 14, kind: input, shape index: {}]   ;;  %s6175_s15 = inlined_call_operand.vmem [shape: f32[8,1], index: 15, kind: output, shape index: {}]  }
   0x1   :  { %s30_s19 = sshll.u32 %s5400_s18, 4  ;;  %s5376_s22 = scalar_lea.hbm %s6162_s2, 224  ;;  %s31_s19 = int_to_ptr.vmem [resolvable:$true] %s30_s19 }
   0x2   :  { %p5377_p0 = scmp.ne.s32.totalorder %s6162_s2, %s5376_s22  ;;  %p5380_p1 = scmp.lt.u32.totalorder %s5376_s22, %s6162_s2 }
   0x4   :  { %p5382_p2 = pnand %p5380_p1, %p5377_p0 }
   0x6   :  { %5385 = shalt.err (!%p5382_p2)
}
   0x7   :  { %s5386_s27 = scalar_lea.vmem %s31_s19, 224  ;;  %p5391_p4 = scmp.lt.s32.totalorder %s31_s19, %s31_s19 }
   0x8   :  { %p5387_p3 = scmp.ne.s32.totalorder %s31_s19, %s5386_s27  ;;  %p5392_p5 = scmp.lt.s32.totalorder %s5386_s27, %s5386_s27 }
   0xa   :  { %p5393_p6 = por %p5392_p5, %p5391_p4 }
   0xc   :  { %p5394_p7 = pnand %p5393_p6, %p5387_p3 }
   0xe   :  { %5397 = shalt.err (!%p5394_p7)
}
   0xf   :  { %s5401_s28 = smov 32   ;;  %s5402_s29 = smov 2  }
  0x10   :  { %36 = dma.hbm_to_vmem [thread:$0]  %s6162_s2, 224, %s31_s19, [#allocation3], %s5401_s28, %s5401_s28, %s5402_s29  }
  0x11   :  { %5398 = dma.done.wait [#allocation3], 224  }
  0x12   :  { %5399 = vsyncadd [#allocation3], 4294967072  ;;  %v5403_v0 = vmov 0.0   ;;  %vm5404_vm0 = vmmov 0   ;;  %vm101_vm1 = vcmask 1043456   ;;  %vm97_vm2 = vcmask 31744  }
  0x13   :  { %4520 = vmatprep.subr.mxu0 %v5403_v0  ;;  %4522 = vmatprep.mubr.msk.f32.mxu0 %vm5404_vm0, %v5403_v0  ;;  %v64_v1 = vld [vmem:[%s6163_s3] sm:$0xf]  ;;  %v67_v4 = vld [vmem:[%s6165_s5 + $0x8] sm:$0xff]  ;;  %v5405_v6 = vmov 0.0|0.0   ;;  %v68_v7 = vld [vmem:[%s6165_s5 + $0x10] sm:$0xff]  ;;  %vm189_vm3 = vcmask 261120   ;;  %v352_v49 = vlaneseq }
  0x14   :  { %4533 = vmatprep.mubr.msk.f32.mxu1 %vm5404_vm0, %v5403_v0  ;;  %v90_v2 = vld [vmem:[%s6160_s0] sm:$0xff]  ;;  %4521 = vmatpush3.msk.msra.mxu0 %vm101_vm1, %v64_v1  ;;  %v69_v8 = vld [vmem:[%s6165_s5 + $0x18] sm:$0xff]  ;;  %v72_v21 = vld [vmem:[%s6167_s7 + $0x8] sm:$0xff]  ;;  %vm356_vm4 = vcmask 130048   ;;  %s5410_s22 = smov 96   ;;  %vm4228_vm5 = vcmask 7168  }
  0x15   :  { %4523 = vmatmul.mubr.msk.f32.vlgmr.msra.gmra.mrb[0].mxu0 %vm97_vm2, %v90_v2  ;;  %v66_v3 = vld [vmem:[%s6165_s5] sm:$0xff]  ;;  %4960 = vmatprep.subr.bf16.mxu1 %v5405_v6  ;;  %v4964_v9 = vpack.c.bf16 %v69_v8, %v68_v7  ;;  %v73_v23 = vld [vmem:[%s6167_s7 + $0x10] sm:$0xff]  ;;  %v74_v24 = vld [vmem:[%s6167_s7 + $0x18] sm:$0xff]  ;;  %v5599_v50 = vshrl.u32 %v352_v49, 7  ;;  %v5406_v8 = vmov 3  }
  0x16   :  { %4544 = vmatprep.mubr.msk.f32.mxu0 %vm5404_vm0, %v5403_v0  ;;  %v4961_v5 = vpack.c.bf16 %v67_v4, %v66_v3  ;;  %4966 = vmatprep.subr.bf16.mxu0 %v5405_v6  ;;  %v4235_v10 = vld [vmem:[%s6164_s4] ss:$0 sm:$0xff]  ;;  %v4970_v25 = vpack.c.bf16 %v74_v24, %v73_v23  ;;  %v77_v27 = vld [vmem:[%s6169_s9 + $0x8] sm:$0xff]  ;;  %v80_v46 = vld [vmem:[%s6170_s10 + $0x10] sm:$0xff] }
  0x17   :  { %v71_v20 = vld [vmem:[%s6167_s7] sm:$0xff]  ;;  %v79_v44 = vld [vmem:[%s6170_s10 + $0x8] sm:$0xff]  ;;  %v81_v47 = vld [vmem:[%s6170_s10 + $0x18] sm:$0xff]  ;;  %v5602_v51 = vsub.s32 0, %v5599_v50  ;;  %5200 = vset.pattern.permute.xlu1 %v5406_v8  ;;  %s5411_s7 = smov 112  }
  0x18   :  { %4962 = vmatpush3.bf16.msra.mxu1 %v4961_v5  ;;  %v4967_v22 = vpack.c.bf16 %v72_v21, %v71_v20  ;;  %v76_v26 = vld [vmem:[%s6169_s9] sm:$0xff]  ;;  %v5595_v48 = vpack.c.bf16 %v81_v47, %v80_v46  ;;  %v84_v1 = vld [vmem:[%s6172_s12 + $0x8] sm:$0xff]  ;;  %v85_v3 = vld [vmem:[%s6172_s12 + $0x10] sm:$0xff]  ;;  %s5412_s9 = smov 80   ;;  %v5684_v46 = vsub.s32 1, %v5599_v50 }
  0x19   :  { %4963 = vmatprep.subr.bf16.mxu1 %v5405_v6  ;;  %v5560_v28 = vpack.c.bf16 %v77_v27, %v76_v26  ;;  %v4239_v29 = vld [vmem:[%s6166_s6] ss:$0 sm:$0xff]  ;;  %v86_v4 = vld [vmem:[%s6172_s12 + $0x18] sm:$0xff] }
  0x1a   :  { %4968 = vmatpush3.bf16.msra.mxu0 %v4967_v22  ;;  %v4242_v39 = vld [vmem:[%s6168_s8] ss:$0 sm:$0xff]  ;;  %v5629_v5 = vpack.c.bf16 %v86_v4, %v85_v3 }
  0x1b   :  { %4969 = vmatprep.subr.bf16.mxu0 %v5405_v6  ;;  %v78_v43 = vld [vmem:[%s6170_s10] sm:$0xff] }
  0x1c   :  { %4965 = vmatpush3.bf16.msra.mxu1 %v4964_v9  ;;  %v5585_v45 = vpack.c.bf16 %v79_v44, %v78_v43  ;;  %v5604_v52 = vld [vmem:[#allocation2] sm:$0x3]  ;;  %v5407_v9 = vmov 1  }
  0x1d   :  { %4972 = vmatprep.subr.bf16.mxu1 %v5405_v6  ;;  %v355_v53 = vrot.slane %v5604_v52, %v5602_v51  ;;  %v83_v63 = vld [vmem:[%s6172_s12] sm:$0xff]  ;;  %5198 = vset.pattern.permute.xlu0 %v5407_v9  ;;  %v646_v47 = vrot.slane %v5604_v52, %v5684_v46 }
  0x1e   :  { %4971 = vmatpush3.bf16.msra.mxu0 %v4970_v25  ;;  %v5619_v2 = vpack.c.bf16 %v84_v1, %v83_v63  ;;  %v350_v7 = vld [vmem:[%s6161_s1] sm:$0xff] }
  0x1f   :  { %4975 = vmatprep.subr.bf16.mxu0 %v5405_v6  ;;  %632 = vperm.xlu1 %5200, %v350_v7   ;;  %v5657_v22 = vld [vmem:[%s6173_s13] ss:$0 sm:$0xff] }
  0x20   :  { %612 = vperm.xlu0 %5198, %v350_v7  }
  0x9f   :  { %v5660_v26 = vpop.permute.xlu0 %612 }
  0xe8   :  { %v171_v11 = vpop.f32.mrb[0].mxu0 }
  0xe9   :  { %v172_v12 = vadd.f32 %v4235_v10, %v171_v11  ;;  %v4524_v13 = vpop.f32.mrb[1].mxu0  ;;  %v5408_v10 = vmov 0   ;;  %v5409_v11 = vmov 2  }
  0xea   :  { %5201 = vset.pattern.permute.xlu1 %v5408_v10  ;;  %5199 = vset.pattern.permute.xlu0 %v5409_v11 }
  0xeb   :  { %v4238_v14 = vmul.f32 -1.442695, %v172_v12  ;;  %v175_v17 = vmul.f32 0.909, %v172_v12  ;;  %607 = vperm.xlu1 %5201, %v350_v7   ;;  %622 = vperm.xlu0 %5199, %v350_v7   ;;  %v5644_v12 = vld [vmem:[%s6171_s11] ss:$0 sm:$0xff] }
  0xed   :  { %5226 = vpow2.f32 %v4238_v14 }
  0xef   :  { %5202 = vset.pattern.permute.xlu1 %v5407_v9 }
  0xf7   :  { %v5227_v15 = vpop.eup %5226 }
  0xf8   :  { %v179_v16 = vadd.f32 1.0, %v5227_v15 }
  0xfa   :  { %5228 = vrcp.f32 %v179_v16 }
 0x104   :  { %v5229_v18 = vpop.eup %5228 }
 0x105   :  { %v182_v19 = vmul.f32 %v5229_v18, %v175_v17 }
 0x107   :  { %4534 = vmatmul.mubr.msk.f32.vlgmr.msra.gmra.mrb[0].mxu1 %vm189_vm3, %v182_v19 }
 0x108   :  { %4551 = vmatprep.mubr.msk.f32.mxu1 %vm5404_vm0, %v5403_v0  ;;  %4974 = vmatpush3.bf16.msra.mxu1 %v5560_v28 }
 0x109   :  { %4981 = vmatprep.subr.bf16.mxu1 %v5405_v6 }
 0x16a   :  { %v5662_v27 = vpop.permute.xlu0 %622 }
 0x1da   :  { %v259_v30 = vpop.f32.mrb[0].mxu1 }
 0x1db   :  { %v260_v31 = vadd.f32 %v4239_v29, %v259_v30  ;;  %v4535_v32 = vpop.f32.mrb[1].mxu1 }
 0x1dc   :  { %v5668_v32 = vpop.permute.xlu1 %632 }
 0x1dd   :  { %v4241_v33 = vmul.f32 -1.442695, %v260_v31  ;;  %v263_v36 = vmul.f32 0.909, %v260_v31 }
 0x1df   :  { %5230 = vpow2.f32 %v4241_v33 }
 0x1e9   :  { %v5231_v34 = vpop.eup %5230 }
 0x1ea   :  { %v267_v35 = vadd.f32 1.0, %v5231_v34  ;;  %v5672_v34 = vpop.permute.xlu1 %607 }
 0x1ec   :  { %5232 = vrcp.f32 %v267_v35 }
 0x1f6   :  { %v5233_v37 = vpop.eup %5232 }
 0x1f7   :  { %v270_v38 = vmul.f32 %v5233_v37, %v263_v36 }
 0x1f9   :  { %4545 = vmatmul.mubr.msk.f32.vlgmr.msra.gmra.mrb[2].mxu0 %vm189_vm3, %v270_v38 }
 0x1fa   :  { %4562 = vmatprep.mubr.msk.f32.mxu0 %vm5404_vm0, %v5403_v0  ;;  %4977 = vmatpush3.bf16.msra.mxu0 %v5585_v45 }
 0x1fb   :  { %4978 = vmatprep.subr.bf16.mxu0 %v5405_v6 }
 0x1fe   :  { %4980 = vmatpush3.bf16.msra.mxu0 %v5595_v48 }
 0x1ff   :  { %4987 = vmatprep.subr.bf16.mxu0 %v5405_v6 }
 0x2cc   :  { %v346_v40 = vpop.f32.mrb[2].mxu0 }
 0x2cd   :  { %v5573_v41 = vadd.f32 %v4242_v39, %v346_v40  ;;  %v4546_v42 = vpop.f32.mrb[3].mxu0 }
 0x2cf   :  { %4552 = vmatmul.mubr.msk.f32.vlgmr.msra.gmra.mrb[2].mxu1 %vm356_vm4, %v5573_v41 }
 0x2d0   :  { %4573 = vmatprep.mubr.msk.f32.mxu1 %vm5404_vm0, %v5403_v0  ;;  %4983 = vmatpush3.bf16.msra.mxu1 %v5619_v2 }
 0x2d1   :  { %4984 = vmatprep.subr.bf16.mxu1 %v5405_v6 }
 0x2d4   :  { %4986 = vmatpush3.bf16.msra.mxu1 %v5629_v5 }
 0x2d5   :  { %4990 = vmatprep.subr.bf16.mxu1 %v5405_v6 }
 0x3a2   :  { %v426_v54 = vpop.f32.mrb[2].mxu1 }
 0x3a3   :  { %v427_v55 = vadd.f32 %v426_v54, %v355_v53  ;;  %v4553_v56 = vpop.f32.mrb[3].mxu1 }
 0x3a5   :  { %v4245_v57 = vmul.f32 -1.442695, %v427_v55  ;;  %v430_v60 = vmul.f32 0.909, %v427_v55 }
 0x3a7   :  { %5234 = vpow2.f32 %v4245_v57 }
 0x3b1   :  { %v5235_v58 = vpop.eup %5234 }
 0x3b2   :  { %v434_v59 = vadd.f32 1.0, %v5235_v58 }
 0x3b4   :  { %5236 = vrcp.f32 %v434_v59 }
 0x3be   :  { %v5237_v61 = vpop.eup %5236 }
 0x3bf   :  { %v437_v62 = vmul.f32 %v5237_v61, %v430_v60 }
 0x3c1   :  { %4563 = vmatmul.mubr.msk.f32.vlgmr.msra.gmra.mrb[4].mxu0 %vm189_vm3, %v437_v62 }
 0x3c2   :  { %4989 = vmatpush3.bf16.msra.mxu0 %v5560_v28  ;;  %4580 = vmatprep.mubr.msk.f32.mxu0 %vm5404_vm0, %v5403_v0 }
 0x3c3   :  { %4996 = vmatprep.subr.bf16.mxu0 %v5405_v6 }
 0x494   :  { %v513_v13 = vpop.f32.mrb[4].mxu0 }
 0x495   :  { %v514_v14 = vadd.f32 %v5644_v12, %v513_v13  ;;  %v4564_v15 = vpop.f32.mrb[5].mxu0 }
 0x497   :  { %v4248_v16 = vmul.f32 -1.442695, %v514_v14  ;;  %v517_v19 = vmul.f32 0.909, %v514_v14 }
 0x499   :  { %5238 = vpow2.f32 %v4248_v16 }
 0x4a3   :  { %v5239_v17 = vpop.eup %5238 }
 0x4a4   :  { %v521_v18 = vadd.f32 1.0, %v5239_v17 }
 0x4a6   :  { %5240 = vrcp.f32 %v521_v18 }
 0x4b0   :  { %v5241_v20 = vpop.eup %5240 }
 0x4b1   :  { %v524_v21 = vmul.f32 %v5241_v20, %v517_v19  ;;  %v4256_v20 = vld [vmem:[%s6161_s1 + $0x8] sm:$0xff] }
 0x4b3   :  { %4574 = vmatmul.mubr.msk.f32.vlgmr.msra.gmra.mrb[4].mxu1 %vm189_vm3, %v524_v21 }
 0x4b4   :  { %4992 = vmatpush3.bf16.msra.mxu1 %v5585_v45  ;;  %4591 = vmatprep.mubr.msk.f32.mxu1 %vm5404_vm0, %v5403_v0 }
 0x4b5   :  { %4993 = vmatprep.subr.bf16.mxu1 %v5405_v6 }
 0x4b8   :  { %4995 = vmatpush3.bf16.msra.mxu1 %v5595_v48 }
 0x4b9   :  { %5002 = vmatprep.subr.bf16.mxu1 %v5405_v6 }
 0x586   :  { %v600_v23 = vpop.f32.mrb[4].mxu1 }
 0x587   :  { %v601_v24 = vadd.f32 %v5657_v22, %v600_v23  ;;  %v4575_v25 = vpop.f32.mrb[5].mxu1 }
 0x589   :  { %5242 = vtanh.f32 %v601_v24 }
 0x593   :  { %v5243_v29 = vpop.eup %5242 }
 0x594   :  { %v615_v30 = vmul.f32 %v5243_v29, %v5660_v26  ;;  %v625_v31 = vmul.f32 %v5243_v29, %v5662_v27  ;;  %v635_v33 = vmul.f32 %v5243_v29, %v5668_v32  ;;  %v610_v35 = vmul.f32 %v5243_v29, %v5672_v34 }
 0x596   :  { %627 = vrot.lane.b32.xlu0 %v625_v31, %s5410_s22  ;;  %617 = vrot.lane.b32.xlu1 %v615_v30, %s5411_s7  ;;  %v5727_v31 = vld [vmem:[#allocation2 + $0x2] sm:$0x3] }
 0x59a   :  { %637 = vrot.lane.b32.xlu1 %v635_v33, %s5412_s9 }
 0x608   :  { %v618_v36 = vpop.permute.xlu1 %617  ;;  %v628_v38 = vpop.permute.xlu0 %627 }
 0x609   :  { %v620_v37 = vadd.f32 %v618_v36, %v610_v35 }
 0x60b   :  { %v630_v39 = vadd.f32 %v628_v38, %v620_v37 }
 0x60c   :  { %v638_v40 = vpop.permute.xlu1 %637 }
 0x60d   :  { %v640_v42 = vadd.f32 %v638_v40, %v630_v39 }
 0x60f   :  { %v641_v43 = vmul.f32 0.5, %v640_v42 }
 0x611   :  { %v642_v44 = vadd.f32 %v641_v43, %v5573_v41 }
 0x613   :  { %4581 = vmatmul.mubr.msk.f32.vlgmr.msra.gmra.mrb[6].mxu0 %vm356_vm4, %v642_v44 }
 0x614   :  { %4998 = vmatpush3.bf16.msra.mxu0 %v5619_v2  ;;  %4602 = vmatprep.mubr.msk.f32.mxu0 %vm5404_vm0, %v5403_v0 }
 0x615   :  { %4999 = vmatprep.subr.bf16.mxu0 %v5405_v6 }
 0x618   :  { %5001 = vmatpush3.bf16.msra.mxu0 %v5629_v5 }
 0x619   :  { %5005 = vmatprep.subr.bf16.mxu0 %v5405_v6 }
 0x6e6   :  { %v716_v49 = vpop.f32.mrb[6].mxu0 }
 0x6e7   :  { %v717_v53 = vadd.f32 %v716_v49, %v646_v47  ;;  %v4582_v54 = vpop.f32.mrb[7].mxu0 }
 0x6e9   :  { %v4252_v55 = vmul.f32 -1.442695, %v717_v53  ;;  %v720_v58 = vmul.f32 0.909, %v717_v53 }
 0x6eb   :  { %5244 = vpow2.f32 %v4252_v55 }
 0x6f5   :  { %v5245_v56 = vpop.eup %5244 }
 0x6f6   :  { %v724_v57 = vadd.f32 1.0, %v5245_v56 }
 0x6f8   :  { %5246 = vrcp.f32 %v724_v57 }
 0x702   :  { %v5247_v59 = vpop.eup %5246 }
 0x703   :  { %v727_v60 = vmul.f32 %v5247_v59, %v720_v58 }
 0x705   :  { %4592 = vmatmul.mubr.msk.f32.vlgmr.msra.gmra.mrb[6].mxu1 %vm189_vm3, %v727_v60 }
 0x706   :  { %5004 = vmatpush3.bf16.msra.mxu1 %v5560_v28  ;;  %4609 = vmatprep.mubr.msk.f32.mxu1 %vm5404_vm0, %v5403_v0 }
 0x707   :  { %5011 = vmatprep.subr.bf16.mxu1 %v5405_v6 }
 0x7d8   :  { %v797_v50 = vpop.f32.mrb[6].mxu1 }
 0x7d9   :  { %v798_v52 = vadd.f32 %v5644_v12, %v797_v50  ;;  %v4593_v61 = vpop.f32.mrb[7].mxu1 }
 0x7db   :  { %v4254_v62 = vmul.f32 -1.442695, %v798_v52  ;;  %v801_v3 = vmul.f32 0.909, %v798_v52 }
 0x7dd   :  { %5248 = vpow2.f32 %v4254_v62 }
 0x7e7   :  { %v5249_v63 = vpop.eup %5248 }
 0x7e8   :  { %v805_v1 = vadd.f32 1.0, %v5249_v63 }
 0x7ea   :  { %5250 = vrcp.f32 %v805_v1 }
 0x7f4   :  { %v5251_v4 = vpop.eup %5250 }
 0x7f5   :  { %v808_v7 = vmul.f32 %v5251_v4, %v801_v3 }
 0x7f7   :  { %4603 = vmatmul.mubr.msk.f32.vlgmr.msra.gmra.mrb[8].mxu0 %vm189_vm3, %v808_v7 }
 0x7f8   :  { %5007 = vmatpush3.bf16.msra.mxu0 %v5585_v45  ;;  %4620 = vmatprep.mubr.msk.f32.mxu0 %vm5404_vm0, %v5403_v0 }
 0x7f9   :  { %5008 = vmatprep.subr.bf16.mxu0 %v5405_v6 }
 0x7fc   :  { %5010 = vmatpush3.bf16.msra.mxu0 %v5595_v48 }
 0x7fd   :  { %5017 = vmatprep.subr.bf16.mxu0 %v5405_v6 }
 0x8ca   :  { %v878_v13 = vpop.f32.mrb[8].mxu0 }
 0x8cb   :  { %v879_v14 = vadd.f32 %v5657_v22, %v878_v13  ;;  %v4604_v15 = vpop.f32.mrb[9].mxu0 }
 0x8cd   :  { %5252 = vtanh.f32 %v879_v14 }
 0x8d7   :  { %v5253_v16 = vpop.eup %5252 }
 0x8d8   :  { %v890_v17 = vmul.f32 %v5253_v16, %v5662_v27  ;;  %v884_v18 = vmul.f32 %v5253_v16, %v5660_v26  ;;  %v896_v19 = vmul.f32 %v5253_v16, %v5668_v32  ;;  %v883_v21 = vmul.f32 %v5253_v16, %v5672_v34 }
 0x8da   :  { %892 = vrot.lane.b32.xlu1 %v890_v17, %s5410_s22  ;;  %886 = vrot.lane.b32.xlu0 %v884_v18, %s5411_s7 }
 0x8de   :  { %898 = vrot.lane.b32.xlu0 %v896_v19, %s5412_s9  ;;  %1154 = vperm.xlu1 %5202, %v4256_v20  }
 0x8e2   :  { %1164 = vperm.xlu0 %5199, %v4256_v20   ;;  %5203 = vset.pattern.permute.xlu1 %v5406_v8 }
 0x8e3   :  { %1174 = vperm.xlu1 %5203, %v4256_v20  }
 0x8e6   :  { %5204 = vset.pattern.permute.xlu0 %v5408_v10 }
 0x8e7   :  { %1149 = vperm.xlu0 %5204, %v4256_v20   ;;  %5206 = vset.pattern.permute.xlu1 %v5409_v11  ;;  %v1188_v20 = vrot.slane %v5727_v31, %v5684_v46 }
 0x8eb   :  { %5205 = vset.pattern.permute.xlu0 %v5407_v9 }
 0x94c   :  { %v887_v23 = vpop.permute.xlu0 %886  ;;  %v893_v25 = vpop.permute.xlu1 %892 }
 0x94d   :  { %v889_v24 = vadd.f32 %v887_v23, %v883_v21 }
 0x94f   :  { %v895_v26 = vadd.f32 %v893_v25, %v889_v24 }
 0x950   :  { %v899_v27 = vpop.permute.xlu0 %898 }
 0x951   :  { %v901_v29 = vadd.f32 %v899_v27, %v895_v26 }
 0x953   :  { %v5717_v30 = vadd.f32 %v901_v29, %v5573_v41  ;;  %v910_v41 = vrot.slane %v5727_v31, %v5602_v51 }
 0x955   :  { %4610 = vmatmul.mubr.msk.f32.vlgmr.msra.gmra.mrb[8].mxu1 %vm356_vm4, %v5717_v30 }
 0x956   :  { %5013 = vmatpush3.bf16.msra.mxu1 %v5619_v2  ;;  %4631 = vmatprep.mubr.msk.f32.mxu1 %vm5404_vm0, %v5403_v0 }
 0x957   :  { %5014 = vmatprep.subr.bf16.mxu1 %v5405_v6 }
 0x95a   :  { %5016 = vmatpush3.bf16.msra.mxu1 %v5629_v5 }
 0x95b   :  { %5020 = vmatprep.subr.bf16.mxu1 %v5405_v6 }
 0x95d   :  { %v5745_v60 = vpop.permute.xlu1 %1154 }
 0x961   :  { %v1165_v63 = vpop.permute.xlu0 %1164 }
 0x962   :  { %v5747_v50 = vpop.permute.xlu1 %1174 }
 0x966   :  { %v1150_v3 = vpop.permute.xlu0 %1149 }
 0xa28   :  { %v980_v32 = vpop.f32.mrb[8].mxu1 }
 0xa29   :  { %v981_v33 = vadd.f32 %v980_v32, %v910_v41  ;;  %v4611_v34 = vpop.f32.mrb[9].mxu1 }
 0xa2b   :  { %v4258_v35 = vmul.f32 -1.442695, %v981_v33  ;;  %v984_v38 = vmul.f32 0.909, %v981_v33 }
 0xa2d   :  { %5254 = vpow2.f32 %v4258_v35 }
 0xa37   :  { %v5255_v36 = vpop.eup %5254 }
 0xa38   :  { %v988_v37 = vadd.f32 1.0, %v5255_v36 }
 0xa3a   :  { %5256 = vrcp.f32 %v988_v37 }
 0xa44   :  { %v5257_v39 = vpop.eup %5256 }
 0xa45   :  { %v991_v40 = vmul.f32 %v5257_v39, %v984_v38 }
 0xa47   :  { %4621 = vmatmul.mubr.msk.f32.vlgmr.msra.gmra.mrb[10].mxu0 %vm189_vm3, %v991_v40 }
 0xa48   :  { %5019 = vmatpush3.bf16.msra.mxu0 %v5560_v28  ;;  %4638 = vmatprep.mubr.msk.f32.mxu0 %vm5404_vm0, %v5403_v0 }
 0xa49   :  { %5026 = vmatprep.subr.bf16.mxu0 %v5405_v6 }
 0xb1a   :  { %v1061_v42 = vpop.f32.mrb[10].mxu0 }
 0xb1b   :  { %v1062_v43 = vadd.f32 %v5644_v12, %v1061_v42  ;;  %v4622_v44 = vpop.f32.mrb[11].mxu0 }
 0xb1d   :  { %v4260_v47 = vmul.f32 -1.442695, %v1062_v43  ;;  %v1065_v54 = vmul.f32 0.909, %v1062_v43 }
 0xb1f   :  { %5258 = vpow2.f32 %v4260_v47 }
 0xb29   :  { %v5259_v49 = vpop.eup %5258 }
 0xb2a   :  { %v1069_v53 = vadd.f32 1.0, %v5259_v49 }
 0xb2c   :  { %5260 = vrcp.f32 %v1069_v53 }
 0xb36   :  { %v5261_v55 = vpop.eup %5260 }
 0xb37   :  { %v1072_v56 = vmul.f32 %v5261_v55, %v1065_v54 }
 0xb39   :  { %4632 = vmatmul.mubr.msk.f32.vlgmr.msra.gmra.mrb[10].mxu1 %vm189_vm3, %v1072_v56 }
 0xb3a   :  { %5022 = vmatpush3.bf16.msra.mxu1 %v5585_v45  ;;  %4649 = vmatprep.mubr.msk.f32.mxu1 %vm5404_vm0, %v5403_v0 }
 0xb3b   :  { %5023 = vmatprep.subr.bf16.mxu1 %v5405_v6 }
 0xb3e   :  { %5025 = vmatpush3.bf16.msra.mxu1 %v5595_v48 }
 0xb3f   :  { %5032 = vmatprep.subr.bf16.mxu1 %v5405_v6 }
 0xc0c   :  { %v1142_v57 = vpop.f32.mrb[10].mxu1 }
 0xc0d   :  { %v1143_v58 = vadd.f32 %v5657_v22, %v1142_v57  ;;  %v4633_v59 = vpop.f32.mrb[11].mxu1 }
 0xc0f   :  { %5262 = vtanh.f32 %v1143_v58 }
 0xc19   :  { %v5263_v52 = vpop.eup %5262 }
 0xc1a   :  { %v1157_v61 = vmul.f32 %v5263_v52, %v5745_v60  ;;  %v1177_v62 = vmul.f32 %v5263_v52, %v5747_v50  ;;  %v1167_v1 = vmul.f32 %v5263_v52, %v1165_v63  ;;  %v1152_v7 = vmul.f32 %v5263_v52, %v1150_v3 }
 0xc1c   :  { %1179 = vrot.lane.b32.xlu0 %v1177_v62, %s5412_s9  ;;  %1159 = vrot.lane.b32.xlu1 %v1157_v61, %s5411_s7 }
 0xc20   :  { %1169 = vrot.lane.b32.xlu1 %v1167_v1, %s5410_s22 }
 0xc8e   :  { %v1160_v4 = vpop.permute.xlu1 %1159  ;;  %v1180_v16 = vpop.permute.xlu0 %1179 }
 0xc8f   :  { %v1162_v13 = vadd.f32 %v1160_v4, %v1152_v7 }
 0xc92   :  { %v1170_v14 = vpop.permute.xlu1 %1169 }
 0xc93   :  { %v1172_v15 = vadd.f32 %v1170_v14, %v1162_v13 }
 0xc95   :  { %v1182_v17 = vadd.f32 %v1180_v16, %v1172_v15  ;;  %v4267_v16 = vld [vmem:[%s6161_s1 + $0x10] sm:$0xff] }
 0xc97   :  { %v1183_v18 = vmul.f32 0.5, %v1182_v17 }
 0xc99   :  { %v1184_v19 = vadd.f32 %v1183_v18, %v5717_v30 }
 0xc9b   :  { %4639 = vmatmul.mubr.msk.f32.vlgmr.msra.gmra.mrb[12].mxu0 %vm356_vm4, %v1184_v19 }
 0xc9c   :  { %5028 = vmatpush3.bf16.msra.mxu0 %v5619_v2  ;;  %4660 = vmatprep.mubr.msk.f32.mxu0 %vm5404_vm0, %v5403_v0 }
 0xc9d   :  { %5029 = vmatprep.subr.bf16.mxu0 %v5405_v6 }
 0xca0   :  { %5031 = vmatpush3.bf16.msra.mxu0 %v5629_v5 }
 0xca1   :  { %5035 = vmatprep.subr.bf16.mxu0 %v5405_v6 }
 0xd6e   :  { %v1258_v21 = vpop.f32.mrb[12].mxu0 }
 0xd6f   :  { %v1259_v23 = vadd.f32 %v1258_v21, %v1188_v20  ;;  %v4640_v24 = vpop.f32.mrb[13].mxu0 }
 0xd71   :  { %v4263_v25 = vmul.f32 -1.442695, %v1259_v23  ;;  %v1262_v29 = vmul.f32 0.909, %v1259_v23 }
 0xd73   :  { %5264 = vpow2.f32 %v4263_v25 }
 0xd7d   :  { %v5265_v26 = vpop.eup %5264 }
 0xd7e   :  { %v1266_v27 = vadd.f32 1.0, %v5265_v26 }
 0xd80   :  { %5266 = vrcp.f32 %v1266_v27 }
 0xd8a   :  { %v5267_v41 = vpop.eup %5266 }
 0xd8b   :  { %v1269_v32 = vmul.f32 %v5267_v41, %v1262_v29 }
 0xd8d   :  { %4650 = vmatmul.mubr.msk.f32.vlgmr.msra.gmra.mrb[12].mxu1 %vm189_vm3, %v1269_v32 }
 0xd8e   :  { %5034 = vmatpush3.bf16.msra.mxu1 %v5560_v28  ;;  %4667 = vmatprep.mubr.msk.f32.mxu1 %vm5404_vm0, %v5403_v0 }
 0xd8f   :  { %5041 = vmatprep.subr.bf16.mxu1 %v5405_v6 }
 0xe60   :  { %v1339_v31 = vpop.f32.mrb[12].mxu1 }
 0xe61   :  { %v1340_v33 = vadd.f32 %v5644_v12, %v1339_v31  ;;  %v4651_v34 = vpop.f32.mrb[13].mxu1 }
 0xe63   :  { %v4265_v35 = vmul.f32 -1.442695, %v1340_v33  ;;  %v1343_v38 = vmul.f32 0.909, %v1340_v33 }
 0xe65   :  { %5268 = vpow2.f32 %v4265_v35 }
 0xe6f   :  { %v5269_v36 = vpop.eup %5268 }
 0xe70   :  { %v1347_v37 = vadd.f32 1.0, %v5269_v36 }
 0xe72   :  { %5270 = vrcp.f32 %v1347_v37 }
 0xe7c   :  { %v5271_v39 = vpop.eup %5270 }
 0xe7d   :  { %v1350_v40 = vmul.f32 %v5271_v39, %v1343_v38 }
 0xe7f   :  { %4661 = vmatmul.mubr.msk.f32.vlgmr.msra.gmra.mrb[14].mxu0 %vm189_vm3, %v1350_v40 }
 0xe80   :  { %5037 = vmatpush3.bf16.msra.mxu0 %v5585_v45  ;;  %4678 = vmatprep.mubr.msk.f32.mxu0 %vm5404_vm0, %v5403_v0 }
 0xe81   :  { %5038 = vmatprep.subr.bf16.mxu0 %v5405_v6 }
 0xe84   :  { %5040 = vmatpush3.bf16.msra.mxu0 %v5595_v48 }
 0xe85   :  { %5047 = vmatprep.subr.bf16.mxu0 %v5405_v6 }
 0xf52   :  { %v1420_v42 = vpop.f32.mrb[14].mxu0 }
 0xf53   :  { %v1421_v43 = vadd.f32 %v5657_v22, %v1420_v42  ;;  %v4662_v44 = vpop.f32.mrb[15].mxu0 }
 0xf55   :  { %5272 = vtanh.f32 %v1421_v43 }
 0xf5f   :  { %v5273_v47 = vpop.eup %5272 }
 0xf60   :  { %v1432_v49 = vmul.f32 %v5273_v47, %v1165_v63  ;;  %v1426_v53 = vmul.f32 %v5273_v47, %v5745_v60  ;;  %v1438_v54 = vmul.f32 %v5273_v47, %v5747_v50  ;;  %v1425_v55 = vmul.f32 %v5273_v47, %v1150_v3  ;;  %v5794_v60 = vld [vmem:[#allocation2 + $0x4] sm:$0x3] }
 0xf62   :  { %1434 = vrot.lane.b32.xlu0 %v1432_v49, %s5410_s22  ;;  %1428 = vrot.lane.b32.xlu1 %v1426_v53, %s5411_s7 }
 0xf66   :  { %1440 = vrot.lane.b32.xlu1 %v1438_v54, %s5412_s9  ;;  %1696 = vperm.xlu0 %5205, %v4267_v16  }
 0xf6a   :  { %1706 = vperm.xlu1 %5206, %v4267_v16   ;;  %5208 = vset.pattern.permute.xlu0 %v5408_v10 }
 0xf6b   :  { %1691 = vperm.xlu0 %5208, %v4267_v16  }
 0xf6e   :  { %5207 = vset.pattern.permute.xlu1 %v5406_v8 }
 0xf6f   :  { %1716 = vperm.xlu1 %5207, %v4267_v16   ;;  %5209 = vset.pattern.permute.xlu0 %v5407_v9 }
 0xf73   :  { %5210 = vset.pattern.permute.xlu1 %v5409_v11 }
 0xfd4   :  { %v1429_v56 = vpop.permute.xlu1 %1428  ;;  %v1435_v58 = vpop.permute.xlu0 %1434 }
 0xfd5   :  { %v1431_v57 = vadd.f32 %v1429_v56, %v1425_v55  ;;  %v1730_v55 = vrot.slane %v5794_v60, %v5684_v46 }
 0xfd7   :  { %v1437_v59 = vadd.f32 %v1435_v58, %v1431_v57 }
 0xfd8   :  { %v1441_v52 = vpop.permute.xlu1 %1440 }
 0xfd9   :  { %v1443_v61 = vadd.f32 %v1441_v52, %v1437_v59 }
 0xfdb   :  { %v5784_v62 = vadd.f32 %v1443_v61, %v5717_v30  ;;  %v1452_v30 = vrot.slane %v5794_v60, %v5602_v51 }
 0xfdd   :  { %4668 = vmatmul.mubr.msk.f32.vlgmr.msra.gmra.mrb[14].mxu1 %vm356_vm4, %v5784_v62 }
 0xfde   :  { %5043 = vmatpush3.bf16.msra.mxu1 %v5619_v2  ;;  %4689 = vmatprep.mubr.msk.f32.mxu1 %vm5404_vm0, %v5403_v0 }
 0xfdf   :  { %5044 = vmatprep.subr.bf16.mxu1 %v5405_v6 }
 0xfe2   :  { %5046 = vmatpush3.bf16.msra.mxu1 %v5629_v5 }
 0xfe3   :  { %5050 = vmatprep.subr.bf16.mxu1 %v5405_v6 }
 0xfe5   :  { %v1697_v34 = vpop.permute.xlu0 %1696 }
 0xfe9   :  { %v5819_v32 = vpop.permute.xlu1 %1706 }
 0xfea   :  { %v1692_v38 = vpop.permute.xlu0 %1691 }
 0xfee   :  { %v5821_v31 = vpop.permute.xlu1 %1716 }
0x10b0   :  { %v1522_v50 = vpop.f32.mrb[14].mxu1 }
0x10b1   :  { %v1523_v63 = vadd.f32 %v1522_v50, %v1452_v30  ;;  %v4669_v1 = vpop.f32.mrb[15].mxu1 }
0x10b3   :  { %v4269_v3 = vmul.f32 -1.442695, %v1523_v63  ;;  %v1526_v13 = vmul.f32 0.909, %v1523_v63 }
0x10b5   :  { %5274 = vpow2.f32 %v4269_v3 }
0x10bf   :  { %v5275_v4 = vpop.eup %5274 }
0x10c0   :  { %v1530_v7 = vadd.f32 1.0, %v5275_v4 }
0x10c2   :  { %5276 = vrcp.f32 %v1530_v7 }
0x10cc   :  { %v5277_v14 = vpop.eup %5276 }
0x10cd   :  { %v1533_v15 = vmul.f32 %v5277_v14, %v1526_v13 }
0x10cf   :  { %4679 = vmatmul.mubr.msk.f32.vlgmr.msra.gmra.mrb[16].mxu0 %vm189_vm3, %v1533_v15 }
0x10d0   :  { %5049 = vmatpush3.bf16.msra.mxu0 %v5560_v28  ;;  %4696 = vmatprep.mubr.msk.f32.mxu0 %vm5404_vm0, %v5403_v0 }
0x10d1   :  { %5056 = vmatprep.subr.bf16.mxu0 %v5405_v6 }
0x11a2   :  { %v1603_v17 = vpop.f32.mrb[16].mxu0 }
0x11a3   :  { %v1604_v18 = vadd.f32 %v5644_v12, %v1603_v17  ;;  %v4680_v19 = vpop.f32.mrb[17].mxu0 }
0x11a5   :  { %v4271_v20 = vmul.f32 -1.442695, %v1604_v18  ;;  %v1607_v24 = vmul.f32 0.909, %v1604_v18 }
0x11a7   :  { %5278 = vpow2.f32 %v4271_v20 }
0x11b1   :  { %v5279_v21 = vpop.eup %5278 }
0x11b2   :  { %v1611_v23 = vadd.f32 1.0, %v5279_v21 }
0x11b4   :  { %5280 = vrcp.f32 %v1611_v23 }
0x11be   :  { %v5281_v25 = vpop.eup %5280 }
0x11bf   :  { %v1614_v26 = vmul.f32 %v5281_v25, %v1607_v24 }
0x11c1   :  { %4690 = vmatmul.mubr.msk.f32.vlgmr.msra.gmra.mrb[16].mxu1 %vm189_vm3, %v1614_v26 }
0x11c2   :  { %5052 = vmatpush3.bf16.msra.mxu1 %v5585_v45  ;;  %4707 = vmatprep.mubr.msk.f32.mxu1 %vm5404_vm0, %v5403_v0 }
0x11c3   :  { %5053 = vmatprep.subr.bf16.mxu1 %v5405_v6 }
0x11c6   :  { %5055 = vmatpush3.bf16.msra.mxu1 %v5595_v48 }
0x11c7   :  { %5062 = vmatprep.subr.bf16.mxu1 %v5405_v6 }
0x1294   :  { %v1684_v27 = vpop.f32.mrb[16].mxu1 }
0x1295   :  { %v1685_v29 = vadd.f32 %v5657_v22, %v1684_v27  ;;  %v4691_v41 = vpop.f32.mrb[17].mxu1 }
0x1297   :  { %5282 = vtanh.f32 %v1685_v29 }
0x12a1   :  { %v5283_v33 = vpop.eup %5282 }
0x12a2   :  { %v1699_v35 = vmul.f32 %v5283_v33, %v1697_v34  ;;  %v1719_v36 = vmul.f32 %v5283_v33, %v5821_v31  ;;  %v1709_v37 = vmul.f32 %v5283_v33, %v5819_v32  ;;  %v1694_v40 = vmul.f32 %v5283_v33, %v1692_v38 }
0x12a4   :  { %1721 = vrot.lane.b32.xlu0 %v1719_v36, %s5412_s9  ;;  %1701 = vrot.lane.b32.xlu1 %v1699_v35, %s5411_s7 }
0x12a8   :  { %1711 = vrot.lane.b32.xlu1 %v1709_v37, %s5410_s22 }
0x1316   :  { %v1702_v39 = vpop.permute.xlu1 %1701  ;;  %v1722_v47 = vpop.permute.xlu0 %1721 }
0x1317   :  { %v1704_v42 = vadd.f32 %v1702_v39, %v1694_v40 }
0x131a   :  { %v1712_v43 = vpop.permute.xlu1 %1711 }
0x131b   :  { %v1714_v44 = vadd.f32 %v1712_v43, %v1704_v42 }
0x131d   :  { %v1724_v49 = vadd.f32 %v1722_v47, %v1714_v44  ;;  %v4278_v47 = vld [vmem:[%s6161_s1 + $0x18] sm:$0xff] }
0x131f   :  { %v1725_v53 = vmul.f32 0.5, %v1724_v49 }
0x1321   :  { %v1726_v54 = vadd.f32 %v1725_v53, %v5784_v62 }
0x1323   :  { %4697 = vmatmul.mubr.msk.f32.vlgmr.msra.gmra.mrb[18].mxu0 %vm356_vm4, %v1726_v54 }
0x1324   :  { %5058 = vmatpush3.bf16.msra.mxu0 %v5619_v2  ;;  %4718 = vmatprep.mubr.msk.f32.mxu0 %vm5404_vm0, %v5403_v0 }
0x1325   :  { %5059 = vmatprep.subr.bf16.mxu0 %v5405_v6 }
0x1328   :  { %5061 = vmatpush3.bf16.msra.mxu0 %v5629_v5 }
0x1329   :  { %5065 = vmatprep.subr.bf16.mxu0 %v5405_v6 }
0x13f6   :  { %v1800_v56 = vpop.f32.mrb[18].mxu0 }
0x13f7   :  { %v1801_v57 = vadd.f32 %v1800_v56, %v1730_v55  ;;  %v4698_v58 = vpop.f32.mrb[19].mxu0 }
0x13f9   :  { %v4274_v59 = vmul.f32 -1.442695, %v1801_v57  ;;  %v1804_v30 = vmul.f32 0.909, %v1801_v57 }
0x13fb   :  { %5284 = vpow2.f32 %v4274_v59 }
0x1405   :  { %v5285_v52 = vpop.eup %5284 }
0x1406   :  { %v1808_v61 = vadd.f32 1.0, %v5285_v52 }
0x1408   :  { %5286 = vrcp.f32 %v1808_v61 }
0x1412   :  { %v5287_v50 = vpop.eup %5286 }
0x1413   :  { %v1811_v63 = vmul.f32 %v5287_v50, %v1804_v30 }
0x1415   :  { %4708 = vmatmul.mubr.msk.f32.vlgmr.msra.gmra.mrb[18].mxu1 %vm189_vm3, %v1811_v63 }
0x1416   :  { %5064 = vmatpush3.bf16.msra.mxu1 %v5560_v28  ;;  %4725 = vmatprep.mubr.msk.f32.mxu1 %vm5404_vm0, %v5403_v0 }
0x1417   :  { %5071 = vmatprep.subr.bf16.mxu1 %v5405_v6 }
0x14e8   :  { %v1881_v60 = vpop.f32.mrb[18].mxu1 }
0x14e9   :  { %v1882_v1 = vadd.f32 %v5644_v12, %v1881_v60  ;;  %v4709_v3 = vpop.f32.mrb[19].mxu1 }
0x14eb   :  { %v4276_v4 = vmul.f32 -1.442695, %v1882_v1  ;;  %v1885_v14 = vmul.f32 0.909, %v1882_v1 }
0x14ed   :  { %5288 = vpow2.f32 %v4276_v4 }
0x14f7   :  { %v5289_v7 = vpop.eup %5288 }
0x14f8   :  { %v1889_v13 = vadd.f32 1.0, %v5289_v7 }
0x14fa   :  { %5290 = vrcp.f32 %v1889_v13 }
0x1504   :  { %v5291_v15 = vpop.eup %5290 }
0x1505   :  { %v1892_v16 = vmul.f32 %v5291_v15, %v1885_v14 }
0x1507   :  { %4719 = vmatmul.mubr.msk.f32.vlgmr.msra.gmra.mrb[20].mxu0 %vm189_vm3, %v1892_v16 }
0x1508   :  { %5067 = vmatpush3.bf16.msra.mxu0 %v5585_v45  ;;  %4736 = vmatprep.mubr.msk.f32.mxu0 %vm5404_vm0, %v5403_v0 }
0x1509   :  { %5068 = vmatprep.subr.bf16.mxu0 %v5405_v6 }
0x150c   :  { %5070 = vmatpush3.bf16.msra.mxu0 %v5595_v48 }
0x150d   :  { %5077 = vmatprep.subr.bf16.mxu0 %v5405_v6 }
0x15da   :  { %v1962_v17 = vpop.f32.mrb[20].mxu0 }
0x15db   :  { %v1963_v18 = vadd.f32 %v5657_v22, %v1962_v17  ;;  %v4720_v19 = vpop.f32.mrb[21].mxu0 }
0x15dd   :  { %5292 = vtanh.f32 %v1963_v18 }
0x15e7   :  { %v5293_v20 = vpop.eup %5292 }
0x15e8   :  { %v1974_v21 = vmul.f32 %v5293_v20, %v5819_v32  ;;  %v1968_v23 = vmul.f32 %v5293_v20, %v1697_v34  ;;  %v1980_v24 = vmul.f32 %v5293_v20, %v5821_v31  ;;  %v1967_v25 = vmul.f32 %v5293_v20, %v1692_v38  ;;  %v5868_v32 = vld [vmem:[#allocation2 + $0x6] sm:$0x3] }
0x15ea   :  { %1976 = vrot.lane.b32.xlu0 %v1974_v21, %s5410_s22  ;;  %1970 = vrot.lane.b32.xlu1 %v1968_v23, %s5411_s7 }
0x15ee   :  { %1982 = vrot.lane.b32.xlu1 %v1980_v24, %s5412_s9  ;;  %2238 = vperm.xlu0 %5209, %v4278_v47  }
0x15f2   :  { %2248 = vperm.xlu1 %5210, %v4278_v47   ;;  %5212 = vset.pattern.permute.xlu0 %v5408_v10 }
0x15f3   :  { %2233 = vperm.xlu0 %5212, %v4278_v47  }
0x15f6   :  { %5211 = vset.pattern.permute.xlu1 %v5406_v8 }
0x15f7   :  { %2258 = vperm.xlu1 %5211, %v4278_v47   ;;  %5213 = vset.pattern.permute.xlu0 %v5407_v9 }
0x15fb   :  { %5214 = vset.pattern.permute.xlu1 %v5409_v11 }
0x165c   :  { %v1971_v26 = vpop.permute.xlu1 %1970  ;;  %v1977_v29 = vpop.permute.xlu0 %1976 }
0x165d   :  { %v1973_v27 = vadd.f32 %v1971_v26, %v1967_v25  ;;  %v2272_v25 = vrot.slane %v5868_v32, %v5684_v46 }
0x165f   :  { %v1979_v41 = vadd.f32 %v1977_v29, %v1973_v27 }
0x1660   :  { %v1983_v33 = vpop.permute.xlu1 %1982 }
0x1661   :  { %v1985_v35 = vadd.f32 %v1983_v33, %v1979_v41 }
0x1663   :  { %v5858_v36 = vadd.f32 %v1985_v35, %v5784_v62  ;;  %v1994_v62 = vrot.slane %v5868_v32, %v5602_v51 }
0x1665   :  { %4726 = vmatmul.mubr.msk.f32.vlgmr.msra.gmra.mrb[20].mxu1 %vm356_vm4, %v5858_v36 }
0x1666   :  { %5073 = vmatpush3.bf16.msra.mxu1 %v5619_v2  ;;  %4747 = vmatprep.mubr.msk.f32.mxu1 %vm5404_vm0, %v5403_v0 }
0x1667   :  { %5074 = vmatprep.subr.bf16.mxu1 %v5405_v6 }
0x166a   :  { %5076 = vmatpush3.bf16.msra.mxu1 %v5629_v5 }
0x166b   :  { %5080 = vmatprep.subr.bf16.mxu1 %v5405_v6 }
0x166d   :  { %v2239_v3 = vpop.permute.xlu0 %2238 }
0x1671   :  { %v5893_v63 = vpop.permute.xlu1 %2248 }
0x1672   :  { %v2234_v14 = vpop.permute.xlu0 %2233 }
0x1676   :  { %v5895_v60 = vpop.permute.xlu1 %2258 }
0x1738   :  { %v2064_v31 = vpop.f32.mrb[20].mxu1 }
0x1739   :  { %v2065_v34 = vadd.f32 %v2064_v31, %v1994_v62  ;;  %v4727_v37 = vpop.f32.mrb[21].mxu1 }
0x173b   :  { %v4280_v38 = vmul.f32 -1.442695, %v2065_v34  ;;  %v2068_v42 = vmul.f32 0.909, %v2065_v34 }
0x173d   :  { %5294 = vpow2.f32 %v4280_v38 }
0x1747   :  { %v5295_v39 = vpop.eup %5294 }
0x1748   :  { %v2072_v40 = vadd.f32 1.0, %v5295_v39 }
0x174a   :  { %5296 = vrcp.f32 %v2072_v40 }
0x1754   :  { %v5297_v43 = vpop.eup %5296 }
0x1755   :  { %v2075_v44 = vmul.f32 %v5297_v43, %v2068_v42 }
0x1757   :  { %4737 = vmatmul.mubr.msk.f32.vlgmr.msra.gmra.mrb[22].mxu0 %vm189_vm3, %v2075_v44 }
0x1758   :  { %5079 = vmatpush3.bf16.msra.mxu0 %v5560_v28  ;;  %4754 = vmatprep.mubr.msk.f32.mxu0 %vm5404_vm0, %v5403_v0 }
0x1759   :  { %5086 = vmatprep.subr.bf16.mxu0 %v5405_v6 }
0x182a   :  { %v2145_v49 = vpop.f32.mrb[22].mxu0 }
0x182b   :  { %v2146_v53 = vadd.f32 %v5644_v12, %v2145_v49  ;;  %v4738_v54 = vpop.f32.mrb[23].mxu0 }
0x182d   :  { %v4282_v55 = vmul.f32 -1.442695, %v2146_v53  ;;  %v2149_v58 = vmul.f32 0.909, %v2146_v53 }
0x182f   :  { %5298 = vpow2.f32 %v4282_v55 }
0x1839   :  { %v5299_v56 = vpop.eup %5298 }
0x183a   :  { %v2153_v57 = vadd.f32 1.0, %v5299_v56 }
0x183c   :  { %5300 = vrcp.f32 %v2153_v57 }
0x1846   :  { %v5301_v59 = vpop.eup %5300 }
0x1847   :  { %v2156_v52 = vmul.f32 %v5301_v59, %v2149_v58 }
0x1849   :  { %4748 = vmatmul.mubr.msk.f32.vlgmr.msra.gmra.mrb[22].mxu1 %vm189_vm3, %v2156_v52 }
0x184a   :  { %5082 = vmatpush3.bf16.msra.mxu1 %v5585_v45  ;;  %4765 = vmatprep.mubr.msk.f32.mxu1 %vm5404_vm0, %v5403_v0 }
0x184b   :  { %5083 = vmatprep.subr.bf16.mxu1 %v5405_v6 }
0x184e   :  { %5085 = vmatpush3.bf16.msra.mxu1 %v5595_v48 }
0x184f   :  { %5092 = vmatprep.subr.bf16.mxu1 %v5405_v6 }
0x191c   :  { %v2226_v61 = vpop.f32.mrb[22].mxu1 }
0x191d   :  { %v2227_v30 = vadd.f32 %v5657_v22, %v2226_v61  ;;  %v4749_v50 = vpop.f32.mrb[23].mxu1 }
0x191f   :  { %5302 = vtanh.f32 %v2227_v30 }
0x1929   :  { %v5303_v1 = vpop.eup %5302 }
0x192a   :  { %v2241_v4 = vmul.f32 %v5303_v1, %v2239_v3  ;;  %v2261_v7 = vmul.f32 %v5303_v1, %v5895_v60  ;;  %v2251_v13 = vmul.f32 %v5303_v1, %v5893_v63  ;;  %v2236_v16 = vmul.f32 %v5303_v1, %v2234_v14 }
0x192c   :  { %2263 = vrot.lane.b32.xlu0 %v2261_v7, %s5412_s9  ;;  %2243 = vrot.lane.b32.xlu1 %v2241_v4, %s5411_s7 }
0x1930   :  { %2253 = vrot.lane.b32.xlu1 %v2251_v13, %s5410_s22 }
0x199e   :  { %v2244_v15 = vpop.permute.xlu1 %2243  ;;  %v2264_v20 = vpop.permute.xlu0 %2263 }
0x199f   :  { %v2246_v17 = vadd.f32 %v2244_v15, %v2236_v16 }
0x19a2   :  { %v2254_v18 = vpop.permute.xlu1 %2253 }
0x19a3   :  { %v2256_v19 = vadd.f32 %v2254_v18, %v2246_v17  ;;  %v4289_v18 = vld [vmem:[%s6161_s1 + $0x20] sm:$0xff] }
0x19a5   :  { %v2266_v21 = vadd.f32 %v2264_v20, %v2256_v19  ;;  %v5961_v20 = vld [vmem:[%s6171_s11] ss:$0 sm:$0xff] }
0x19a7   :  { %v2267_v23 = vmul.f32 0.5, %v2266_v21 }
0x19a9   :  { %v2268_v24 = vadd.f32 %v2267_v23, %v5858_v36 }
0x19ab   :  { %4755 = vmatmul.mubr.msk.f32.vlgmr.msra.gmra.mrb[24].mxu0 %vm356_vm4, %v2268_v24 }
0x19ac   :  { %5088 = vmatpush3.bf16.msra.mxu0 %v5619_v2  ;;  %4776 = vmatprep.mubr.msk.f32.mxu0 %vm5404_vm0, %v5403_v0 }
0x19ad   :  { %5089 = vmatprep.subr.bf16.mxu0 %v5405_v6 }
0x19b0   :  { %5091 = vmatpush3.bf16.msra.mxu0 %v5629_v5 }
0x19b1   :  { %5095 = vmatprep.subr.bf16.mxu0 %v5405_v6 }
0x1a7e   :  { %v2342_v26 = vpop.f32.mrb[24].mxu0 }
0x1a7f   :  { %v2343_v27 = vadd.f32 %v2342_v26, %v2272_v25  ;;  %v4756_v29 = vpop.f32.mrb[25].mxu0 }
0x1a81   :  { %v4285_v41 = vmul.f32 -1.442695, %v2343_v27  ;;  %v2346_v62 = vmul.f32 0.909, %v2343_v27 }
0x1a83   :  { %5304 = vpow2.f32 %v4285_v41 }
0x1a8d   :  { %v5305_v33 = vpop.eup %5304 }
0x1a8e   :  { %v2350_v35 = vadd.f32 1.0, %v5305_v33 }
0x1a90   :  { %5306 = vrcp.f32 %v2350_v35  ;;  %v5974_v35 = vld [vmem:[%s6173_s13] ss:$0 sm:$0xff] }
0x1a9a   :  { %v5307_v31 = vpop.eup %5306 }
0x1a9b   :  { %v2353_v34 = vmul.f32 %v5307_v31, %v2346_v62 }
0x1a9d   :  { %4766 = vmatmul.mubr.msk.f32.vlgmr.msra.gmra.mrb[24].mxu1 %vm189_vm3, %v2353_v34 }
0x1a9e   :  { %5094 = vmatpush3.bf16.msra.mxu1 %v5560_v28  ;;  %4783 = vmatprep.mubr.msk.f32.mxu1 %vm5404_vm0, %v5403_v0 }
0x1a9f   :  { %5101 = vmatprep.subr.bf16.mxu1 %v5405_v6 }
0x1b70   :  { %v2423_v32 = vpop.f32.mrb[24].mxu1 }
0x1b71   :  { %v2424_v37 = vadd.f32 %v5644_v12, %v2423_v32  ;;  %v4767_v38 = vpop.f32.mrb[25].mxu1 }
0x1b73   :  { %v4287_v39 = vmul.f32 -1.442695, %v2424_v37  ;;  %v2427_v43 = vmul.f32 0.909, %v2424_v37 }
0x1b75   :  { %5308 = vpow2.f32 %v4287_v39 }
0x1b7f   :  { %v5309_v40 = vpop.eup %5308 }
0x1b80   :  { %v2431_v42 = vadd.f32 1.0, %v5309_v40 }
0x1b82   :  { %5310 = vrcp.f32 %v2431_v42 }
0x1b8c   :  { %v5311_v44 = vpop.eup %5310 }
0x1b8d   :  { %v2434_v47 = vmul.f32 %v5311_v44, %v2427_v43 }
0x1b8f   :  { %4777 = vmatmul.mubr.msk.f32.vlgmr.msra.gmra.mrb[26].mxu0 %vm189_vm3, %v2434_v47 }
0x1b90   :  { %5097 = vmatpush3.bf16.msra.mxu0 %v5585_v45  ;;  %4794 = vmatprep.mubr.msk.f32.mxu0 %vm5404_vm0, %v5403_v0 }
0x1b91   :  { %5098 = vmatprep.subr.bf16.mxu0 %v5405_v6 }
0x1b94   :  { %5100 = vmatpush3.bf16.msra.mxu0 %v5595_v48 }
0x1b95   :  { %5107 = vmatprep.subr.bf16.mxu0 %v5405_v6 }
0x1c62   :  { %v2504_v12 = vpop.f32.mrb[26].mxu0 }
0x1c63   :  { %v2505_v49 = vadd.f32 %v5657_v22, %v2504_v12  ;;  %v4778_v53 = vpop.f32.mrb[27].mxu0 }
0x1c65   :  { %5312 = vtanh.f32 %v2505_v49 }
0x1c6f   :  { %v5313_v54 = vpop.eup %5312 }
0x1c70   :  { %v2516_v55 = vmul.f32 %v5313_v54, %v5893_v63  ;;  %v2510_v56 = vmul.f32 %v5313_v54, %v2239_v3  ;;  %v2522_v57 = vmul.f32 %v5313_v54, %v5895_v60  ;;  %v2509_v58 = vmul.f32 %v5313_v54, %v2234_v14  ;;  %v5942_v63 = vld [vmem:[#allocation2 + $0x8] sm:$0x3] }
0x1c72   :  { %2518 = vrot.lane.b32.xlu0 %v2516_v55, %s5410_s22  ;;  %2512 = vrot.lane.b32.xlu1 %v2510_v56, %s5411_s7 }
0x1c76   :  { %2524 = vrot.lane.b32.xlu1 %v2522_v57, %s5412_s9  ;;  %2780 = vperm.xlu0 %5213, %v4289_v18  }
0x1c7a   :  { %2790 = vperm.xlu1 %5214, %v4289_v18   ;;  %5216 = vset.pattern.permute.xlu0 %v5408_v10 }
0x1c7b   :  { %2775 = vperm.xlu0 %5216, %v4289_v18  }
0x1c7e   :  { %5215 = vset.pattern.permute.xlu1 %v5406_v8 }
0x1c7f   :  { %2800 = vperm.xlu1 %5215, %v4289_v18   ;;  %5217 = vset.pattern.permute.xlu0 %v5407_v9 }
0x1c83   :  { %5218 = vset.pattern.permute.xlu1 %v5409_v11 }
0x1ce4   :  { %v2513_v59 = vpop.permute.xlu1 %2512  ;;  %v2519_v61 = vpop.permute.xlu0 %2518 }
0x1ce5   :  { %v2515_v52 = vadd.f32 %v2513_v59, %v2509_v58  ;;  %v2814_v58 = vrot.slane %v5942_v63, %v5684_v46 }
0x1ce7   :  { %v2521_v30 = vadd.f32 %v2519_v61, %v2515_v52 }
0x1ce8   :  { %v2525_v22 = vpop.permute.xlu1 %2524 }
0x1ce9   :  { %v2527_v50 = vadd.f32 %v2525_v22, %v2521_v30 }
0x1ceb   :  { %v5932_v1 = vadd.f32 %v2527_v50, %v5858_v36  ;;  %v2536_v36 = vrot.slane %v5942_v63, %v5602_v51 }
0x1ced   :  { %4784 = vmatmul.mubr.msk.f32.vlgmr.msra.gmra.mrb[26].mxu1 %vm356_vm4, %v5932_v1 }
0x1cee   :  { %5103 = vmatpush3.bf16.msra.mxu1 %v5619_v2  ;;  %4805 = vmatprep.mubr.msk.f32.mxu1 %vm5404_vm0, %v5403_v0 }
0x1cef   :  { %5104 = vmatprep.subr.bf16.mxu1 %v5405_v6 }
0x1cf2   :  { %5106 = vmatpush3.bf16.msra.mxu1 %v5629_v5 }
0x1cf3   :  { %5110 = vmatprep.subr.bf16.mxu1 %v5405_v6 }
0x1cf5   :  { %v2781_v38 = vpop.permute.xlu0 %2780 }
0x1cf9   :  { %v5977_v34 = vpop.permute.xlu1 %2790 }
0x1cfa   :  { %v2776_v43 = vpop.permute.xlu0 %2775 }
0x1cfe   :  { %v5979_v32 = vpop.permute.xlu1 %2800 }
0x1dc0   :  { %v2606_v60 = vpop.f32.mrb[26].mxu1 }
0x1dc1   :  { %v2607_v3 = vadd.f32 %v2606_v60, %v2536_v36  ;;  %v4785_v4 = vpop.f32.mrb[27].mxu1 }
0x1dc3   :  { %v4291_v7 = vmul.f32 -1.442695, %v2607_v3  ;;  %v2610_v15 = vmul.f32 0.909, %v2607_v3 }
0x1dc5   :  { %5314 = vpow2.f32 %v4291_v7 }
0x1dcf   :  { %v5315_v13 = vpop.eup %5314 }
0x1dd0   :  { %v2614_v14 = vadd.f32 1.0, %v5315_v13 }
0x1dd2   :  { %5316 = vrcp.f32 %v2614_v14 }
0x1ddc   :  { %v5317_v16 = vpop.eup %5316 }
0x1ddd   :  { %v2617_v17 = vmul.f32 %v5317_v16, %v2610_v15 }
0x1ddf   :  { %4795 = vmatmul.mubr.msk.f32.vlgmr.msra.gmra.mrb[28].mxu0 %vm189_vm3, %v2617_v17 }
0x1de0   :  { %5109 = vmatpush3.bf16.msra.mxu0 %v5560_v28  ;;  %4812 = vmatprep.mubr.msk.f32.mxu0 %vm5404_vm0, %v5403_v0 }
0x1de1   :  { %5116 = vmatprep.subr.bf16.mxu0 %v5405_v6 }
0x1eb2   :  { %v2687_v19 = vpop.f32.mrb[28].mxu0 }
0x1eb3   :  { %v2688_v21 = vadd.f32 %v5961_v20, %v2687_v19  ;;  %v4796_v23 = vpop.f32.mrb[29].mxu0 }
0x1eb5   :  { %v4293_v24 = vmul.f32 -1.442695, %v2688_v21  ;;  %v2691_v27 = vmul.f32 0.909, %v2688_v21 }
0x1eb7   :  { %5318 = vpow2.f32 %v4293_v24 }
0x1ec1   :  { %v5319_v25 = vpop.eup %5318 }
0x1ec2   :  { %v2695_v26 = vadd.f32 1.0, %v5319_v25 }
0x1ec4   :  { %5320 = vrcp.f32 %v2695_v26 }
0x1ece   :  { %v5321_v29 = vpop.eup %5320 }
0x1ecf   :  { %v2698_v41 = vmul.f32 %v5321_v29, %v2691_v27 }
0x1ed1   :  { %4806 = vmatmul.mubr.msk.f32.vlgmr.msra.gmra.mrb[28].mxu1 %vm189_vm3, %v2698_v41 }
0x1ed2   :  { %5112 = vmatpush3.bf16.msra.mxu1 %v5585_v45  ;;  %4823 = vmatprep.mubr.msk.f32.mxu1 %vm5404_vm0, %v5403_v0 }
0x1ed3   :  { %5113 = vmatprep.subr.bf16.mxu1 %v5405_v6 }
0x1ed6   :  { %5115 = vmatpush3.bf16.msra.mxu1 %v5595_v48 }
0x1ed7   :  { %5122 = vmatprep.subr.bf16.mxu1 %v5405_v6 }
0x1fa4   :  { %v2768_v33 = vpop.f32.mrb[28].mxu1 }
0x1fa5   :  { %v2769_v62 = vadd.f32 %v5974_v35, %v2768_v33  ;;  %v4807_v31 = vpop.f32.mrb[29].mxu1 }
0x1fa7   :  { %5322 = vtanh.f32 %v2769_v62 }
0x1fb1   :  { %v5323_v37 = vpop.eup %5322 }
0x1fb2   :  { %v2783_v39 = vmul.f32 %v5323_v37, %v2781_v38  ;;  %v2803_v40 = vmul.f32 %v5323_v37, %v5979_v32  ;;  %v2793_v42 = vmul.f32 %v5323_v37, %v5977_v34  ;;  %v2778_v47 = vmul.f32 %v5323_v37, %v2776_v43 }
0x1fb4   :  { %2805 = vrot.lane.b32.xlu0 %v2803_v40, %s5412_s9  ;;  %2785 = vrot.lane.b32.xlu1 %v2783_v39, %s5411_s7 }
0x1fb8   :  { %2795 = vrot.lane.b32.xlu1 %v2793_v42, %s5410_s22 }
0x2026   :  { %v2786_v44 = vpop.permute.xlu1 %2785  ;;  %v2806_v54 = vpop.permute.xlu0 %2805 }
0x2027   :  { %v2788_v12 = vadd.f32 %v2786_v44, %v2778_v47 }
0x202a   :  { %v2796_v49 = vpop.permute.xlu1 %2795 }
0x202b   :  { %v2798_v53 = vadd.f32 %v2796_v49, %v2788_v12 }
0x202d   :  { %v2808_v55 = vadd.f32 %v2806_v54, %v2798_v53  ;;  %v4300_v54 = vld [vmem:[%s6161_s1 + $0x28] sm:$0xff] }
0x202f   :  { %v2809_v56 = vmul.f32 0.5, %v2808_v55 }
0x2031   :  { %v2810_v57 = vadd.f32 %v2809_v56, %v5932_v1 }
0x2033   :  { %4813 = vmatmul.mubr.msk.f32.vlgmr.msra.gmra.mrb[30].mxu0 %vm356_vm4, %v2810_v57 }
0x2034   :  { %5118 = vmatpush3.bf16.msra.mxu0 %v5619_v2  ;;  %4834 = vmatprep.mubr.msk.f32.mxu0 %vm5404_vm0, %v5403_v0 }
0x2035   :  { %5119 = vmatprep.subr.bf16.mxu0 %v5405_v6 }
0x2038   :  { %5121 = vmatpush3.bf16.msra.mxu0 %v5629_v5 }
0x2039   :  { %5125 = vmatprep.subr.bf16.mxu0 %v5405_v6 }
0x2106   :  { %v2884_v59 = vpop.f32.mrb[30].mxu0 }
0x2107   :  { %v2885_v52 = vadd.f32 %v2884_v59, %v2814_v58  ;;  %v4814_v61 = vpop.f32.mrb[31].mxu0 }
0x2109   :  { %v4296_v30 = vmul.f32 -1.442695, %v2885_v52  ;;  %v2888_v36 = vmul.f32 0.909, %v2885_v52 }
0x210b   :  { %5324 = vpow2.f32 %v4296_v30 }
0x2115   :  { %v5325_v22 = vpop.eup %5324 }
0x2116   :  { %v2892_v50 = vadd.f32 1.0, %v5325_v22 }
0x2118   :  { %5326 = vrcp.f32 %v2892_v50 }
0x2122   :  { %v5327_v60 = vpop.eup %5326 }
0x2123   :  { %v2895_v3 = vmul.f32 %v5327_v60, %v2888_v36 }
0x2125   :  { %4824 = vmatmul.mubr.msk.f32.vlgmr.msra.gmra.mrb[30].mxu1 %vm189_vm3, %v2895_v3 }
0x2126   :  { %5124 = vmatpush3.bf16.msra.mxu1 %v5560_v28  ;;  %4841 = vmatprep.mubr.msk.f32.mxu1 %vm5404_vm0, %v5403_v0 }
0x2127   :  { %5131 = vmatprep.subr.bf16.mxu1 %v5405_v6 }
0x21f8   :  { %v2965_v63 = vpop.f32.mrb[30].mxu1 }
0x21f9   :  { %v2966_v4 = vadd.f32 %v5961_v20, %v2965_v63  ;;  %v4825_v7 = vpop.f32.mrb[31].mxu1 }
0x21fb   :  { %v4298_v13 = vmul.f32 -1.442695, %v2966_v4  ;;  %v2969_v16 = vmul.f32 0.909, %v2966_v4 }
0x21fd   :  { %5328 = vpow2.f32 %v4298_v13 }
0x2207   :  { %v5329_v14 = vpop.eup %5328 }
0x2208   :  { %v2973_v15 = vadd.f32 1.0, %v5329_v14 }
0x220a   :  { %5330 = vrcp.f32 %v2973_v15 }
0x2214   :  { %v5331_v17 = vpop.eup %5330 }
0x2215   :  { %v2976_v18 = vmul.f32 %v5331_v17, %v2969_v16 }
0x2217   :  { %4835 = vmatmul.mubr.msk.f32.vlgmr.msra.gmra.mrb[32].mxu0 %vm189_vm3, %v2976_v18 }
0x2218   :  { %5127 = vmatpush3.bf16.msra.mxu0 %v5585_v45  ;;  %4852 = vmatprep.mubr.msk.f32.mxu0 %vm5404_vm0, %v5403_v0 }
0x2219   :  { %5128 = vmatprep.subr.bf16.mxu0 %v5405_v6 }
0x221c   :  { %5130 = vmatpush3.bf16.msra.mxu0 %v5595_v48 }
0x221d   :  { %5137 = vmatprep.subr.bf16.mxu0 %v5405_v6 }
0x22ea   :  { %v3046_v19 = vpop.f32.mrb[32].mxu0 }
0x22eb   :  { %v3047_v21 = vadd.f32 %v5974_v35, %v3046_v19  ;;  %v4836_v23 = vpop.f32.mrb[33].mxu0 }
0x22ed   :  { %5332 = vtanh.f32 %v3047_v21 }
0x22f7   :  { %v5333_v24 = vpop.eup %5332 }
0x22f8   :  { %v3058_v25 = vmul.f32 %v5333_v24, %v5977_v34  ;;  %v3052_v26 = vmul.f32 %v5333_v24, %v2781_v38  ;;  %v3064_v27 = vmul.f32 %v5333_v24, %v5979_v32  ;;  %v3051_v29 = vmul.f32 %v5333_v24, %v2776_v43  ;;  %v6026_v34 = vld [vmem:[#allocation2 + $0xa] sm:$0x3] }
0x22fa   :  { %3060 = vrot.lane.b32.xlu0 %v3058_v25, %s5410_s22  ;;  %3054 = vrot.lane.b32.xlu1 %v3052_v26, %s5411_s7  ;;  %v3356_v26 = vrot.slane %v6026_v34, %v5684_v46 }
0x22fe   :  { %3066 = vrot.lane.b32.xlu1 %v3064_v27, %s5412_s9  ;;  %3322 = vperm.xlu0 %5217, %v4300_v54  }
0x2302   :  { %3332 = vperm.xlu1 %5218, %v4300_v54   ;;  %5220 = vset.pattern.permute.xlu0 %v5408_v10 }
0x2303   :  { %3317 = vperm.xlu0 %5220, %v4300_v54  }
0x2306   :  { %5219 = vset.pattern.permute.xlu1 %v5406_v8 }
0x2307   :  { %3342 = vperm.xlu1 %5219, %v4300_v54   ;;  %5221 = vset.pattern.permute.xlu0 %v5407_v9 }
0x230b   :  { %5222 = vset.pattern.permute.xlu1 %v5409_v11 }
0x236c   :  { %v3055_v41 = vpop.permute.xlu1 %3054  ;;  %v3061_v62 = vpop.permute.xlu0 %3060 }
0x236d   :  { %v3057_v33 = vadd.f32 %v3055_v41, %v3051_v29 }
0x236f   :  { %v3063_v31 = vadd.f32 %v3061_v62, %v3057_v33 }
0x2370   :  { %v3067_v37 = vpop.permute.xlu1 %3066 }
0x2371   :  { %v3069_v39 = vadd.f32 %v3067_v37, %v3063_v31 }
0x2373   :  { %v6016_v40 = vadd.f32 %v3069_v39, %v5932_v1  ;;  %v3078_v1 = vrot.slane %v6026_v34, %v5602_v51 }
0x2375   :  { %4842 = vmatmul.mubr.msk.f32.vlgmr.msra.gmra.mrb[32].mxu1 %vm356_vm4, %v6016_v40 }
0x2376   :  { %5133 = vmatpush3.bf16.msra.mxu1 %v5619_v2  ;;  %4863 = vmatprep.mubr.msk.f32.mxu1 %vm5404_vm0, %v5403_v0 }
0x2377   :  { %5134 = vmatprep.subr.bf16.mxu1 %v5405_v6 }
0x237a   :  { %5136 = vmatpush3.bf16.msra.mxu1 %v5629_v5 }
0x237b   :  { %5140 = vmatprep.subr.bf16.mxu1 %v5405_v6 }
0x237d   :  { %v3323_v63 = vpop.permute.xlu0 %3322 }
0x2381   :  { %v6051_v36 = vpop.permute.xlu1 %3332 }
0x2382   :  { %v3318_v14 = vpop.permute.xlu0 %3317 }
0x2386   :  { %v6053_v60 = vpop.permute.xlu1 %3342 }
0x2448   :  { %v3148_v32 = vpop.f32.mrb[32].mxu1 }
0x2449   :  { %v3149_v38 = vadd.f32 %v3148_v32, %v3078_v1  ;;  %v4843_v42 = vpop.f32.mrb[33].mxu1 }
0x244b   :  { %v4302_v43 = vmul.f32 -1.442695, %v3149_v38  ;;  %v3152_v12 = vmul.f32 0.909, %v3149_v38 }
0x244d   :  { %5334 = vpow2.f32 %v4302_v43 }
0x2457   :  { %v5335_v44 = vpop.eup %5334 }
0x2458   :  { %v3156_v47 = vadd.f32 1.0, %v5335_v44 }
0x245a   :  { %5336 = vrcp.f32 %v3156_v47 }
0x2464   :  { %v5337_v49 = vpop.eup %5336 }
0x2465   :  { %v3159_v53 = vmul.f32 %v5337_v49, %v3152_v12 }
0x2467   :  { %4853 = vmatmul.mubr.msk.f32.vlgmr.msra.gmra.mrb[34].mxu0 %vm189_vm3, %v3159_v53 }
0x2468   :  { %5139 = vmatpush3.bf16.msra.mxu0 %v5560_v28  ;;  %4870 = vmatprep.mubr.msk.f32.mxu0 %vm5404_vm0, %v5403_v0 }
0x2469   :  { %5146 = vmatprep.subr.bf16.mxu0 %v5405_v6 }
0x253a   :  { %v3229_v55 = vpop.f32.mrb[34].mxu0 }
0x253b   :  { %v3230_v56 = vadd.f32 %v5961_v20, %v3229_v55  ;;  %v4854_v57 = vpop.f32.mrb[35].mxu0 }
0x253d   :  { %v4304_v58 = vmul.f32 -1.442695, %v3230_v56  ;;  %v3233_v61 = vmul.f32 0.909, %v3230_v56 }
0x253f   :  { %5338 = vpow2.f32 %v4304_v58 }
0x2549   :  { %v5339_v59 = vpop.eup %5338 }
0x254a   :  { %v3237_v52 = vadd.f32 1.0, %v5339_v59 }
0x254c   :  { %5340 = vrcp.f32 %v3237_v52 }
0x2556   :  { %v5341_v30 = vpop.eup %5340 }
0x2557   :  { %v3240_v22 = vmul.f32 %v5341_v30, %v3233_v61 }
0x2559   :  { %4864 = vmatmul.mubr.msk.f32.vlgmr.msra.gmra.mrb[34].mxu1 %vm189_vm3, %v3240_v22 }
0x255a   :  { %5142 = vmatpush3.bf16.msra.mxu1 %v5585_v45  ;;  %4881 = vmatprep.mubr.msk.f32.mxu1 %vm5404_vm0, %v5403_v0 }
0x255b   :  { %5143 = vmatprep.subr.bf16.mxu1 %v5405_v6 }
0x255e   :  { %5145 = vmatpush3.bf16.msra.mxu1 %v5595_v48 }
0x255f   :  { %5152 = vmatprep.subr.bf16.mxu1 %v5405_v6 }
0x262c   :  { %v3310_v9 = vpop.f32.mrb[34].mxu1 }
0x262d   :  { %v3311_v11 = vadd.f32 %v5974_v35, %v3310_v9  ;;  %v4865_v50 = vpop.f32.mrb[35].mxu1 }
0x262f   :  { %5342 = vtanh.f32 %v3311_v11 }
0x2639   :  { %v5343_v3 = vpop.eup %5342 }
0x263a   :  { %v3325_v4 = vmul.f32 %v5343_v3, %v3323_v63  ;;  %v3345_v7 = vmul.f32 %v5343_v3, %v6053_v60  ;;  %v3335_v13 = vmul.f32 %v5343_v3, %v6051_v36  ;;  %v3320_v16 = vmul.f32 %v5343_v3, %v3318_v14 }
0x263c   :  { %3347 = vrot.lane.b32.xlu0 %v3345_v7, %s5412_s9  ;;  %3327 = vrot.lane.b32.xlu1 %v3325_v4, %s5411_s7 }
0x2640   :  { %3337 = vrot.lane.b32.xlu1 %v3335_v13, %s5410_s22 }
0x26ae   :  { %v3328_v15 = vpop.permute.xlu1 %3327  ;;  %v3348_v21 = vpop.permute.xlu0 %3347 }
0x26af   :  { %v3330_v17 = vadd.f32 %v3328_v15, %v3320_v16 }
0x26b2   :  { %v3338_v18 = vpop.permute.xlu1 %3337 }
0x26b3   :  { %v3340_v19 = vadd.f32 %v3338_v18, %v3330_v17 }
0x26b5   :  { %v3350_v23 = vadd.f32 %v3348_v21, %v3340_v19 }
0x26b7   :  { %v3351_v24 = vmul.f32 0.5, %v3350_v23 }
0x26b9   :  { %v3352_v25 = vadd.f32 %v3351_v24, %v6016_v40 }
0x26bb   :  { %4871 = vmatmul.mubr.msk.f32.vlgmr.msra.gmra.mrb[36].mxu0 %vm356_vm4, %v3352_v25 }
0x26bc   :  { %5148 = vmatpush3.bf16.msra.mxu0 %v5619_v2  ;;  %4892 = vmatprep.mubr.msk.f32.mxu0 %vm5404_vm0, %v5403_v0 }
0x26bd   :  { %5149 = vmatprep.subr.bf16.mxu0 %v5405_v6 }
0x26c0   :  { %5151 = vmatpush3.bf16.msra.mxu0 %v5629_v5 }
0x26c1   :  { %5155 = vmatprep.subr.bf16.mxu0 %v5405_v6 }
0x278e   :  { %v3426_v27 = vpop.f32.mrb[36].mxu0 }
0x278f   :  { %v3427_v29 = vadd.f32 %v3426_v27, %v3356_v26  ;;  %v4872_v41 = vpop.f32.mrb[37].mxu0 }
0x2791   :  { %v4307_v33 = vmul.f32 -1.442695, %v3427_v29  ;;  %v3430_v37 = vmul.f32 0.909, %v3427_v29 }
0x2793   :  { %5344 = vpow2.f32 %v4307_v33 }
0x279d   :  { %v5345_v62 = vpop.eup %5344 }
0x279e   :  { %v3434_v31 = vadd.f32 1.0, %v5345_v62 }
0x27a0   :  { %5346 = vrcp.f32 %v3434_v31 }
0x27aa   :  { %v5347_v39 = vpop.eup %5346 }
0x27ab   :  { %v3437_v1 = vmul.f32 %v5347_v39, %v3430_v37 }
0x27ad   :  { %4882 = vmatmul.mubr.msk.f32.vlgmr.msra.gmra.mrb[36].mxu1 %vm189_vm3, %v3437_v1 }
0x27ae   :  { %5154 = vmatpush3.bf16.msra.mxu1 %v5560_v28  ;;  %4899 = vmatprep.mubr.msk.f32.mxu1 %vm5404_vm0, %v5403_v0 }
0x27af   :  { %5161 = vmatprep.subr.bf16.mxu1 %v5405_v6 }
0x2880   :  { %v3507_v34 = vpop.f32.mrb[36].mxu1 }
0x2881   :  { %v3508_v32 = vadd.f32 %v5961_v20, %v3507_v34  ;;  %v4883_v38 = vpop.f32.mrb[37].mxu1 }
0x2883   :  { %v4309_v42 = vmul.f32 -1.442695, %v3508_v32  ;;  %v3511_v47 = vmul.f32 0.909, %v3508_v32 }
0x2885   :  { %5348 = vpow2.f32 %v4309_v42 }
0x288f   :  { %v5349_v43 = vpop.eup %5348 }
0x2890   :  { %v3515_v44 = vadd.f32 1.0, %v5349_v43 }
0x2892   :  { %5350 = vrcp.f32 %v3515_v44 }
0x289c   :  { %v5351_v12 = vpop.eup %5350 }
0x289d   :  { %v3518_v49 = vmul.f32 %v5351_v12, %v3511_v47 }
0x289f   :  { %4893 = vmatmul.mubr.msk.f32.vlgmr.msra.gmra.mrb[38].mxu0 %vm189_vm3, %v3518_v49 }
0x28a0   :  { %5157 = vmatpush3.bf16.msra.mxu0 %v5585_v45  ;;  %4910 = vmatprep.mubr.msk.f32.mxu0 %vm5404_vm0, %v5403_v0 }
0x28a1   :  { %5158 = vmatprep.subr.bf16.mxu0 %v5405_v6 }
0x28a4   :  { %5160 = vmatpush3.bf16.msra.mxu0 %v5595_v48 }
0x28a5   :  { %5167 = vmatprep.subr.bf16.mxu0 %v5405_v6 }
0x2972   :  { %v3588_v53 = vpop.f32.mrb[38].mxu0 }
0x2973   :  { %v3589_v54 = vadd.f32 %v5974_v35, %v3588_v53  ;;  %v4894_v55 = vpop.f32.mrb[39].mxu0 }
0x2975   :  { %5352 = vtanh.f32 %v3589_v54 }
0x297f   :  { %v5353_v56 = vpop.eup %5352 }
0x2980   :  { %v3600_v57 = vmul.f32 %v5353_v56, %v6051_v36  ;;  %v3594_v58 = vmul.f32 %v5353_v56, %v3323_v63  ;;  %v3606_v59 = vmul.f32 %v5353_v56, %v6053_v60  ;;  %v3593_v52 = vmul.f32 %v5353_v56, %v3318_v14  ;;  %v6100_v36 = vld [vmem:[#allocation2 + $0xc] sm:$0x3] }
0x2981   :  { %v3898_v49 = vrot.slane %v6100_v36, %v5684_v46 }
0x2982   :  { %3602 = vrot.lane.b32.xlu0 %v3600_v57, %s5410_s22  ;;  %3596 = vrot.lane.b32.xlu1 %v3594_v58, %s5411_s7 }
0x2986   :  { %3608 = vrot.lane.b32.xlu1 %v3606_v59, %s5412_s9 }
0x29f4   :  { %v3597_v61 = vpop.permute.xlu1 %3596  ;;  %v3603_v22 = vpop.permute.xlu0 %3602 }
0x29f5   :  { %v3599_v30 = vadd.f32 %v3597_v61, %v3593_v52 }
0x29f7   :  { %v3605_v9 = vadd.f32 %v3603_v22, %v3599_v30 }
0x29f8   :  { %v3609_v11 = vpop.permute.xlu1 %3608 }
0x29f9   :  { %v3611_v50 = vadd.f32 %v3609_v11, %v3605_v9 }
0x29fb   :  { %v6090_v3 = vadd.f32 %v3611_v50, %v6016_v40  ;;  %v3620_v40 = vrot.slane %v6100_v36, %v5602_v51  ;;  %v4311_v51 = vld [vmem:[%s6161_s1 + $0x30] sm:$0xff] }
0x29fc   :  { %3864 = vperm.xlu0 %5221, %v4311_v51   ;;  %3874 = vperm.xlu1 %5222, %v4311_v51  }
0x29fd   :  { %4900 = vmatmul.mubr.msk.f32.vlgmr.msra.gmra.mrb[38].mxu1 %vm356_vm4, %v6090_v3 }
0x29fe   :  { %5163 = vmatpush3.bf16.msra.mxu1 %v5619_v2  ;;  %4921 = vmatprep.mubr.msk.f32.mxu1 %vm5404_vm0, %v5403_v0 }
0x29ff   :  { %5164 = vmatprep.subr.bf16.mxu1 %v5405_v6 }
0x2a00   :  { %5224 = vset.pattern.permute.xlu0 %v5408_v10  ;;  %5223 = vset.pattern.permute.xlu1 %v5406_v8 }
0x2a01   :  { %3859 = vperm.xlu0 %5224, %v4311_v51   ;;  %3884 = vperm.xlu1 %5223, %v4311_v51  }
0x2a02   :  { %5166 = vmatpush3.bf16.msra.mxu1 %v5629_v5 }
0x2a03   :  { %5170 = vmatprep.subr.bf16.mxu1 %v5405_v6 }
0x2a05   :  { %5225 = vset.pattern.permute.xlu0 %v5406_v8 }
0x2a7b   :  { %v3875_v41 = vpop.permute.xlu1 %3874  ;;  %v3865_v31 = vpop.permute.xlu0 %3864 }
0x2a80   :  { %v6124_v33 = vpop.permute.xlu1 %3884  ;;  %v3860_v39 = vpop.permute.xlu0 %3859 }
0x2ad0   :  { %v3690_v60 = vpop.f32.mrb[38].mxu1 }
0x2ad1   :  { %v3691_v63 = vadd.f32 %v3690_v60, %v3620_v40  ;;  %v4901_v4 = vpop.f32.mrb[39].mxu1 }
0x2ad3   :  { %v4313_v7 = vmul.f32 -1.442695, %v3691_v63  ;;  %v3694_v15 = vmul.f32 0.909, %v3691_v63 }
0x2ad5   :  { %5354 = vpow2.f32 %v4313_v7 }
0x2adf   :  { %v5355_v13 = vpop.eup %5354 }
0x2ae0   :  { %v3698_v14 = vadd.f32 1.0, %v5355_v13 }
0x2ae2   :  { %5356 = vrcp.f32 %v3698_v14 }
0x2aec   :  { %v5357_v16 = vpop.eup %5356 }
0x2aed   :  { %v3701_v17 = vmul.f32 %v5357_v16, %v3694_v15 }
0x2aef   :  { %4911 = vmatmul.mubr.msk.f32.vlgmr.msra.gmra.mrb[40].mxu0 %vm189_vm3, %v3701_v17 }
0x2af0   :  { %5169 = vmatpush3.bf16.msra.mxu0 %v5560_v28  ;;  %4928 = vmatprep.mubr.msk.f32.mxu0 %vm5404_vm0, %v5403_v0 }
0x2af1   :  { %5176 = vmatprep.subr.bf16.mxu0 %v5405_v6 }
0x2bc2   :  { %v3771_v28 = vpop.f32.mrb[40].mxu0 }
0x2bc3   :  { %v3772_v18 = vadd.f32 %v5961_v20, %v3771_v28  ;;  %v4912_v19 = vpop.f32.mrb[41].mxu0 }
0x2bc5   :  { %v4315_v21 = vmul.f32 -1.442695, %v3772_v18  ;;  %v3775_v25 = vmul.f32 0.909, %v3772_v18 }
0x2bc7   :  { %5358 = vpow2.f32 %v4315_v21 }
0x2bd1   :  { %v5359_v23 = vpop.eup %5358 }
0x2bd2   :  { %v3779_v24 = vadd.f32 1.0, %v5359_v23 }
0x2bd4   :  { %5360 = vrcp.f32 %v3779_v24 }
0x2bde   :  { %v5361_v26 = vpop.eup %5360 }
0x2bdf   :  { %v3782_v27 = vmul.f32 %v5361_v26, %v3775_v25 }
0x2be1   :  { %4922 = vmatmul.mubr.msk.f32.vlgmr.msra.gmra.mrb[40].mxu1 %vm189_vm3, %v3782_v27 }
0x2be2   :  { %5172 = vmatpush3.bf16.msra.mxu1 %v5585_v45  ;;  %4939 = vmatprep.mubr.msk.f32.mxu1 %vm5404_vm0, %v5403_v0 }
0x2be3   :  { %5173 = vmatprep.subr.bf16.mxu1 %v5405_v6 }
0x2be6   :  { %5175 = vmatpush3.bf16.msra.mxu1 %v5595_v48 }
0x2be7   :  { %5182 = vmatprep.subr.bf16.mxu1 %v5405_v6 }
0x2cb4   :  { %v3852_v8 = vpop.f32.mrb[40].mxu1 }
0x2cb5   :  { %v3853_v10 = vadd.f32 %v5974_v35, %v3852_v8  ;;  %v4923_v29 = vpop.f32.mrb[41].mxu1 }
0x2cb7   :  { %5362 = vtanh.f32 %v3853_v10 }
0x2cc1   :  { %v5363_v62 = vpop.eup %5362 }
0x2cc2   :  { %v3867_v45 = vmul.f32 %v5363_v62, %v3865_v31  ;;  %v3887_v37 = vmul.f32 %v5363_v62, %v6124_v33  ;;  %v3877_v48 = vmul.f32 %v5363_v62, %v3875_v41  ;;  %v3862_v34 = vmul.f32 %v5363_v62, %v3860_v39 }
0x2cc4   :  { %3889 = vrot.lane.b32.xlu0 %v3887_v37, %s5412_s9  ;;  %3869 = vrot.lane.b32.xlu1 %v3867_v45, %s5411_s7 }
0x2cc8   :  { %3879 = vrot.lane.b32.xlu1 %v3877_v48, %s5410_s22 }
0x2d36   :  { %v3870_v1 = vpop.permute.xlu1 %3869  ;;  %v3890_v43 = vpop.permute.xlu0 %3889 }
0x2d37   :  { %v3872_v32 = vadd.f32 %v3870_v1, %v3862_v34 }
0x2d3a   :  { %v3880_v38 = vpop.permute.xlu1 %3879 }
0x2d3b   :  { %v3882_v42 = vadd.f32 %v3880_v38, %v3872_v32 }
0x2d3d   :  { %v3892_v44 = vadd.f32 %v3890_v43, %v3882_v42 }
0x2d3f   :  { %v3893_v47 = vmul.f32 0.5, %v3892_v44 }
0x2d41   :  { %v3894_v12 = vadd.f32 %v3893_v47, %v6090_v3 }
0x2d43   :  { %4929 = vmatmul.mubr.msk.f32.vlgmr.msra.gmra.mrb[42].mxu0 %vm356_vm4, %v3894_v12 }
0x2d44   :  { %5178 = vmatpush3.bf16.msra.mxu0 %v5619_v2  ;;  %4950 = vmatprep.mubr.msk.f32.mxu0 %vm5404_vm0, %v5403_v0 }
0x2d45   :  { %5179 = vmatprep.subr.bf16.mxu0 %v5405_v6 }
0x2d48   :  { %5181 = vmatpush3.bf16.msra.mxu0 %v5629_v5 }
0x2e16   :  { %v3968_v53 = vpop.f32.mrb[42].mxu0 }
0x2e17   :  { %v3969_v54 = vadd.f32 %v3968_v53, %v3898_v49  ;;  %v4930_v55 = vpop.f32.mrb[43].mxu0 }
0x2e19   :  { %v4318_v56 = vmul.f32 -1.442695, %v3969_v54  ;;  %v3972_v59 = vmul.f32 0.909, %v3969_v54 }
0x2e1b   :  { %5364 = vpow2.f32 %v4318_v56 }
0x2e25   :  { %v5365_v57 = vpop.eup %5364 }
0x2e26   :  { %v3976_v58 = vadd.f32 1.0, %v5365_v57 }
0x2e28   :  { %5366 = vrcp.f32 %v3976_v58 }
0x2e32   :  { %v5367_v2 = vpop.eup %5366 }
0x2e33   :  { %v3979_v52 = vmul.f32 %v5367_v2, %v3972_v59 }
0x2e35   :  { %4940 = vmatmul.mubr.msk.f32.vlgmr.msra.gmra.mrb[42].mxu1 %vm189_vm3, %v3979_v52 }
0x2e36   :  { %4957 = vmatprep.mubr.msk.f32.mxu1 %vm5404_vm0, %v5403_v0  ;;  %v88_v0 = vld [vmem:[%s6174_s14] sm:$0xff] }
0x2f08   :  { %v4049_v6 = vpop.f32.mrb[42].mxu1 }
0x2f09   :  { %v4050_v5 = vadd.f32 %v5961_v20, %v4049_v6  ;;  %v4941_v46 = vpop.f32.mrb[43].mxu1  ;;  %v89_v20 = vld [vmem:[%s6174_s14 + $0x8] sm:$0xff] }
0x2f0a   :  { %v5183_v63 = vpack.c.bf16 %v89_v20, %v88_v0 }
0x2f0b   :  { %v4320_v61 = vmul.f32 -1.442695, %v4050_v5  ;;  %v4053_v9 = vmul.f32 0.909, %v4050_v5 }
0x2f0c   :  { %5184 = vmatpush3.bf16.msra.mxu1 %v5183_v63 }
0x2f0d   :  { %5368 = vpow2.f32 %v4320_v61 }
0x2f17   :  { %v5369_v30 = vpop.eup %5368 }
0x2f18   :  { %v4057_v22 = vadd.f32 1.0, %v5369_v30 }
0x2f1a   :  { %5370 = vrcp.f32 %v4057_v22 }
0x2f24   :  { %v5371_v11 = vpop.eup %5370 }
0x2f25   :  { %v4060_v50 = vmul.f32 %v5371_v11, %v4053_v9 }
0x2f27   :  { %4951 = vmatmul.mubr.msk.f32.vlgmr.msra.gmra.mrb[44].mxu0 %vm189_vm3, %v4060_v50 }
0x2ffa   :  { %v4130_v36 = vpop.f32.mrb[44].mxu0 }
0x2ffb   :  { %v4131_v40 = vadd.f32 %v5974_v35, %v4130_v36  ;;  %v4952_v60 = vpop.f32.mrb[45].mxu0 }
0x2ffd   :  { %5372 = vtanh.f32 %v4131_v40 }
0x3007   :  { %v5373_v4 = vpop.eup %5372 }
0x3008   :  { %v4142_v7 = vmul.f32 %v5373_v4, %v3875_v41  ;;  %v4136_v13 = vmul.f32 %v5373_v4, %v3865_v31  ;;  %v4148_v35 = vmul.f32 %v5373_v4, %v6124_v33  ;;  %v4135_v14 = vmul.f32 %v5373_v4, %v3860_v39 }
0x300a   :  { %4144 = vrot.lane.b32.xlu0 %v4142_v7, %s5410_s22  ;;  %4138 = vrot.lane.b32.xlu1 %v4136_v13, %s5411_s7 }
0x300e   :  { %4150 = vrot.lane.b32.xlu1 %v4148_v35, %s5412_s9 }
0x307c   :  { %v4139_v15 = vpop.permute.xlu1 %4138  ;;  %v4145_v17 = vpop.permute.xlu0 %4144 }
0x307d   :  { %v4141_v16 = vadd.f32 %v4139_v15, %v4135_v14 }
0x307f   :  { %v4147_v51 = vadd.f32 %v4145_v17, %v4141_v16 }
0x3080   :  { %v4151_v28 = vpop.permute.xlu1 %4150 }
0x3081   :  { %v4153_v18 = vadd.f32 %v4151_v28, %v4147_v51 }
0x3083   :  { %v4154_v19 = vadd.f32 %v4153_v18, %v6090_v3 }
0x3085   :  { %4958 = vmatmul.mubr.msk.f32.vlgmr.msra.gmra.mrb[44].mxu1 %vm356_vm4, %v4154_v19 }
0x3158   :  { %v4224_v21 = vpop.f32.mrb[44].mxu1 }
0x3159   :  { %4229 = vst.msk [vmem:[%s6175_s15] sm:$0xff] %vm4228_vm5, %v4224_v21  ;;  %v4959_v23 = vpop.f32.mrb[45].mxu1 }
0x315a   :  { %4234 = vsyncpa [#allocation3], 1 }

</bundles_post_ra>
